<compile_context>
chip_gen: v7x
topology: tpu7x:2x2x1
jax: 0.10.0
libtpu: 0.0.40
codegen_flags: <defaults>
</compile_context>

<pallas_src>
import functools

import jax
import jax.numpy as jnp
from jax.experimental import pallas as pl
from jax.experimental.pallas import tpu as pltpu


def _phase_encoder_kernel(w1_ref, b1_ref, w2_ref, b2_ref, x_ref, o_ref, h_ref,
                          *, cin, cmid, cout, kw, t1, t2):
    """Fused conv1(+folded norm) -> conv2 on one block of B*F rows.

    x_ref : (cin,  g, T)      VMEM input block        (T on lanes)
    h_ref : (cmid, g, t1+2)   VMEM scratch, zero cols 0 / t1+1 give conv2's pad
    o_ref : (cout, g, t2)     VMEM output block       (t2 on lanes)
    w*/b* : flat f32 arrays in SMEM (scalar broadcasts)
    """
    g = x_ref.shape[1]

    # Re-zero the scratch every grid step (scratch persists across steps and
    # with "parallel" megacore sharding a given core may never see step 0, so
    # no pl.when(i == 0) guard).  Columns 0 and t1+1 stay zero -> conv2 pad.
    h_ref[...] = jnp.zeros_like(h_ref)

    # ---- conv1 (+ eval-mode norm folded into w1/b1) ------------------------
    x_taps = []
    for c in range(cin):
        xc = x_ref[c].astype(jnp.float32)                       # (g, T)
        x_taps.append([xc[:, k:k + t1] for k in range(kw)])     # shifted views

    for o in range(cmid):
        acc = jnp.full((g, t1), b1_ref[o], dtype=jnp.float32)
        for c in range(cin):
            for k in range(kw):
                acc = acc + w1_ref[(o * cin + c) * kw + k] * x_taps[c][k]
        h_ref[o, :, 1:1 + t1] = acc

    # ---- conv2 (padding (0,1) along T via the zero scratch columns) --------
    h_taps = []
    for m in range(cmid):
        hm = h_ref[m]                                           # (g, t1+2)
        h_taps.append([hm[:, k:k + t2] for k in range(kw)])

    for o2 in range(cout):
        acc = jnp.full((g, t2), b2_ref[o2], dtype=jnp.float32)
        for m in range(cmid):
            for k in range(kw):
                acc = acc + w2_ref[(o2 * cmid + m) * kw + k] * h_taps[m][k]
        o_ref[o2] = acc.astype(o_ref.dtype)


def _pick_block_rows(bf, target):
    """Choose a (multiple-of-8) row-block size; keep >=2 grid blocks when
    possible so both v7x TensorCores get work."""
    if bf <= 8:
        return bf
    g = min(target, bf)
    g = max(8, (g // 8) * 8)
    if g >= bf and bf >= 16:
        g = max(8, ((bf + 1) // 2 // 8) * 8)
    return g


def phase_encoder_v4(x, w1, b1, gamma, beta, running_mean, running_var, w2, b2,
                     *, eps=1e-5, block_rows=256):
    """x: (B, 2, F, T) NCHW.  Returns (B, out_channels, F, T-2)."""
    B, Cin, Fdim, T = x.shape
    Cmid, cin_w, kh, KW = w1.shape
    assert cin_w == Cin and kh == 1 and KW == 3
    Cout = w2.shape[0]
    T1 = T - (KW - 1)          # conv1 output width (valid conv)
    T2 = T1                    # conv2: kernel 3, pad (0,1) -> same width
    assert T1 >= 1

    # Fold eval-mode BatchNorm/InstanceNorm (running stats) into conv1.
    inv = (gamma.astype(jnp.float32) /
           jnp.sqrt(running_var.astype(jnp.float32) + eps))
    w1f = w1[:, :, 0, :].astype(jnp.float32) * inv[:, None, None]   # (Cmid,Cin,KW)
    b1f = ((b1.astype(jnp.float32) - running_mean.astype(jnp.float32)) * inv
           + beta.astype(jnp.float32))                              # (Cmid,)
    w2f = w2[:, :, 0, :].astype(jnp.float32)                        # (Cout,Cmid,KW)
    b2f = b2.astype(jnp.float32)

    # (B, Cin, F, T) -> (Cin, B*F, T): major-dim permute only, T stays minor.
    BF = B * Fdim
    x3 = jnp.transpose(x, (1, 0, 2, 3)).reshape(Cin, BF, T)

    g = _pick_block_rows(BF, block_rows)
    nblk = pl.cdiv(BF, g)
    BFp = nblk * g
    if BFp != BF:
        x3 = jnp.pad(x3, ((0, 0), (0, BFp - BF), (0, 0)))

    kernel = functools.partial(
        _phase_encoder_kernel,
        cin=Cin, cmid=Cmid, cout=Cout, kw=KW, t1=T1, t2=T2)

    y3 = pl.pallas_call(
        kernel,
        out_shape=jax.ShapeDtypeStruct((Cout, BFp, T2), x.dtype),
        grid_spec=pltpu.PrefetchScalarGridSpec(
            num_scalar_prefetch=0,
            grid=(nblk,),
            in_specs=[
                pl.BlockSpec(memory_space=pltpu.MemorySpace.SMEM),  # w1 (flat)
                pl.BlockSpec(memory_space=pltpu.MemorySpace.SMEM),  # b1
                pl.BlockSpec(memory_space=pltpu.MemorySpace.SMEM),  # w2 (flat)
                pl.BlockSpec(memory_space=pltpu.MemorySpace.SMEM),  # b2
                pl.BlockSpec((Cin, g, T), lambda i: (0, i, 0)),     # x rows
            ],
            out_specs=pl.BlockSpec((Cout, g, T2), lambda i: (0, i, 0)),
            scratch_shapes=[pltpu.VMEM((Cmid, g, T1 + 2), jnp.float32)],
        ),
        compiler_params=pltpu.CompilerParams(
            dimension_semantics=("parallel",)),
    )(w1f.reshape(-1), b1f, w2f.reshape(-1), b2f, x3)

    # (Cout, B*F, T2) -> (B, Cout, F, T2): major-dim permute only.
    y = y3[:, :BF].reshape(Cout, B, Fdim, T2)
    return jnp.transpose(y, (1, 0, 2, 3))


def _ref_forward(x, w1, b1, gamma, beta, running_mean, running_var, w2, b2,
                 *, eps=1e-5):
    """Pure-JAX reference mirroring the PyTorch module (eval mode)."""
    def conv(inp, w, b, pad_w):
        y = jax.lax.conv_general_dilated(
            inp, w, window_strides=(1, 1),
            padding=[(0, 0), (pad_w, pad_w)],
            dimension_numbers=('NCHW', 'OIHW', 'NCHW'))
        return y + b.reshape(1, -1, 1, 1)

    h = conv(x, w1, b1, 0)
    h = ((h - running_mean.reshape(1, -1, 1, 1))
         / jnp.sqrt(running_var.reshape(1, -1, 1, 1) + eps)
         * gamma.reshape(1, -1, 1, 1) + beta.reshape(1, -1, 1, 1))
    return conv(h, w2, b2, 1)


if __name__ == "__main__":
    # Small config: out_channels=4 (so mid channels = 8), in_channels=2 (re/im),
    # B=2, F=16, T=130 (so the output time axis is exactly 128 -> lane-dense).
    out_channels = 4
    in_channels = 2
    B, Fdim, T = 2, 16, 130
    c_mid = out_channels * 2

    key = jax.random.PRNGKey(0)
    ks = jax.random.split(key, 9)

    x = jax.random.normal(ks[0], (B, in_channels, Fdim, T), dtype=jnp.float32)
    w1 = 0.1 * jax.random.normal(ks[1], (c_mid, in_channels, 1, 3), jnp.float32)
    b1 = 0.1 * jax.random.normal(ks[2], (c_mid,), jnp.float32)
    gamma = 1.0 + 0.1 * jax.random.normal(ks[3], (c_mid,), jnp.float32)
    beta = 0.1 * jax.random.normal(ks[4], (c_mid,), jnp.float32)
    running_mean = 0.1 * jax.random.normal(ks[5], (c_mid,), jnp.float32)
    running_var = jnp.abs(1.0 + 0.1 * jax.random.normal(ks[6], (c_mid,),
                                                        jnp.float32))
    w2 = 0.1 * jax.random.normal(ks[7], (out_channels, c_mid, 1, 3),
                                 jnp.float32)
    b2 = 0.1 * jax.random.normal(ks[8], (out_channels,), jnp.float32)

    run = jax.jit(phase_encoder_v4)
    out = run(x, w1, b1, gamma, beta, running_mean, running_var, w2, b2)
    out = jax.block_until_ready(out)

    ref = _ref_forward(x, w1, b1, gamma, beta, running_mean, running_var,
                       w2, b2)
    ref = jax.block_until_ready(ref)

    assert out.shape == ref.shape, (out.shape, ref.shape)
    assert jnp.allclose(out, ref, atol=1e-4, rtol=1e-4), float(
        jnp.max(jnp.abs(out - ref)))
    print("KERNEL_OK")
</pallas_src>

<mosaic_0001>
module attributes {stable_mosaic.version = 11 : i64} {
  func.func @_phase_encoder_kernel(%arg0: i32, %arg1: memref<48xf32, #tpu.memory_space<smem>>, %arg2: memref<8xf32, #tpu.memory_space<smem>>, %arg3: memref<96xf32, #tpu.memory_space<smem>>, %arg4: memref<4xf32, #tpu.memory_space<smem>>, %arg5: memref<2x16x130xf32, #tpu.memory_space<vmem>>, %arg6: memref<4x16x128xf32, #tpu.memory_space<vmem>>, %arg7: memref<8x16x130xf32, #tpu.memory_space<vmem>>) attributes {dimension_semantics = [#tpu.dimension_semantics<parallel>], iteration_bounds = array<i64: 2>, scalar_prefetch = 0 : i64, scratch_operands = 1 : i64, tpu.core_type = #tpu.core_type<tc>, window_params = [{transform_indices = @transform_0, window_bounds = array<i64: 48>}, {transform_indices = @transform_1, window_bounds = array<i64: 8>}, {transform_indices = @transform_2, window_bounds = array<i64: 96>}, {transform_indices = @transform_3, window_bounds = array<i64: 4>}, {transform_indices = @transform_4, window_bounds = array<i64: 2, 16, 130>}, {transform_indices = @transform_5, window_bounds = array<i64: 4, 16, 128>}]} {
    %cst = arith.constant 0.000000e+00 : f32
    %0 = vector.broadcast %cst : f32 to vector<8x16x130xf32>
    %c0 = arith.constant 0 : index
    %c0_0 = arith.constant 0 : index
    %c0_1 = arith.constant 0 : index
    %1 = vector.load %arg7[%c0, %c0_0, %c0_1] : memref<8x16x130xf32, #tpu.memory_space<vmem>>, vector<8x16x130xf32>
    tpu.vector_store %arg7[%c0, %c0_0, %c0_1], %0 {strides = array<i32>} : memref<8x16x130xf32, #tpu.memory_space<vmem>>, vector<8x16x130xf32>,
    %c0_2 = arith.constant 0 : index
    %c0_3 = arith.constant 0 : index
    %c0_4 = arith.constant 0 : index
    %2 = vector.load %arg5[%c0_2, %c0_3, %c0_4] : memref<2x16x130xf32, #tpu.memory_space<vmem>>, vector<1x16x130xf32>
    %3 = vector.shape_cast %2 : vector<1x16x130xf32> to vector<16x130xf32>
    %4 = vector.extract_strided_slice %3 {offsets = [0, 0], sizes = [16, 128], strides = [1, 1]} : vector<16x130xf32> to vector<16x128xf32>
    %5 = vector.extract_strided_slice %3 {offsets = [0, 1], sizes = [16, 128], strides = [1, 1]} : vector<16x130xf32> to vector<16x128xf32>
    %6 = vector.extract_strided_slice %3 {offsets = [0, 2], sizes = [16, 128], strides = [1, 1]} : vector<16x130xf32> to vector<16x128xf32>
    %c1 = arith.constant 1 : index
    %c0_5 = arith.constant 0 : index
    %c0_6 = arith.constant 0 : index
    %7 = vector.load %arg5[%c1, %c0_5, %c0_6] : memref<2x16x130xf32, #tpu.memory_space<vmem>>, vector<1x16x130xf32>
    %8 = vector.shape_cast %7 : vector<1x16x130xf32> to vector<16x130xf32>
    %9 = vector.extract_strided_slice %8 {offsets = [0, 0], sizes = [16, 128], strides = [1, 1]} : vector<16x130xf32> to vector<16x128xf32>
    %10 = vector.extract_strided_slice %8 {offsets = [0, 1], sizes = [16, 128], strides = [1, 1]} : vector<16x130xf32> to vector<16x128xf32>
    %11 = vector.extract_strided_slice %8 {offsets = [0, 2], sizes = [16, 128], strides = [1, 1]} : vector<16x130xf32> to vector<16x128xf32>
    %c0_7 = arith.constant 0 : index
    %12 = memref.load %arg2[%c0_7] : memref<8xf32, #tpu.memory_space<smem>>
    %13 = vector.broadcast %12 : f32 to vector<16x128xf32>
    %c0_8 = arith.constant 0 : index
    %14 = memref.load %arg1[%c0_8] : memref<48xf32, #tpu.memory_space<smem>>
    %15 = vector.broadcast %14 : f32 to vector<16x128xf32>
    %16 = arith.mulf %15, %4 : vector<16x128xf32>
    %17 = arith.addf %13, %16 : vector<16x128xf32>
    %c1_9 = arith.constant 1 : index
    %18 = memref.load %arg1[%c1_9] : memref<48xf32, #tpu.memory_space<smem>>
    %19 = vector.broadcast %18 : f32 to vector<16x128xf32>
    %20 = arith.mulf %19, %5 : vector<16x128xf32>
    %21 = arith.addf %17, %20 : vector<16x128xf32>
    %c2 = arith.constant 2 : index
    %22 = memref.load %arg1[%c2] : memref<48xf32, #tpu.memory_space<smem>>
    %23 = vector.broadcast %22 : f32 to vector<16x128xf32>
    %24 = arith.mulf %23, %6 : vector<16x128xf32>
    %25 = arith.addf %21, %24 : vector<16x128xf32>
    %c3 = arith.constant 3 : index
    %26 = memref.load %arg1[%c3] : memref<48xf32, #tpu.memory_space<smem>>
    %27 = vector.broadcast %26 : f32 to vector<16x128xf32>
    %28 = arith.mulf %27, %9 : vector<16x128xf32>
    %29 = arith.addf %25, %28 : vector<16x128xf32>
    %c4 = arith.constant 4 : index
    %30 = memref.load %arg1[%c4] : memref<48xf32, #tpu.memory_space<smem>>
    %31 = vector.broadcast %30 : f32 to vector<16x128xf32>
    %32 = arith.mulf %31, %10 : vector<16x128xf32>
    %33 = arith.addf %29, %32 : vector<16x128xf32>
    %c5 = arith.constant 5 : index
    %34 = memref.load %arg1[%c5] : memref<48xf32, #tpu.memory_space<smem>>
    %35 = vector.broadcast %34 : f32 to vector<16x128xf32>
    %36 = arith.mulf %35, %11 : vector<16x128xf32>
    %37 = arith.addf %33, %36 : vector<16x128xf32>
    %c0_10 = arith.constant 0 : index
    %c0_11 = arith.constant 0 : index
    %c1_12 = arith.constant 1 : index
    %38 = vector.load %arg7[%c0_10, %c0_11, %c1_12] : memref<8x16x130xf32, #tpu.memory_space<vmem>>, vector<1x16x128xf32>
    %39 = vector.shape_cast %38 : vector<1x16x128xf32> to vector<16x128xf32>
    %40 = vector.shape_cast %37 : vector<16x128xf32> to vector<1x16x128xf32>
    tpu.vector_store %arg7[%c0_10, %c0_11, %c1_12], %40 {strides = array<i32>} : memref<8x16x130xf32, #tpu.memory_space<vmem>>, vector<1x16x128xf32>,
    %c1_13 = arith.constant 1 : index
    %41 = memref.load %arg2[%c1_13] : memref<8xf32, #tpu.memory_space<smem>>
    %42 = vector.broadcast %41 : f32 to vector<16x128xf32>
    %c6 = arith.constant 6 : index
    %43 = memref.load %arg1[%c6] : memref<48xf32, #tpu.memory_space<smem>>
    %44 = vector.broadcast %43 : f32 to vector<16x128xf32>
    %45 = arith.mulf %44, %4 : vector<16x128xf32>
    %46 = arith.addf %42, %45 : vector<16x128xf32>
    %c7 = arith.constant 7 : index
    %47 = memref.load %arg1[%c7] : memref<48xf32, #tpu.memory_space<smem>>
    %48 = vector.broadcast %47 : f32 to vector<16x128xf32>
    %49 = arith.mulf %48, %5 : vector<16x128xf32>
    %50 = arith.addf %46, %49 : vector<16x128xf32>
    %c8 = arith.constant 8 : index
    %51 = memref.load %arg1[%c8] : memref<48xf32, #tpu.memory_space<smem>>
    %52 = vector.broadcast %51 : f32 to vector<16x128xf32>
    %53 = arith.mulf %52, %6 : vector<16x128xf32>
    %54 = arith.addf %50, %53 : vector<16x128xf32>
    %c9 = arith.constant 9 : index
    %55 = memref.load %arg1[%c9] : memref<48xf32, #tpu.memory_space<smem>>
    %56 = vector.broadcast %55 : f32 to vector<16x128xf32>
    %57 = arith.mulf %56, %9 : vector<16x128xf32>
    %58 = arith.addf %54, %57 : vector<16x128xf32>
    %c10 = arith.constant 10 : index
    %59 = memref.load %arg1[%c10] : memref<48xf32, #tpu.memory_space<smem>>
    %60 = vector.broadcast %59 : f32 to vector<16x128xf32>
    %61 = arith.mulf %60, %10 : vector<16x128xf32>
    %62 = arith.addf %58, %61 : vector<16x128xf32>
    %c11 = arith.constant 11 : index
    %63 = memref.load %arg1[%c11] : memref<48xf32, #tpu.memory_space<smem>>
    %64 = vector.broadcast %63 : f32 to vector<16x128xf32>
    %65 = arith.mulf %64, %11 : vector<16x128xf32>
    %66 = arith.addf %62, %65 : vector<16x128xf32>
    %c1_14 = arith.constant 1 : index
    %c0_15 = arith.constant 0 : index
    %c1_16 = arith.constant 1 : index
    %67 = vector.load %arg7[%c1_14, %c0_15, %c1_16] : memref<8x16x130xf32, #tpu.memory_space<vmem>>, vector<1x16x128xf32>
    %68 = vector.shape_cast %67 : vector<1x16x128xf32> to vector<16x128xf32>
    %69 = vector.shape_cast %66 : vector<16x128xf32> to vector<1x16x128xf32>
    tpu.vector_store %arg7[%c1_14, %c0_15, %c1_16], %69 {strides = array<i32>} : memref<8x16x130xf32, #tpu.memory_space<vmem>>, vector<1x16x128xf32>,
    %c2_17 = arith.constant 2 : index
    %70 = memref.load %arg2[%c2_17] : memref<8xf32, #tpu.memory_space<smem>>
    %71 = vector.broadcast %70 : f32 to vector<16x128xf32>
    %c12 = arith.constant 12 : index
    %72 = memref.load %arg1[%c12] : memref<48xf32, #tpu.memory_space<smem>>
    %73 = vector.broadcast %72 : f32 to vector<16x128xf32>
    %74 = arith.mulf %73, %4 : vector<16x128xf32>
    %75 = arith.addf %71, %74 : vector<16x128xf32>
    %c13 = arith.constant 13 : index
    %76 = memref.load %arg1[%c13] : memref<48xf32, #tpu.memory_space<smem>>
    %77 = vector.broadcast %76 : f32 to vector<16x128xf32>
    %78 = arith.mulf %77, %5 : vector<16x128xf32>
    %79 = arith.addf %75, %78 : vector<16x128xf32>
    %c14 = arith.constant 14 : index
    %80 = memref.load %arg1[%c14] : memref<48xf32, #tpu.memory_space<smem>>
    %81 = vector.broadcast %80 : f32 to vector<16x128xf32>
    %82 = arith.mulf %81, %6 : vector<16x128xf32>
    %83 = arith.addf %79, %82 : vector<16x128xf32>
    %c15 = arith.constant 15 : index
    %84 = memref.load %arg1[%c15] : memref<48xf32, #tpu.memory_space<smem>>
    %85 = vector.broadcast %84 : f32 to vector<16x128xf32>
    %86 = arith.mulf %85, %9 : vector<16x128xf32>
    %87 = arith.addf %83, %86 : vector<16x128xf32>
    %c16 = arith.constant 16 : index
    %88 = memref.load %arg1[%c16] : memref<48xf32, #tpu.memory_space<smem>>
    %89 = vector.broadcast %88 : f32 to vector<16x128xf32>
    %90 = arith.mulf %89, %10 : vector<16x128xf32>
    %91 = arith.addf %87, %90 : vector<16x128xf32>
    %c17 = arith.constant 17 : index
    %92 = memref.load %arg1[%c17] : memref<48xf32, #tpu.memory_space<smem>>
    %93 = vector.broadcast %92 : f32 to vector<16x128xf32>
    %94 = arith.mulf %93, %11 : vector<16x128xf32>
    %95 = arith.addf %91, %94 : vector<16x128xf32>
    %c2_18 = arith.constant 2 : index
    %c0_19 = arith.constant 0 : index
    %c1_20 = arith.constant 1 : index
    %96 = vector.load %arg7[%c2_18, %c0_19, %c1_20] : memref<8x16x130xf32, #tpu.memory_space<vmem>>, vector<1x16x128xf32>
    %97 = vector.shape_cast %96 : vector<1x16x128xf32> to vector<16x128xf32>
    %98 = vector.shape_cast %95 : vector<16x128xf32> to vector<1x16x128xf32>
    tpu.vector_store %arg7[%c2_18, %c0_19, %c1_20], %98 {strides = array<i32>} : memref<8x16x130xf32, #tpu.memory_space<vmem>>, vector<1x16x128xf32>,
    %c3_21 = arith.constant 3 : index
    %99 = memref.load %arg2[%c3_21] : memref<8xf32, #tpu.memory_space<smem>>
    %100 = vector.broadcast %99 : f32 to vector<16x128xf32>
    %c18 = arith.constant 18 : index
    %101 = memref.load %arg1[%c18] : memref<48xf32, #tpu.memory_space<smem>>
    %102 = vector.broadcast %101 : f32 to vector<16x128xf32>
    %103 = arith.mulf %102, %4 : vector<16x128xf32>
    %104 = arith.addf %100, %103 : vector<16x128xf32>
    %c19 = arith.constant 19 : index
    %105 = memref.load %arg1[%c19] : memref<48xf32, #tpu.memory_space<smem>>
    %106 = vector.broadcast %105 : f32 to vector<16x128xf32>
    %107 = arith.mulf %106, %5 : vector<16x128xf32>
    %108 = arith.addf %104, %107 : vector<16x128xf32>
    %c20 = arith.constant 20 : index
    %109 = memref.load %arg1[%c20] : memref<48xf32, #tpu.memory_space<smem>>
    %110 = vector.broadcast %109 : f32 to vector<16x128xf32>
    %111 = arith.mulf %110, %6 : vector<16x128xf32>
    %112 = arith.addf %108, %111 : vector<16x128xf32>
    %c21 = arith.constant 21 : index
    %113 = memref.load %arg1[%c21] : memref<48xf32, #tpu.memory_space<smem>>
    %114 = vector.broadcast %113 : f32 to vector<16x128xf32>
    %115 = arith.mulf %114, %9 : vector<16x128xf32>
    %116 = arith.addf %112, %115 : vector<16x128xf32>
    %c22 = arith.constant 22 : index
    %117 = memref.load %arg1[%c22] : memref<48xf32, #tpu.memory_space<smem>>
    %118 = vector.broadcast %117 : f32 to vector<16x128xf32>
    %119 = arith.mulf %118, %10 : vector<16x128xf32>
    %120 = arith.addf %116, %119 : vector<16x128xf32>
    %c23 = arith.constant 23 : index
    %121 = memref.load %arg1[%c23] : memref<48xf32, #tpu.memory_space<smem>>
    %122 = vector.broadcast %121 : f32 to vector<16x128xf32>
    %123 = arith.mulf %122, %11 : vector<16x128xf32>
    %124 = arith.addf %120, %123 : vector<16x128xf32>
    %c3_22 = arith.constant 3 : index
    %c0_23 = arith.constant 0 : index
    %c1_24 = arith.constant 1 : index
    %125 = vector.load %arg7[%c3_22, %c0_23, %c1_24] : memref<8x16x130xf32, #tpu.memory_space<vmem>>, vector<1x16x128xf32>
    %126 = vector.shape_cast %125 : vector<1x16x128xf32> to vector<16x128xf32>
    %127 = vector.shape_cast %124 : vector<16x128xf32> to vector<1x16x128xf32>
    tpu.vector_store %arg7[%c3_22, %c0_23, %c1_24], %127 {strides = array<i32>} : memref<8x16x130xf32, #tpu.memory_space<vmem>>, vector<1x16x128xf32>,
    %c4_25 = arith.constant 4 : index
    %128 = memref.load %arg2[%c4_25] : memref<8xf32, #tpu.memory_space<smem>>
    %129 = vector.broadcast %128 : f32 to vector<16x128xf32>
    %c24 = arith.constant 24 : index
    %130 = memref.load %arg1[%c24] : memref<48xf32, #tpu.memory_space<smem>>
    %131 = vector.broadcast %130 : f32 to vector<16x128xf32>
    %132 = arith.mulf %131, %4 : vector<16x128xf32>
    %133 = arith.addf %129, %132 : vector<16x128xf32>
    %c25 = arith.constant 25 : index
    %134 = memref.load %arg1[%c25] : memref<48xf32, #tpu.memory_space<smem>>
    %135 = vector.broadcast %134 : f32 to vector<16x128xf32>
    %136 = arith.mulf %135, %5 : vector<16x128xf32>
    %137 = arith.addf %133, %136 : vector<16x128xf32>
    %c26 = arith.constant 26 : index
    %138 = memref.load %arg1[%c26] : memref<48xf32, #tpu.memory_space<smem>>
    %139 = vector.broadcast %138 : f32 to vector<16x128xf32>
    %140 = arith.mulf %139, %6 : vector<16x128xf32>
    %141 = arith.addf %137, %140 : vector<16x128xf32>
    %c27 = arith.constant 27 : index
    %142 = memref.load %arg1[%c27] : memref<48xf32, #tpu.memory_space<smem>>
    %143 = vector.broadcast %142 : f32 to vector<16x128xf32>
    %144 = arith.mulf %143, %9 : vector<16x128xf32>
    %145 = arith.addf %141, %144 : vector<16x128xf32>
    %c28 = arith.constant 28 : index
    %146 = memref.load %arg1[%c28] : memref<48xf32, #tpu.memory_space<smem>>
    %147 = vector.broadcast %146 : f32 to vector<16x128xf32>
    %148 = arith.mulf %147, %10 : vector<16x128xf32>
    %149 = arith.addf %145, %148 : vector<16x128xf32>
    %c29 = arith.constant 29 : index
    %150 = memref.load %arg1[%c29] : memref<48xf32, #tpu.memory_space<smem>>
    %151 = vector.broadcast %150 : f32 to vector<16x128xf32>
    %152 = arith.mulf %151, %11 : vector<16x128xf32>
    %153 = arith.addf %149, %152 : vector<16x128xf32>
    %c4_26 = arith.constant 4 : index
    %c0_27 = arith.constant 0 : index
    %c1_28 = arith.constant 1 : index
    %154 = vector.load %arg7[%c4_26, %c0_27, %c1_28] : memref<8x16x130xf32, #tpu.memory_space<vmem>>, vector<1x16x128xf32>
    %155 = vector.shape_cast %154 : vector<1x16x128xf32> to vector<16x128xf32>
    %156 = vector.shape_cast %153 : vector<16x128xf32> to vector<1x16x128xf32>
    tpu.vector_store %arg7[%c4_26, %c0_27, %c1_28], %156 {strides = array<i32>} : memref<8x16x130xf32, #tpu.memory_space<vmem>>, vector<1x16x128xf32>,
    %c5_29 = arith.constant 5 : index
    %157 = memref.load %arg2[%c5_29] : memref<8xf32, #tpu.memory_space<smem>>
    %158 = vector.broadcast %157 : f32 to vector<16x128xf32>
    %c30 = arith.constant 30 : index
    %159 = memref.load %arg1[%c30] : memref<48xf32, #tpu.memory_space<smem>>
    %160 = vector.broadcast %159 : f32 to vector<16x128xf32>
    %161 = arith.mulf %160, %4 : vector<16x128xf32>
    %162 = arith.addf %158, %161 : vector<16x128xf32>
    %c31 = arith.constant 31 : index
    %163 = memref.load %arg1[%c31] : memref<48xf32, #tpu.memory_space<smem>>
    %164 = vector.broadcast %163 : f32 to vector<16x128xf32>
    %165 = arith.mulf %164, %5 : vector<16x128xf32>
    %166 = arith.addf %162, %165 : vector<16x128xf32>
    %c32 = arith.constant 32 : index
    %167 = memref.load %arg1[%c32] : memref<48xf32, #tpu.memory_space<smem>>
    %168 = vector.broadcast %167 : f32 to vector<16x128xf32>
    %169 = arith.mulf %168, %6 : vector<16x128xf32>
    %170 = arith.addf %166, %169 : vector<16x128xf32>
    %c33 = arith.constant 33 : index
    %171 = memref.load %arg1[%c33] : memref<48xf32, #tpu.memory_space<smem>>
    %172 = vector.broadcast %171 : f32 to vector<16x128xf32>
    %173 = arith.mulf %172, %9 : vector<16x128xf32>
    %174 = arith.addf %170, %173 : vector<16x128xf32>
    %c34 = arith.constant 34 : index
    %175 = memref.load %arg1[%c34] : memref<48xf32, #tpu.memory_space<smem>>
    %176 = vector.broadcast %175 : f32 to vector<16x128xf32>
    %177 = arith.mulf %176, %10 : vector<16x128xf32>
    %178 = arith.addf %174, %177 : vector<16x128xf32>
    %c35 = arith.constant 35 : index
    %179 = memref.load %arg1[%c35] : memref<48xf32, #tpu.memory_space<smem>>
    %180 = vector.broadcast %179 : f32 to vector<16x128xf32>
    %181 = arith.mulf %180, %11 : vector<16x128xf32>
    %182 = arith.addf %178, %181 : vector<16x128xf32>
    %c5_30 = arith.constant 5 : index
    %c0_31 = arith.constant 0 : index
    %c1_32 = arith.constant 1 : index
    %183 = vector.load %arg7[%c5_30, %c0_31, %c1_32] : memref<8x16x130xf32, #tpu.memory_space<vmem>>, vector<1x16x128xf32>
    %184 = vector.shape_cast %183 : vector<1x16x128xf32> to vector<16x128xf32>
    %185 = vector.shape_cast %182 : vector<16x128xf32> to vector<1x16x128xf32>
    tpu.vector_store %arg7[%c5_30, %c0_31, %c1_32], %185 {strides = array<i32>} : memref<8x16x130xf32, #tpu.memory_space<vmem>>, vector<1x16x128xf32>,
    %c6_33 = arith.constant 6 : index
    %186 = memref.load %arg2[%c6_33] : memref<8xf32, #tpu.memory_space<smem>>
    %187 = vector.broadcast %186 : f32 to vector<16x128xf32>
    %c36 = arith.constant 36 : index
    %188 = memref.load %arg1[%c36] : memref<48xf32, #tpu.memory_space<smem>>
    %189 = vector.broadcast %188 : f32 to vector<16x128xf32>
    %190 = arith.mulf %189, %4 : vector<16x128xf32>
    %191 = arith.addf %187, %190 : vector<16x128xf32>
    %c37 = arith.constant 37 : index
    %192 = memref.load %arg1[%c37] : memref<48xf32, #tpu.memory_space<smem>>
    %193 = vector.broadcast %192 : f32 to vector<16x128xf32>
    %194 = arith.mulf %193, %5 : vector<16x128xf32>
    %195 = arith.addf %191, %194 : vector<16x128xf32>
    %c38 = arith.constant 38 : index
    %196 = memref.load %arg1[%c38] : memref<48xf32, #tpu.memory_space<smem>>
    %197 = vector.broadcast %196 : f32 to vector<16x128xf32>
    %198 = arith.mulf %197, %6 : vector<16x128xf32>
    %199 = arith.addf %195, %198 : vector<16x128xf32>
    %c39 = arith.constant 39 : index
    %200 = memref.load %arg1[%c39] : memref<48xf32, #tpu.memory_space<smem>>
    %201 = vector.broadcast %200 : f32 to vector<16x128xf32>
    %202 = arith.mulf %201, %9 : vector<16x128xf32>
    %203 = arith.addf %199, %202 : vector<16x128xf32>
    %c40 = arith.constant 40 : index
    %204 = memref.load %arg1[%c40] : memref<48xf32, #tpu.memory_space<smem>>
    %205 = vector.broadcast %204 : f32 to vector<16x128xf32>
    %206 = arith.mulf %205, %10 : vector<16x128xf32>
    %207 = arith.addf %203, %206 : vector<16x128xf32>
    %c41 = arith.constant 41 : index
    %208 = memref.load %arg1[%c41] : memref<48xf32, #tpu.memory_space<smem>>
    %209 = vector.broadcast %208 : f32 to vector<16x128xf32>
    %210 = arith.mulf %209, %11 : vector<16x128xf32>
    %211 = arith.addf %207, %210 : vector<16x128xf32>
    %c6_34 = arith.constant 6 : index
    %c0_35 = arith.constant 0 : index
    %c1_36 = arith.constant 1 : index
    %212 = vector.load %arg7[%c6_34, %c0_35, %c1_36] : memref<8x16x130xf32, #tpu.memory_space<vmem>>, vector<1x16x128xf32>
    %213 = vector.shape_cast %212 : vector<1x16x128xf32> to vector<16x128xf32>
    %214 = vector.shape_cast %211 : vector<16x128xf32> to vector<1x16x128xf32>
    tpu.vector_store %arg7[%c6_34, %c0_35, %c1_36], %214 {strides = array<i32>} : memref<8x16x130xf32, #tpu.memory_space<vmem>>, vector<1x16x128xf32>,
    %c7_37 = arith.constant 7 : index
    %215 = memref.load %arg2[%c7_37] : memref<8xf32, #tpu.memory_space<smem>>
    %216 = vector.broadcast %215 : f32 to vector<16x128xf32>
    %c42 = arith.constant 42 : index
    %217 = memref.load %arg1[%c42] : memref<48xf32, #tpu.memory_space<smem>>
    %218 = vector.broadcast %217 : f32 to vector<16x128xf32>
    %219 = arith.mulf %218, %4 : vector<16x128xf32>
    %220 = arith.addf %216, %219 : vector<16x128xf32>
    %c43 = arith.constant 43 : index
    %221 = memref.load %arg1[%c43] : memref<48xf32, #tpu.memory_space<smem>>
    %222 = vector.broadcast %221 : f32 to vector<16x128xf32>
    %223 = arith.mulf %222, %5 : vector<16x128xf32>
    %224 = arith.addf %220, %223 : vector<16x128xf32>
    %c44 = arith.constant 44 : index
    %225 = memref.load %arg1[%c44] : memref<48xf32, #tpu.memory_space<smem>>
    %226 = vector.broadcast %225 : f32 to vector<16x128xf32>
    %227 = arith.mulf %226, %6 : vector<16x128xf32>
    %228 = arith.addf %224, %227 : vector<16x128xf32>
    %c45 = arith.constant 45 : index
    %229 = memref.load %arg1[%c45] : memref<48xf32, #tpu.memory_space<smem>>
    %230 = vector.broadcast %229 : f32 to vector<16x128xf32>
    %231 = arith.mulf %230, %9 : vector<16x128xf32>
    %232 = arith.addf %228, %231 : vector<16x128xf32>
    %c46 = arith.constant 46 : index
    %233 = memref.load %arg1[%c46] : memref<48xf32, #tpu.memory_space<smem>>
    %234 = vector.broadcast %233 : f32 to vector<16x128xf32>
    %235 = arith.mulf %234, %10 : vector<16x128xf32>
    %236 = arith.addf %232, %235 : vector<16x128xf32>
    %c47 = arith.constant 47 : index
    %237 = memref.load %arg1[%c47] : memref<48xf32, #tpu.memory_space<smem>>
    %238 = vector.broadcast %237 : f32 to vector<16x128xf32>
    %239 = arith.mulf %238, %11 : vector<16x128xf32>
    %240 = arith.addf %236, %239 : vector<16x128xf32>
    %c7_38 = arith.constant 7 : index
    %c0_39 = arith.constant 0 : index
    %c1_40 = arith.constant 1 : index
    %241 = vector.load %arg7[%c7_38, %c0_39, %c1_40] : memref<8x16x130xf32, #tpu.memory_space<vmem>>, vector<1x16x128xf32>
    %242 = vector.shape_cast %241 : vector<1x16x128xf32> to vector<16x128xf32>
    %243 = vector.shape_cast %240 : vector<16x128xf32> to vector<1x16x128xf32>
    tpu.vector_store %arg7[%c7_38, %c0_39, %c1_40], %243 {strides = array<i32>} : memref<8x16x130xf32, #tpu.memory_space<vmem>>, vector<1x16x128xf32>,
    %c0_41 = arith.constant 0 : index
    %c0_42 = arith.constant 0 : index
    %c0_43 = arith.constant 0 : index
    %244 = vector.load %arg7[%c0_41, %c0_42, %c0_43] : memref<8x16x130xf32, #tpu.memory_space<vmem>>, vector<1x16x130xf32>
    %245 = vector.shape_cast %244 : vector<1x16x130xf32> to vector<16x130xf32>
    %246 = vector.extract_strided_slice %245 {offsets = [0, 0], sizes = [16, 128], strides = [1, 1]} : vector<16x130xf32> to vector<16x128xf32>
    %247 = vector.extract_strided_slice %245 {offsets = [0, 1], sizes = [16, 128], strides = [1, 1]} : vector<16x130xf32> to vector<16x128xf32>
    %248 = vector.extract_strided_slice %245 {offsets = [0, 2], sizes = [16, 128], strides = [1, 1]} : vector<16x130xf32> to vector<16x128xf32>
    %c1_44 = arith.constant 1 : index
    %c0_45 = arith.constant 0 : index
    %c0_46 = arith.constant 0 : index
    %249 = vector.load %arg7[%c1_44, %c0_45, %c0_46] : memref<8x16x130xf32, #tpu.memory_space<vmem>>, vector<1x16x130xf32>
    %250 = vector.shape_cast %249 : vector<1x16x130xf32> to vector<16x130xf32>
    %251 = vector.extract_strided_slice %250 {offsets = [0, 0], sizes = [16, 128], strides = [1, 1]} : vector<16x130xf32> to vector<16x128xf32>
    %252 = vector.extract_strided_slice %250 {offsets = [0, 1], sizes = [16, 128], strides = [1, 1]} : vector<16x130xf32> to vector<16x128xf32>
    %253 = vector.extract_strided_slice %250 {offsets = [0, 2], sizes = [16, 128], strides = [1, 1]} : vector<16x130xf32> to vector<16x128xf32>
    %c2_47 = arith.constant 2 : index
    %c0_48 = arith.constant 0 : index
    %c0_49 = arith.constant 0 : index
    %254 = vector.load %arg7[%c2_47, %c0_48, %c0_49] : memref<8x16x130xf32, #tpu.memory_space<vmem>>, vector<1x16x130xf32>
    %255 = vector.shape_cast %254 : vector<1x16x130xf32> to vector<16x130xf32>
    %256 = vector.extract_strided_slice %255 {offsets = [0, 0], sizes = [16, 128], strides = [1, 1]} : vector<16x130xf32> to vector<16x128xf32>
    %257 = vector.extract_strided_slice %255 {offsets = [0, 1], sizes = [16, 128], strides = [1, 1]} : vector<16x130xf32> to vector<16x128xf32>
    %258 = vector.extract_strided_slice %255 {offsets = [0, 2], sizes = [16, 128], strides = [1, 1]} : vector<16x130xf32> to vector<16x128xf32>
    %c3_50 = arith.constant 3 : index
    %c0_51 = arith.constant 0 : index
    %c0_52 = arith.constant 0 : index
    %259 = vector.load %arg7[%c3_50, %c0_51, %c0_52] : memref<8x16x130xf32, #tpu.memory_space<vmem>>, vector<1x16x130xf32>
    %260 = vector.shape_cast %259 : vector<1x16x130xf32> to vector<16x130xf32>
    %261 = vector.extract_strided_slice %260 {offsets = [0, 0], sizes = [16, 128], strides = [1, 1]} : vector<16x130xf32> to vector<16x128xf32>
    %262 = vector.extract_strided_slice %260 {offsets = [0, 1], sizes = [16, 128], strides = [1, 1]} : vector<16x130xf32> to vector<16x128xf32>
    %263 = vector.extract_strided_slice %260 {offsets = [0, 2], sizes = [16, 128], strides = [1, 1]} : vector<16x130xf32> to vector<16x128xf32>
    %c4_53 = arith.constant 4 : index
    %c0_54 = arith.constant 0 : index
    %c0_55 = arith.constant 0 : index
    %264 = vector.load %arg7[%c4_53, %c0_54, %c0_55] : memref<8x16x130xf32, #tpu.memory_space<vmem>>, vector<1x16x130xf32>
    %265 = vector.shape_cast %264 : vector<1x16x130xf32> to vector<16x130xf32>
    %266 = vector.extract_strided_slice %265 {offsets = [0, 0], sizes = [16, 128], strides = [1, 1]} : vector<16x130xf32> to vector<16x128xf32>
    %267 = vector.extract_strided_slice %265 {offsets = [0, 1], sizes = [16, 128], strides = [1, 1]} : vector<16x130xf32> to vector<16x128xf32>
    %268 = vector.extract_strided_slice %265 {offsets = [0, 2], sizes = [16, 128], strides = [1, 1]} : vector<16x130xf32> to vector<16x128xf32>
    %c5_56 = arith.constant 5 : index
    %c0_57 = arith.constant 0 : index
    %c0_58 = arith.constant 0 : index
    %269 = vector.load %arg7[%c5_56, %c0_57, %c0_58] : memref<8x16x130xf32, #tpu.memory_space<vmem>>, vector<1x16x130xf32>
    %270 = vector.shape_cast %269 : vector<1x16x130xf32> to vector<16x130xf32>
    %271 = vector.extract_strided_slice %270 {offsets = [0, 0], sizes = [16, 128], strides = [1, 1]} : vector<16x130xf32> to vector<16x128xf32>
    %272 = vector.extract_strided_slice %270 {offsets = [0, 1], sizes = [16, 128], strides = [1, 1]} : vector<16x130xf32> to vector<16x128xf32>
    %273 = vector.extract_strided_slice %270 {offsets = [0, 2], sizes = [16, 128], strides = [1, 1]} : vector<16x130xf32> to vector<16x128xf32>
    %c6_59 = arith.constant 6 : index
    %c0_60 = arith.constant 0 : index
    %c0_61 = arith.constant 0 : index
    %274 = vector.load %arg7[%c6_59, %c0_60, %c0_61] : memref<8x16x130xf32, #tpu.memory_space<vmem>>, vector<1x16x130xf32>
    %275 = vector.shape_cast %274 : vector<1x16x130xf32> to vector<16x130xf32>
    %276 = vector.extract_strided_slice %275 {offsets = [0, 0], sizes = [16, 128], strides = [1, 1]} : vector<16x130xf32> to vector<16x128xf32>
    %277 = vector.extract_strided_slice %275 {offsets = [0, 1], sizes = [16, 128], strides = [1, 1]} : vector<16x130xf32> to vector<16x128xf32>
    %278 = vector.extract_strided_slice %275 {offsets = [0, 2], sizes = [16, 128], strides = [1, 1]} : vector<16x130xf32> to vector<16x128xf32>
    %c7_62 = arith.constant 7 : index
    %c0_63 = arith.constant 0 : index
    %c0_64 = arith.constant 0 : index
    %279 = vector.load %arg7[%c7_62, %c0_63, %c0_64] : memref<8x16x130xf32, #tpu.memory_space<vmem>>, vector<1x16x130xf32>
    %280 = vector.shape_cast %279 : vector<1x16x130xf32> to vector<16x130xf32>
    %281 = vector.extract_strided_slice %280 {offsets = [0, 0], sizes = [16, 128], strides = [1, 1]} : vector<16x130xf32> to vector<16x128xf32>
    %282 = vector.extract_strided_slice %280 {offsets = [0, 1], sizes = [16, 128], strides = [1, 1]} : vector<16x130xf32> to vector<16x128xf32>
    %283 = vector.extract_strided_slice %280 {offsets = [0, 2], sizes = [16, 128], strides = [1, 1]} : vector<16x130xf32> to vector<16x128xf32>
    %c0_65 = arith.constant 0 : index
    %284 = memref.load %arg4[%c0_65] : memref<4xf32, #tpu.memory_space<smem>>
    %285 = vector.broadcast %284 : f32 to vector<16x128xf32>
    %c0_66 = arith.constant 0 : index
    %286 = memref.load %arg3[%c0_66] : memref<96xf32, #tpu.memory_space<smem>>
    %287 = vector.broadcast %286 : f32 to vector<16x128xf32>
    %288 = arith.mulf %287, %246 : vector<16x128xf32>
    %289 = arith.addf %285, %288 : vector<16x128xf32>
    %c1_67 = arith.constant 1 : index
    %290 = memref.load %arg3[%c1_67] : memref<96xf32, #tpu.memory_space<smem>>
    %291 = vector.broadcast %290 : f32 to vector<16x128xf32>
    %292 = arith.mulf %291, %247 : vector<16x128xf32>
    %293 = arith.addf %289, %292 : vector<16x128xf32>
    %c2_68 = arith.constant 2 : index
    %294 = memref.load %arg3[%c2_68] : memref<96xf32, #tpu.memory_space<smem>>
    %295 = vector.broadcast %294 : f32 to vector<16x128xf32>
    %296 = arith.mulf %295, %248 : vector<16x128xf32>
    %297 = arith.addf %293, %296 : vector<16x128xf32>
    %c3_69 = arith.constant 3 : index
    %298 = memref.load %arg3[%c3_69] : memref<96xf32, #tpu.memory_space<smem>>
    %299 = vector.broadcast %298 : f32 to vector<16x128xf32>
    %300 = arith.mulf %299, %251 : vector<16x128xf32>
    %301 = arith.addf %297, %300 : vector<16x128xf32>
    %c4_70 = arith.constant 4 : index
    %302 = memref.load %arg3[%c4_70] : memref<96xf32, #tpu.memory_space<smem>>
    %303 = vector.broadcast %302 : f32 to vector<16x128xf32>
    %304 = arith.mulf %303, %252 : vector<16x128xf32>
    %305 = arith.addf %301, %304 : vector<16x128xf32>
    %c5_71 = arith.constant 5 : index
    %306 = memref.load %arg3[%c5_71] : memref<96xf32, #tpu.memory_space<smem>>
    %307 = vector.broadcast %306 : f32 to vector<16x128xf32>
    %308 = arith.mulf %307, %253 : vector<16x128xf32>
    %309 = arith.addf %305, %308 : vector<16x128xf32>
    %c6_72 = arith.constant 6 : index
    %310 = memref.load %arg3[%c6_72] : memref<96xf32, #tpu.memory_space<smem>>
    %311 = vector.broadcast %310 : f32 to vector<16x128xf32>
    %312 = arith.mulf %311, %256 : vector<16x128xf32>
    %313 = arith.addf %309, %312 : vector<16x128xf32>
    %c7_73 = arith.constant 7 : index
    %314 = memref.load %arg3[%c7_73] : memref<96xf32, #tpu.memory_space<smem>>
    %315 = vector.broadcast %314 : f32 to vector<16x128xf32>
    %316 = arith.mulf %315, %257 : vector<16x128xf32>
    %317 = arith.addf %313, %316 : vector<16x128xf32>
    %c8_74 = arith.constant 8 : index
    %318 = memref.load %arg3[%c8_74] : memref<96xf32, #tpu.memory_space<smem>>
    %319 = vector.broadcast %318 : f32 to vector<16x128xf32>
    %320 = arith.mulf %319, %258 : vector<16x128xf32>
    %321 = arith.addf %317, %320 : vector<16x128xf32>
    %c9_75 = arith.constant 9 : index
    %322 = memref.load %arg3[%c9_75] : memref<96xf32, #tpu.memory_space<smem>>
    %323 = vector.broadcast %322 : f32 to vector<16x128xf32>
    %324 = arith.mulf %323, %261 : vector<16x128xf32>
    %325 = arith.addf %321, %324 : vector<16x128xf32>
    %c10_76 = arith.constant 10 : index
    %326 = memref.load %arg3[%c10_76] : memref<96xf32, #tpu.memory_space<smem>>
    %327 = vector.broadcast %326 : f32 to vector<16x128xf32>
    %328 = arith.mulf %327, %262 : vector<16x128xf32>
    %329 = arith.addf %325, %328 : vector<16x128xf32>
    %c11_77 = arith.constant 11 : index
    %330 = memref.load %arg3[%c11_77] : memref<96xf32, #tpu.memory_space<smem>>
    %331 = vector.broadcast %330 : f32 to vector<16x128xf32>
    %332 = arith.mulf %331, %263 : vector<16x128xf32>
    %333 = arith.addf %329, %332 : vector<16x128xf32>
    %c12_78 = arith.constant 12 : index
    %334 = memref.load %arg3[%c12_78] : memref<96xf32, #tpu.memory_space<smem>>
    %335 = vector.broadcast %334 : f32 to vector<16x128xf32>
    %336 = arith.mulf %335, %266 : vector<16x128xf32>
    %337 = arith.addf %333, %336 : vector<16x128xf32>
    %c13_79 = arith.constant 13 : index
    %338 = memref.load %arg3[%c13_79] : memref<96xf32, #tpu.memory_space<smem>>
    %339 = vector.broadcast %338 : f32 to vector<16x128xf32>
    %340 = arith.mulf %339, %267 : vector<16x128xf32>
    %341 = arith.addf %337, %340 : vector<16x128xf32>
    %c14_80 = arith.constant 14 : index
    %342 = memref.load %arg3[%c14_80] : memref<96xf32, #tpu.memory_space<smem>>
    %343 = vector.broadcast %342 : f32 to vector<16x128xf32>
    %344 = arith.mulf %343, %268 : vector<16x128xf32>
    %345 = arith.addf %341, %344 : vector<16x128xf32>
    %c15_81 = arith.constant 15 : index
    %346 = memref.load %arg3[%c15_81] : memref<96xf32, #tpu.memory_space<smem>>
    %347 = vector.broadcast %346 : f32 to vector<16x128xf32>
    %348 = arith.mulf %347, %271 : vector<16x128xf32>
    %349 = arith.addf %345, %348 : vector<16x128xf32>
    %c16_82 = arith.constant 16 : index
    %350 = memref.load %arg3[%c16_82] : memref<96xf32, #tpu.memory_space<smem>>
    %351 = vector.broadcast %350 : f32 to vector<16x128xf32>
    %352 = arith.mulf %351, %272 : vector<16x128xf32>
    %353 = arith.addf %349, %352 : vector<16x128xf32>
    %c17_83 = arith.constant 17 : index
    %354 = memref.load %arg3[%c17_83] : memref<96xf32, #tpu.memory_space<smem>>
    %355 = vector.broadcast %354 : f32 to vector<16x128xf32>
    %356 = arith.mulf %355, %273 : vector<16x128xf32>
    %357 = arith.addf %353, %356 : vector<16x128xf32>
    %c18_84 = arith.constant 18 : index
    %358 = memref.load %arg3[%c18_84] : memref<96xf32, #tpu.memory_space<smem>>
    %359 = vector.broadcast %358 : f32 to vector<16x128xf32>
    %360 = arith.mulf %359, %276 : vector<16x128xf32>
    %361 = arith.addf %357, %360 : vector<16x128xf32>
    %c19_85 = arith.constant 19 : index
    %362 = memref.load %arg3[%c19_85] : memref<96xf32, #tpu.memory_space<smem>>
    %363 = vector.broadcast %362 : f32 to vector<16x128xf32>
    %364 = arith.mulf %363, %277 : vector<16x128xf32>
    %365 = arith.addf %361, %364 : vector<16x128xf32>
    %c20_86 = arith.constant 20 : index
    %366 = memref.load %arg3[%c20_86] : memref<96xf32, #tpu.memory_space<smem>>
    %367 = vector.broadcast %366 : f32 to vector<16x128xf32>
    %368 = arith.mulf %367, %278 : vector<16x128xf32>
    %369 = arith.addf %365, %368 : vector<16x128xf32>
    %c21_87 = arith.constant 21 : index
    %370 = memref.load %arg3[%c21_87] : memref<96xf32, #tpu.memory_space<smem>>
    %371 = vector.broadcast %370 : f32 to vector<16x128xf32>
    %372 = arith.mulf %371, %281 : vector<16x128xf32>
    %373 = arith.addf %369, %372 : vector<16x128xf32>
    %c22_88 = arith.constant 22 : index
    %374 = memref.load %arg3[%c22_88] : memref<96xf32, #tpu.memory_space<smem>>
    %375 = vector.broadcast %374 : f32 to vector<16x128xf32>
    %376 = arith.mulf %375, %282 : vector<16x128xf32>
    %377 = arith.addf %373, %376 : vector<16x128xf32>
    %c23_89 = arith.constant 23 : index
    %378 = memref.load %arg3[%c23_89] : memref<96xf32, #tpu.memory_space<smem>>
    %379 = vector.broadcast %378 : f32 to vector<16x128xf32>
    %380 = arith.mulf %379, %283 : vector<16x128xf32>
    %381 = arith.addf %377, %380 : vector<16x128xf32>
    %c0_90 = arith.constant 0 : index
    %c0_91 = arith.constant 0 : index
    %c0_92 = arith.constant 0 : index
    %382 = vector.load %arg6[%c0_90, %c0_91, %c0_92] : memref<4x16x128xf32, #tpu.memory_space<vmem>>, vector<1x16x128xf32>
    %383 = vector.shape_cast %382 : vector<1x16x128xf32> to vector<16x128xf32>
    %384 = vector.shape_cast %381 : vector<16x128xf32> to vector<1x16x128xf32>
    tpu.vector_store %arg6[%c0_90, %c0_91, %c0_92], %384 {strides = array<i32>} : memref<4x16x128xf32, #tpu.memory_space<vmem>>, vector<1x16x128xf32>,
    %c1_93 = arith.constant 1 : index
    %385 = memref.load %arg4[%c1_93] : memref<4xf32, #tpu.memory_space<smem>>
    %386 = vector.broadcast %385 : f32 to vector<16x128xf32>
    %c24_94 = arith.constant 24 : index
    %387 = memref.load %arg3[%c24_94] : memref<96xf32, #tpu.memory_space<smem>>
    %388 = vector.broadcast %387 : f32 to vector<16x128xf32>
    %389 = arith.mulf %388, %246 : vector<16x128xf32>
    %390 = arith.addf %386, %389 : vector<16x128xf32>
    %c25_95 = arith.constant 25 : index
    %391 = memref.load %arg3[%c25_95] : memref<96xf32, #tpu.memory_space<smem>>
    %392 = vector.broadcast %391 : f32 to vector<16x128xf32>
    %393 = arith.mulf %392, %247 : vector<16x128xf32>
    %394 = arith.addf %390, %393 : vector<16x128xf32>
    %c26_96 = arith.constant 26 : index
    %395 = memref.load %arg3[%c26_96] : memref<96xf32, #tpu.memory_space<smem>>
    %396 = vector.broadcast %395 : f32 to vector<16x128xf32>
    %397 = arith.mulf %396, %248 : vector<16x128xf32>
    %398 = arith.addf %394, %397 : vector<16x128xf32>
    %c27_97 = arith.constant 27 : index
    %399 = memref.load %arg3[%c27_97] : memref<96xf32, #tpu.memory_space<smem>>
    %400 = vector.broadcast %399 : f32 to vector<16x128xf32>
    %401 = arith.mulf %400, %251 : vector<16x128xf32>
    %402 = arith.addf %398, %401 : vector<16x128xf32>
    %c28_98 = arith.constant 28 : index
    %403 = memref.load %arg3[%c28_98] : memref<96xf32, #tpu.memory_space<smem>>
    %404 = vector.broadcast %403 : f32 to vector<16x128xf32>
    %405 = arith.mulf %404, %252 : vector<16x128xf32>
    %406 = arith.addf %402, %405 : vector<16x128xf32>
    %c29_99 = arith.constant 29 : index
    %407 = memref.load %arg3[%c29_99] : memref<96xf32, #tpu.memory_space<smem>>
    %408 = vector.broadcast %407 : f32 to vector<16x128xf32>
    %409 = arith.mulf %408, %253 : vector<16x128xf32>
    %410 = arith.addf %406, %409 : vector<16x128xf32>
    %c30_100 = arith.constant 30 : index
    %411 = memref.load %arg3[%c30_100] : memref<96xf32, #tpu.memory_space<smem>>
    %412 = vector.broadcast %411 : f32 to vector<16x128xf32>
    %413 = arith.mulf %412, %256 : vector<16x128xf32>
    %414 = arith.addf %410, %413 : vector<16x128xf32>
    %c31_101 = arith.constant 31 : index
    %415 = memref.load %arg3[%c31_101] : memref<96xf32, #tpu.memory_space<smem>>
    %416 = vector.broadcast %415 : f32 to vector<16x128xf32>
    %417 = arith.mulf %416, %257 : vector<16x128xf32>
    %418 = arith.addf %414, %417 : vector<16x128xf32>
    %c32_102 = arith.constant 32 : index
    %419 = memref.load %arg3[%c32_102] : memref<96xf32, #tpu.memory_space<smem>>
    %420 = vector.broadcast %419 : f32 to vector<16x128xf32>
    %421 = arith.mulf %420, %258 : vector<16x128xf32>
    %422 = arith.addf %418, %421 : vector<16x128xf32>
    %c33_103 = arith.constant 33 : index
    %423 = memref.load %arg3[%c33_103] : memref<96xf32, #tpu.memory_space<smem>>
    %424 = vector.broadcast %423 : f32 to vector<16x128xf32>
    %425 = arith.mulf %424, %261 : vector<16x128xf32>
    %426 = arith.addf %422, %425 : vector<16x128xf32>
    %c34_104 = arith.constant 34 : index
    %427 = memref.load %arg3[%c34_104] : memref<96xf32, #tpu.memory_space<smem>>
    %428 = vector.broadcast %427 : f32 to vector<16x128xf32>
    %429 = arith.mulf %428, %262 : vector<16x128xf32>
    %430 = arith.addf %426, %429 : vector<16x128xf32>
    %c35_105 = arith.constant 35 : index
    %431 = memref.load %arg3[%c35_105] : memref<96xf32, #tpu.memory_space<smem>>
    %432 = vector.broadcast %431 : f32 to vector<16x128xf32>
    %433 = arith.mulf %432, %263 : vector<16x128xf32>
    %434 = arith.addf %430, %433 : vector<16x128xf32>
    %c36_106 = arith.constant 36 : index
    %435 = memref.load %arg3[%c36_106] : memref<96xf32, #tpu.memory_space<smem>>
    %436 = vector.broadcast %435 : f32 to vector<16x128xf32>
    %437 = arith.mulf %436, %266 : vector<16x128xf32>
    %438 = arith.addf %434, %437 : vector<16x128xf32>
    %c37_107 = arith.constant 37 : index
    %439 = memref.load %arg3[%c37_107] : memref<96xf32, #tpu.memory_space<smem>>
    %440 = vector.broadcast %439 : f32 to vector<16x128xf32>
    %441 = arith.mulf %440, %267 : vector<16x128xf32>
    %442 = arith.addf %438, %441 : vector<16x128xf32>
    %c38_108 = arith.constant 38 : index
    %443 = memref.load %arg3[%c38_108] : memref<96xf32, #tpu.memory_space<smem>>
    %444 = vector.broadcast %443 : f32 to vector<16x128xf32>
    %445 = arith.mulf %444, %268 : vector<16x128xf32>
    %446 = arith.addf %442, %445 : vector<16x128xf32>
    %c39_109 = arith.constant 39 : index
    %447 = memref.load %arg3[%c39_109] : memref<96xf32, #tpu.memory_space<smem>>
    %448 = vector.broadcast %447 : f32 to vector<16x128xf32>
    %449 = arith.mulf %448, %271 : vector<16x128xf32>
    %450 = arith.addf %446, %449 : vector<16x128xf32>
    %c40_110 = arith.constant 40 : index
    %451 = memref.load %arg3[%c40_110] : memref<96xf32, #tpu.memory_space<smem>>
    %452 = vector.broadcast %451 : f32 to vector<16x128xf32>
    %453 = arith.mulf %452, %272 : vector<16x128xf32>
    %454 = arith.addf %450, %453 : vector<16x128xf32>
    %c41_111 = arith.constant 41 : index
    %455 = memref.load %arg3[%c41_111] : memref<96xf32, #tpu.memory_space<smem>>
    %456 = vector.broadcast %455 : f32 to vector<16x128xf32>
    %457 = arith.mulf %456, %273 : vector<16x128xf32>
    %458 = arith.addf %454, %457 : vector<16x128xf32>
    %c42_112 = arith.constant 42 : index
    %459 = memref.load %arg3[%c42_112] : memref<96xf32, #tpu.memory_space<smem>>
    %460 = vector.broadcast %459 : f32 to vector<16x128xf32>
    %461 = arith.mulf %460, %276 : vector<16x128xf32>
    %462 = arith.addf %458, %461 : vector<16x128xf32>
    %c43_113 = arith.constant 43 : index
    %463 = memref.load %arg3[%c43_113] : memref<96xf32, #tpu.memory_space<smem>>
    %464 = vector.broadcast %463 : f32 to vector<16x128xf32>
    %465 = arith.mulf %464, %277 : vector<16x128xf32>
    %466 = arith.addf %462, %465 : vector<16x128xf32>
    %c44_114 = arith.constant 44 : index
    %467 = memref.load %arg3[%c44_114] : memref<96xf32, #tpu.memory_space<smem>>
    %468 = vector.broadcast %467 : f32 to vector<16x128xf32>
    %469 = arith.mulf %468, %278 : vector<16x128xf32>
    %470 = arith.addf %466, %469 : vector<16x128xf32>
    %c45_115 = arith.constant 45 : index
    %471 = memref.load %arg3[%c45_115] : memref<96xf32, #tpu.memory_space<smem>>
    %472 = vector.broadcast %471 : f32 to vector<16x128xf32>
    %473 = arith.mulf %472, %281 : vector<16x128xf32>
    %474 = arith.addf %470, %473 : vector<16x128xf32>
    %c46_116 = arith.constant 46 : index
    %475 = memref.load %arg3[%c46_116] : memref<96xf32, #tpu.memory_space<smem>>
    %476 = vector.broadcast %475 : f32 to vector<16x128xf32>
    %477 = arith.mulf %476, %282 : vector<16x128xf32>
    %478 = arith.addf %474, %477 : vector<16x128xf32>
    %c47_117 = arith.constant 47 : index
    %479 = memref.load %arg3[%c47_117] : memref<96xf32, #tpu.memory_space<smem>>
    %480 = vector.broadcast %479 : f32 to vector<16x128xf32>
    %481 = arith.mulf %480, %283 : vector<16x128xf32>
    %482 = arith.addf %478, %481 : vector<16x128xf32>
    %c1_118 = arith.constant 1 : index
    %c0_119 = arith.constant 0 : index
    %c0_120 = arith.constant 0 : index
    %483 = vector.load %arg6[%c1_118, %c0_119, %c0_120] : memref<4x16x128xf32, #tpu.memory_space<vmem>>, vector<1x16x128xf32>
    %484 = vector.shape_cast %483 : vector<1x16x128xf32> to vector<16x128xf32>
    %485 = vector.shape_cast %482 : vector<16x128xf32> to vector<1x16x128xf32>
    tpu.vector_store %arg6[%c1_118, %c0_119, %c0_120], %485 {strides = array<i32>} : memref<4x16x128xf32, #tpu.memory_space<vmem>>, vector<1x16x128xf32>,
    %c2_121 = arith.constant 2 : index
    %486 = memref.load %arg4[%c2_121] : memref<4xf32, #tpu.memory_space<smem>>
    %487 = vector.broadcast %486 : f32 to vector<16x128xf32>
    %c48 = arith.constant 48 : index
    %488 = memref.load %arg3[%c48] : memref<96xf32, #tpu.memory_space<smem>>
    %489 = vector.broadcast %488 : f32 to vector<16x128xf32>
    %490 = arith.mulf %489, %246 : vector<16x128xf32>
    %491 = arith.addf %487, %490 : vector<16x128xf32>
    %c49 = arith.constant 49 : index
    %492 = memref.load %arg3[%c49] : memref<96xf32, #tpu.memory_space<smem>>
    %493 = vector.broadcast %492 : f32 to vector<16x128xf32>
    %494 = arith.mulf %493, %247 : vector<16x128xf32>
    %495 = arith.addf %491, %494 : vector<16x128xf32>
    %c50 = arith.constant 50 : index
    %496 = memref.load %arg3[%c50] : memref<96xf32, #tpu.memory_space<smem>>
    %497 = vector.broadcast %496 : f32 to vector<16x128xf32>
    %498 = arith.mulf %497, %248 : vector<16x128xf32>
    %499 = arith.addf %495, %498 : vector<16x128xf32>
    %c51 = arith.constant 51 : index
    %500 = memref.load %arg3[%c51] : memref<96xf32, #tpu.memory_space<smem>>
    %501 = vector.broadcast %500 : f32 to vector<16x128xf32>
    %502 = arith.mulf %501, %251 : vector<16x128xf32>
    %503 = arith.addf %499, %502 : vector<16x128xf32>
    %c52 = arith.constant 52 : index
    %504 = memref.load %arg3[%c52] : memref<96xf32, #tpu.memory_space<smem>>
    %505 = vector.broadcast %504 : f32 to vector<16x128xf32>
    %506 = arith.mulf %505, %252 : vector<16x128xf32>
    %507 = arith.addf %503, %506 : vector<16x128xf32>
    %c53 = arith.constant 53 : index
    %508 = memref.load %arg3[%c53] : memref<96xf32, #tpu.memory_space<smem>>
    %509 = vector.broadcast %508 : f32 to vector<16x128xf32>
    %510 = arith.mulf %509, %253 : vector<16x128xf32>
    %511 = arith.addf %507, %510 : vector<16x128xf32>
    %c54 = arith.constant 54 : index
    %512 = memref.load %arg3[%c54] : memref<96xf32, #tpu.memory_space<smem>>
    %513 = vector.broadcast %512 : f32 to vector<16x128xf32>
    %514 = arith.mulf %513, %256 : vector<16x128xf32>
    %515 = arith.addf %511, %514 : vector<16x128xf32>
    %c55 = arith.constant 55 : index
    %516 = memref.load %arg3[%c55] : memref<96xf32, #tpu.memory_space<smem>>
    %517 = vector.broadcast %516 : f32 to vector<16x128xf32>
    %518 = arith.mulf %517, %257 : vector<16x128xf32>
    %519 = arith.addf %515, %518 : vector<16x128xf32>
    %c56 = arith.constant 56 : index
    %520 = memref.load %arg3[%c56] : memref<96xf32, #tpu.memory_space<smem>>
    %521 = vector.broadcast %520 : f32 to vector<16x128xf32>
    %522 = arith.mulf %521, %258 : vector<16x128xf32>
    %523 = arith.addf %519, %522 : vector<16x128xf32>
    %c57 = arith.constant 57 : index
    %524 = memref.load %arg3[%c57] : memref<96xf32, #tpu.memory_space<smem>>
    %525 = vector.broadcast %524 : f32 to vector<16x128xf32>
    %526 = arith.mulf %525, %261 : vector<16x128xf32>
    %527 = arith.addf %523, %526 : vector<16x128xf32>
    %c58 = arith.constant 58 : index
    %528 = memref.load %arg3[%c58] : memref<96xf32, #tpu.memory_space<smem>>
    %529 = vector.broadcast %528 : f32 to vector<16x128xf32>
    %530 = arith.mulf %529, %262 : vector<16x128xf32>
    %531 = arith.addf %527, %530 : vector<16x128xf32>
    %c59 = arith.constant 59 : index
    %532 = memref.load %arg3[%c59] : memref<96xf32, #tpu.memory_space<smem>>
    %533 = vector.broadcast %532 : f32 to vector<16x128xf32>
    %534 = arith.mulf %533, %263 : vector<16x128xf32>
    %535 = arith.addf %531, %534 : vector<16x128xf32>
    %c60 = arith.constant 60 : index
    %536 = memref.load %arg3[%c60] : memref<96xf32, #tpu.memory_space<smem>>
    %537 = vector.broadcast %536 : f32 to vector<16x128xf32>
    %538 = arith.mulf %537, %266 : vector<16x128xf32>
    %539 = arith.addf %535, %538 : vector<16x128xf32>
    %c61 = arith.constant 61 : index
    %540 = memref.load %arg3[%c61] : memref<96xf32, #tpu.memory_space<smem>>
    %541 = vector.broadcast %540 : f32 to vector<16x128xf32>
    %542 = arith.mulf %541, %267 : vector<16x128xf32>
    %543 = arith.addf %539, %542 : vector<16x128xf32>
    %c62 = arith.constant 62 : index
    %544 = memref.load %arg3[%c62] : memref<96xf32, #tpu.memory_space<smem>>
    %545 = vector.broadcast %544 : f32 to vector<16x128xf32>
    %546 = arith.mulf %545, %268 : vector<16x128xf32>
    %547 = arith.addf %543, %546 : vector<16x128xf32>
    %c63 = arith.constant 63 : index
    %548 = memref.load %arg3[%c63] : memref<96xf32, #tpu.memory_space<smem>>
    %549 = vector.broadcast %548 : f32 to vector<16x128xf32>
    %550 = arith.mulf %549, %271 : vector<16x128xf32>
    %551 = arith.addf %547, %550 : vector<16x128xf32>
    %c64 = arith.constant 64 : index
    %552 = memref.load %arg3[%c64] : memref<96xf32, #tpu.memory_space<smem>>
    %553 = vector.broadcast %552 : f32 to vector<16x128xf32>
    %554 = arith.mulf %553, %272 : vector<16x128xf32>
    %555 = arith.addf %551, %554 : vector<16x128xf32>
    %c65 = arith.constant 65 : index
    %556 = memref.load %arg3[%c65] : memref<96xf32, #tpu.memory_space<smem>>
    %557 = vector.broadcast %556 : f32 to vector<16x128xf32>
    %558 = arith.mulf %557, %273 : vector<16x128xf32>
    %559 = arith.addf %555, %558 : vector<16x128xf32>
    %c66 = arith.constant 66 : index
    %560 = memref.load %arg3[%c66] : memref<96xf32, #tpu.memory_space<smem>>
    %561 = vector.broadcast %560 : f32 to vector<16x128xf32>
    %562 = arith.mulf %561, %276 : vector<16x128xf32>
    %563 = arith.addf %559, %562 : vector<16x128xf32>
    %c67 = arith.constant 67 : index
    %564 = memref.load %arg3[%c67] : memref<96xf32, #tpu.memory_space<smem>>
    %565 = vector.broadcast %564 : f32 to vector<16x128xf32>
    %566 = arith.mulf %565, %277 : vector<16x128xf32>
    %567 = arith.addf %563, %566 : vector<16x128xf32>
    %c68 = arith.constant 68 : index
    %568 = memref.load %arg3[%c68] : memref<96xf32, #tpu.memory_space<smem>>
    %569 = vector.broadcast %568 : f32 to vector<16x128xf32>
    %570 = arith.mulf %569, %278 : vector<16x128xf32>
    %571 = arith.addf %567, %570 : vector<16x128xf32>
    %c69 = arith.constant 69 : index
    %572 = memref.load %arg3[%c69] : memref<96xf32, #tpu.memory_space<smem>>
    %573 = vector.broadcast %572 : f32 to vector<16x128xf32>
    %574 = arith.mulf %573, %281 : vector<16x128xf32>
    %575 = arith.addf %571, %574 : vector<16x128xf32>
    %c70 = arith.constant 70 : index
    %576 = memref.load %arg3[%c70] : memref<96xf32, #tpu.memory_space<smem>>
    %577 = vector.broadcast %576 : f32 to vector<16x128xf32>
    %578 = arith.mulf %577, %282 : vector<16x128xf32>
    %579 = arith.addf %575, %578 : vector<16x128xf32>
    %c71 = arith.constant 71 : index
    %580 = memref.load %arg3[%c71] : memref<96xf32, #tpu.memory_space<smem>>
    %581 = vector.broadcast %580 : f32 to vector<16x128xf32>
    %582 = arith.mulf %581, %283 : vector<16x128xf32>
    %583 = arith.addf %579, %582 : vector<16x128xf32>
    %c2_122 = arith.constant 2 : index
    %c0_123 = arith.constant 0 : index
    %c0_124 = arith.constant 0 : index
    %584 = vector.load %arg6[%c2_122, %c0_123, %c0_124] : memref<4x16x128xf32, #tpu.memory_space<vmem>>, vector<1x16x128xf32>
    %585 = vector.shape_cast %584 : vector<1x16x128xf32> to vector<16x128xf32>
    %586 = vector.shape_cast %583 : vector<16x128xf32> to vector<1x16x128xf32>
    tpu.vector_store %arg6[%c2_122, %c0_123, %c0_124], %586 {strides = array<i32>} : memref<4x16x128xf32, #tpu.memory_space<vmem>>, vector<1x16x128xf32>,
    %c3_125 = arith.constant 3 : index
    %587 = memref.load %arg4[%c3_125] : memref<4xf32, #tpu.memory_space<smem>>
    %588 = vector.broadcast %587 : f32 to vector<16x128xf32>
    %c72 = arith.constant 72 : index
    %589 = memref.load %arg3[%c72] : memref<96xf32, #tpu.memory_space<smem>>
    %590 = vector.broadcast %589 : f32 to vector<16x128xf32>
    %591 = arith.mulf %590, %246 : vector<16x128xf32>
    %592 = arith.addf %588, %591 : vector<16x128xf32>
    %c73 = arith.constant 73 : index
    %593 = memref.load %arg3[%c73] : memref<96xf32, #tpu.memory_space<smem>>
    %594 = vector.broadcast %593 : f32 to vector<16x128xf32>
    %595 = arith.mulf %594, %247 : vector<16x128xf32>
    %596 = arith.addf %592, %595 : vector<16x128xf32>
    %c74 = arith.constant 74 : index
    %597 = memref.load %arg3[%c74] : memref<96xf32, #tpu.memory_space<smem>>
    %598 = vector.broadcast %597 : f32 to vector<16x128xf32>
    %599 = arith.mulf %598, %248 : vector<16x128xf32>
    %600 = arith.addf %596, %599 : vector<16x128xf32>
    %c75 = arith.constant 75 : index
    %601 = memref.load %arg3[%c75] : memref<96xf32, #tpu.memory_space<smem>>
    %602 = vector.broadcast %601 : f32 to vector<16x128xf32>
    %603 = arith.mulf %602, %251 : vector<16x128xf32>
    %604 = arith.addf %600, %603 : vector<16x128xf32>
    %c76 = arith.constant 76 : index
    %605 = memref.load %arg3[%c76] : memref<96xf32, #tpu.memory_space<smem>>
    %606 = vector.broadcast %605 : f32 to vector<16x128xf32>
    %607 = arith.mulf %606, %252 : vector<16x128xf32>
    %608 = arith.addf %604, %607 : vector<16x128xf32>
    %c77 = arith.constant 77 : index
    %609 = memref.load %arg3[%c77] : memref<96xf32, #tpu.memory_space<smem>>
    %610 = vector.broadcast %609 : f32 to vector<16x128xf32>
    %611 = arith.mulf %610, %253 : vector<16x128xf32>
    %612 = arith.addf %608, %611 : vector<16x128xf32>
    %c78 = arith.constant 78 : index
    %613 = memref.load %arg3[%c78] : memref<96xf32, #tpu.memory_space<smem>>
    %614 = vector.broadcast %613 : f32 to vector<16x128xf32>
    %615 = arith.mulf %614, %256 : vector<16x128xf32>
    %616 = arith.addf %612, %615 : vector<16x128xf32>
    %c79 = arith.constant 79 : index
    %617 = memref.load %arg3[%c79] : memref<96xf32, #tpu.memory_space<smem>>
    %618 = vector.broadcast %617 : f32 to vector<16x128xf32>
    %619 = arith.mulf %618, %257 : vector<16x128xf32>
    %620 = arith.addf %616, %619 : vector<16x128xf32>
    %c80 = arith.constant 80 : index
    %621 = memref.load %arg3[%c80] : memref<96xf32, #tpu.memory_space<smem>>
    %622 = vector.broadcast %621 : f32 to vector<16x128xf32>
    %623 = arith.mulf %622, %258 : vector<16x128xf32>
    %624 = arith.addf %620, %623 : vector<16x128xf32>
    %c81 = arith.constant 81 : index
    %625 = memref.load %arg3[%c81] : memref<96xf32, #tpu.memory_space<smem>>
    %626 = vector.broadcast %625 : f32 to vector<16x128xf32>
    %627 = arith.mulf %626, %261 : vector<16x128xf32>
    %628 = arith.addf %624, %627 : vector<16x128xf32>
    %c82 = arith.constant 82 : index
    %629 = memref.load %arg3[%c82] : memref<96xf32, #tpu.memory_space<smem>>
    %630 = vector.broadcast %629 : f32 to vector<16x128xf32>
    %631 = arith.mulf %630, %262 : vector<16x128xf32>
    %632 = arith.addf %628, %631 : vector<16x128xf32>
    %c83 = arith.constant 83 : index
    %633 = memref.load %arg3[%c83] : memref<96xf32, #tpu.memory_space<smem>>
    %634 = vector.broadcast %633 : f32 to vector<16x128xf32>
    %635 = arith.mulf %634, %263 : vector<16x128xf32>
    %636 = arith.addf %632, %635 : vector<16x128xf32>
    %c84 = arith.constant 84 : index
    %637 = memref.load %arg3[%c84] : memref<96xf32, #tpu.memory_space<smem>>
    %638 = vector.broadcast %637 : f32 to vector<16x128xf32>
    %639 = arith.mulf %638, %266 : vector<16x128xf32>
    %640 = arith.addf %636, %639 : vector<16x128xf32>
    %c85 = arith.constant 85 : index
    %641 = memref.load %arg3[%c85] : memref<96xf32, #tpu.memory_space<smem>>
    %642 = vector.broadcast %641 : f32 to vector<16x128xf32>
    %643 = arith.mulf %642, %267 : vector<16x128xf32>
    %644 = arith.addf %640, %643 : vector<16x128xf32>
    %c86 = arith.constant 86 : index
    %645 = memref.load %arg3[%c86] : memref<96xf32, #tpu.memory_space<smem>>
    %646 = vector.broadcast %645 : f32 to vector<16x128xf32>
    %647 = arith.mulf %646, %268 : vector<16x128xf32>
    %648 = arith.addf %644, %647 : vector<16x128xf32>
    %c87 = arith.constant 87 : index
    %649 = memref.load %arg3[%c87] : memref<96xf32, #tpu.memory_space<smem>>
    %650 = vector.broadcast %649 : f32 to vector<16x128xf32>
    %651 = arith.mulf %650, %271 : vector<16x128xf32>
    %652 = arith.addf %648, %651 : vector<16x128xf32>
    %c88 = arith.constant 88 : index
    %653 = memref.load %arg3[%c88] : memref<96xf32, #tpu.memory_space<smem>>
    %654 = vector.broadcast %653 : f32 to vector<16x128xf32>
    %655 = arith.mulf %654, %272 : vector<16x128xf32>
    %656 = arith.addf %652, %655 : vector<16x128xf32>
    %c89 = arith.constant 89 : index
    %657 = memref.load %arg3[%c89] : memref<96xf32, #tpu.memory_space<smem>>
    %658 = vector.broadcast %657 : f32 to vector<16x128xf32>
    %659 = arith.mulf %658, %273 : vector<16x128xf32>
    %660 = arith.addf %656, %659 : vector<16x128xf32>
    %c90 = arith.constant 90 : index
    %661 = memref.load %arg3[%c90] : memref<96xf32, #tpu.memory_space<smem>>
    %662 = vector.broadcast %661 : f32 to vector<16x128xf32>
    %663 = arith.mulf %662, %276 : vector<16x128xf32>
    %664 = arith.addf %660, %663 : vector<16x128xf32>
    %c91 = arith.constant 91 : index
    %665 = memref.load %arg3[%c91] : memref<96xf32, #tpu.memory_space<smem>>
    %666 = vector.broadcast %665 : f32 to vector<16x128xf32>
    %667 = arith.mulf %666, %277 : vector<16x128xf32>
    %668 = arith.addf %664, %667 : vector<16x128xf32>
    %c92 = arith.constant 92 : index
    %669 = memref.load %arg3[%c92] : memref<96xf32, #tpu.memory_space<smem>>
    %670 = vector.broadcast %669 : f32 to vector<16x128xf32>
    %671 = arith.mulf %670, %278 : vector<16x128xf32>
    %672 = arith.addf %668, %671 : vector<16x128xf32>
    %c93 = arith.constant 93 : index
    %673 = memref.load %arg3[%c93] : memref<96xf32, #tpu.memory_space<smem>>
    %674 = vector.broadcast %673 : f32 to vector<16x128xf32>
    %675 = arith.mulf %674, %281 : vector<16x128xf32>
    %676 = arith.addf %672, %675 : vector<16x128xf32>
    %c94 = arith.constant 94 : index
    %677 = memref.load %arg3[%c94] : memref<96xf32, #tpu.memory_space<smem>>
    %678 = vector.broadcast %677 : f32 to vector<16x128xf32>
    %679 = arith.mulf %678, %282 : vector<16x128xf32>
    %680 = arith.addf %676, %679 : vector<16x128xf32>
    %c95 = arith.constant 95 : index
    %681 = memref.load %arg3[%c95] : memref<96xf32, #tpu.memory_space<smem>>
    %682 = vector.broadcast %681 : f32 to vector<16x128xf32>
    %683 = arith.mulf %682, %283 : vector<16x128xf32>
    %684 = arith.addf %680, %683 : vector<16x128xf32>
    %c3_126 = arith.constant 3 : index
    %c0_127 = arith.constant 0 : index
    %c0_128 = arith.constant 0 : index
    %685 = vector.load %arg6[%c3_126, %c0_127, %c0_128] : memref<4x16x128xf32, #tpu.memory_space<vmem>>, vector<1x16x128xf32>
    %686 = vector.shape_cast %685 : vector<1x16x128xf32> to vector<16x128xf32>
    %687 = vector.shape_cast %684 : vector<16x128xf32> to vector<1x16x128xf32>
    tpu.vector_store %arg6[%c3_126, %c0_127, %c0_128], %687 {strides = array<i32>} : memref<4x16x128xf32, #tpu.memory_space<vmem>>, vector<1x16x128xf32>,
    return
  }
  func.func @transform_0(%arg0: i32) -> i32 {
    %c0_i32 = arith.constant 0 : i32
    %c0_i32_0 = arith.constant 0 : i32
    return %c0_i32 : i32
  }
  func.func @transform_1(%arg0: i32) -> i32 {
    %c0_i32 = arith.constant 0 : i32
    %c0_i32_0 = arith.constant 0 : i32
    return %c0_i32 : i32
  }
  func.func @transform_2(%arg0: i32) -> i32 {
    %c0_i32 = arith.constant 0 : i32
    %c0_i32_0 = arith.constant 0 : i32
    return %c0_i32 : i32
  }
  func.func @transform_3(%arg0: i32) -> i32 {
    %c0_i32 = arith.constant 0 : i32
    %c0_i32_0 = arith.constant 0 : i32
    return %c0_i32 : i32
  }
  func.func @transform_4(%arg0: i32) -> (i32, i32, i32) {
    %c0_i32 = arith.constant 0 : i32
    %c0_i32_0 = arith.constant 0 : i32
    %c0_i32_1 = arith.constant 0 : i32
    return %c0_i32, %arg0, %c0_i32_0 : i32, i32, i32
  }
  func.func @transform_5(%arg0: i32) -> (i32, i32, i32) {
    %c0_i32 = arith.constant 0 : i32
    %c0_i32_0 = arith.constant 0 : i32
    %c0_i32_1 = arith.constant 0 : i32
    return %c0_i32, %arg0, %c0_i32_0 : i32, i32, i32
  }
}

</mosaic_0001>

<bundles_post_ra>
// kernel: mul.0
= control target key start
LH: loop header
LB: loop body
LE: loop exit
PB: predicated region body
PF: predicated region fallthrough
CT: control target
= control target key end

     0   :  { %s34_s0 = inlined_call_operand.vmem [shape: f32[48], index: 0, kind: input, shape index: {}]   ;;  %s35_s1 = inlined_call_operand.vmem [shape: f32[48], index: 1, kind: input, shape index: {}]   ;;  %s36_s2 = inlined_call_operand.vmem [shape: f32[48], index: 2, kind: output, shape index: {}]  }
   0x1   :  { %v3_v0 = vld [vmem:[%s34_s0] sm:$0x1] }
   0x2   :  { %v4_v1 = vld [vmem:[%s35_s1] sm:$0x1] }
   0x3   :  { %v7_v2 = vmul.f32 %v4_v1, %v3_v0 }
   0x5   :  { %9 = vst [vmem:[%s36_s2] sm:$0x1] %v7_v2 }

// kernel: squeeze.3
= control target key start
LH: loop header
LB: loop body
LE: loop exit
PB: predicated region body
PF: predicated region fallthrough
CT: control target
= control target key end

     0   :  { %s259_s10 = smov 93   ;;  %s260_s11 = smov 87   ;;  %vm3_vm0 = vcmask 23552   ;;  %vm9_vm1 = vcmask 786152   ;;  %vm15_vm2 = vcmask 761552   ;;  %vm21_vm3 = vcmask 736952   ;;  %s399_s0 = inlined_call_operand.vmem [shape: f32[4,8,1,3], index: 0, kind: input, shape index: {}]   ;;  %s400_s1 = inlined_call_operand.vmem [shape: f32[96], index: 1, kind: output, shape index: {}]  }
   0x1   :  { %v197_v0 = vld [vmem:[%s399_s0 + $0x1f] sm:$0x1]   ;;  %v199_v1 = vld [vmem:[%s399_s0 + $0x1d] sm:$0x1]   ;;  %v198_v2 = vld [vmem:[%s399_s0 + $0x1e] sm:$0x1]  }
   0x2   :  { %7 = vrot.lane.b32.xlu0 %v197_v0, %s259_s10  ;;  %19 = vrot.lane.b32.xlu1 %v199_v1, %s260_s11  ;;  %v200_v3 = vld [vmem:[%s399_s0 + $0x1c] sm:$0x1]   ;;  %s261_s16 = smov 90   ;;  %s262_s17 = smov 84   ;;  %v201_v4 = vld [vmem:[%s399_s0 + $0x1b] sm:$0x1]  }
   0x3   :  { %v202_v5 = vld [vmem:[%s399_s0 + $0x1a] sm:$0x1]   ;;  %s263_s22 = smov 81   ;;  %s264_s23 = smov 78   ;;  %v203_v6 = vld [vmem:[%s399_s0 + $0x19] sm:$0x1]  }
   0x4   :  { %v204_v7 = vld [vmem:[%s399_s0 + $0x18] sm:$0x1]   ;;  %s265_s28 = smov 75   ;;  %s266_s29 = smov 72   ;;  %v205_v8 = vld [vmem:[%s399_s0 + $0x17] sm:$0x1]  }
   0x5   :  { %v206_v9 = vld [vmem:[%s399_s0 + $0x16] sm:$0x1]   ;;  %v2_v10 = vld [vmem:[%s399_s0] sm:$0x1]   ;;  %s267_s7 = smov 69   ;;  %s268_s8 = smov 66  }
   0x6   :  { %13 = vrot.lane.b32.xlu0 %v198_v2, %s261_s16  ;;  %25 = vrot.lane.b32.xlu1 %v200_v3, %s262_s17  ;;  %4 = vst.msk [vmem:[#allocation0] sm:$0x1] %vm3_vm0, %v2_v10   ;;  %v207_v11 = vld [vmem:[%s399_s0 + $0x15] sm:$0x1]   ;;  %v208_v12 = vld [vmem:[%s399_s0 + $0x14] sm:$0x1]  }
   0x7   :  { %s269_s13 = smov 63   ;;  %s270_s14 = smov 60   ;;  %v209_v13 = vld [vmem:[%s399_s0 + $0x13] sm:$0x1]   ;;  %v210_v14 = vld [vmem:[%s399_s0 + $0x12] sm:$0x1]  }
   0x8   :  { %s271_s19 = smov 57   ;;  %s272_s20 = smov 54   ;;  %v211_v15 = vld [vmem:[%s399_s0 + $0x11] sm:$0x1]   ;;  %v212_v16 = vld [vmem:[%s399_s0 + $0x10] sm:$0x1]  }
   0x9   :  { %s273_s25 = smov 51   ;;  %s274_s26 = smov 48   ;;  %v213_v17 = vld [vmem:[%s399_s0 + $0xf] sm:$0x1]   ;;  %v214_v18 = vld [vmem:[%s399_s0 + $0xe] sm:$0x1]  }
   0xa   :  { %31 = vrot.lane.b32.xlu0 %v201_v4, %s263_s22  ;;  %37 = vrot.lane.b32.xlu1 %v202_v5, %s264_s23  ;;  %s275_s2 = smov 45   ;;  %s276_s3 = smov 42   ;;  %v215_v19 = vld [vmem:[%s399_s0 + $0xd] sm:$0x1]   ;;  %v216_v20 = vld [vmem:[%s399_s0 + $0xc] sm:$0x1]  }
   0xb   :  { %s278_s9 = smov 36   ;;  %v217_v21 = vld [vmem:[%s399_s0 + $0xb] sm:$0x1]   ;;  %v218_v22 = vld [vmem:[%s399_s0 + $0xa] sm:$0x1]   ;;  %s280_s15 = smov 30  }
   0xc   :  { %v219_v23 = vld [vmem:[%s399_s0 + $0x9] sm:$0x1]   ;;  %v220_v24 = vld [vmem:[%s399_s0 + $0x8] sm:$0x1]   ;;  %s282_s21 = smov 24   ;;  %s284_s27 = smov 18  }
   0xd   :  { %v221_v25 = vld [vmem:[%s399_s0 + $0x7] sm:$0x1]   ;;  %v222_v26 = vld [vmem:[%s399_s0 + $0x6] sm:$0x1]   ;;  %v223_v27 = vld [vmem:[%s399_s0 + $0x5] sm:$0x1]  }
   0xe   :  { %43 = vrot.lane.b32.xlu0 %v203_v6, %s265_s28  ;;  %49 = vrot.lane.b32.xlu1 %v204_v7, %s266_s29  ;;  %v224_v28 = vld [vmem:[%s399_s0 + $0x4] sm:$0x1]   ;;  %s286_s4 = smov 12   ;;  %v225_v29 = vld [vmem:[%s399_s0 + $0x3] sm:$0x1]   ;;  %s288_s10 = smov 6  }
   0xf   :  { %v226_v30 = vld [vmem:[%s399_s0 + $0x2] sm:$0x1]   ;;  %v227_v31 = vld [vmem:[%s399_s0 + $0x1] sm:$0x1]   ;;  %s289_s0 = smov 3   ;;  %vm27_vm4 = vcmask 712352  }
  0x10   :  { %vm33_vm5 = vcmask 687752   ;;  %vm39_vm6 = vcmask 663152   ;;  %vm45_vm7 = vcmask 638552   ;;  %vm51_vm8 = vcmask 613952  }
  0x11   :  { %vm57_vm9 = vcmask 589352   ;;  %vm63_vm10 = vcmask 564752   ;;  %vm69_vm11 = vcmask 540152   ;;  %vm75_vm12 = vcmask 515552  }
  0x12   :  { %55 = vrot.lane.b32.xlu0 %v205_v8, %s267_s7  ;;  %61 = vrot.lane.b32.xlu1 %v206_v9, %s268_s8  ;;  %s277_s8 = smov 39   ;;  %vm81_vm13 = vcmask 490952   ;;  %vm87_vm14 = vcmask 466352   ;;  %vm93_vm15 = vcmask 441752   ;;  %vm99_vm0 = vcmask 417152  }
  0x16   :  { %67 = vrot.lane.b32.xlu0 %v207_v11, %s269_s13  ;;  %73 = vrot.lane.b32.xlu1 %v208_v12, %s270_s14  ;;  %s279_s14 = smov 33  }
  0x1a   :  { %79 = vrot.lane.b32.xlu0 %v209_v13, %s271_s19  ;;  %85 = vrot.lane.b32.xlu1 %v210_v14, %s272_s20  ;;  %s281_s20 = smov 27  }
  0x1e   :  { %91 = vrot.lane.b32.xlu0 %v211_v15, %s273_s25  ;;  %97 = vrot.lane.b32.xlu1 %v212_v16, %s274_s26  ;;  %s283_s26 = smov 21  }
  0x22   :  { %103 = vrot.lane.b32.xlu0 %v213_v17, %s275_s2  ;;  %109 = vrot.lane.b32.xlu1 %v214_v18, %s276_s3  ;;  %s285_s3 = smov 15  }
  0x26   :  { %115 = vrot.lane.b32.xlu0 %v215_v19, %s277_s8  ;;  %121 = vrot.lane.b32.xlu1 %v216_v20, %s278_s9  ;;  %s287_s9 = smov 9  }
  0x2a   :  { %127 = vrot.lane.b32.xlu0 %v217_v21, %s279_s14  ;;  %133 = vrot.lane.b32.xlu1 %v218_v22, %s280_s15 }
  0x2e   :  { %139 = vrot.lane.b32.xlu0 %v219_v23, %s281_s20  ;;  %145 = vrot.lane.b32.xlu1 %v220_v24, %s282_s21 }
  0x32   :  { %151 = vrot.lane.b32.xlu0 %v221_v25, %s283_s26  ;;  %157 = vrot.lane.b32.xlu1 %v222_v26, %s284_s27 }
  0x36   :  { %163 = vrot.lane.b32.xlu0 %v223_v27, %s285_s3  ;;  %169 = vrot.lane.b32.xlu1 %v224_v28, %s286_s4 }
  0x3a   :  { %175 = vrot.lane.b32.xlu0 %v225_v29, %s287_s9  ;;  %181 = vrot.lane.b32.xlu1 %v226_v30, %s288_s10 }
  0x3e   :  { %187 = vrot.lane.b32.xlu0 %v227_v31, %s289_s0 }
  0x74   :  { %v8_v32 = vpop.permute.xlu0 %7   ;;  %v20_v33 = vpop.permute.xlu1 %19  }
  0x75   :  { %10 = vst.msk [vmem:[#allocation0] sm:$0x1] %vm9_vm1, %v8_v32   ;;  %vm105_vm1 = vcmask 392552  }
  0x78   :  { %v14_v34 = vpop.permute.xlu0 %13   ;;  %v26_v35 = vpop.permute.xlu1 %25  }
  0x79   :  { %16 = vst.msk [vmem:[#allocation0] sm:$0x1] %vm15_vm2, %v14_v34   ;;  %vm111_vm2 = vcmask 367952  }
  0x7a   :  { %22 = vst.msk [vmem:[#allocation0] sm:$0x1] %vm21_vm3, %v20_v33   ;;  %vm117_vm3 = vcmask 343352  }
  0x7b   :  { %28 = vst.msk [vmem:[#allocation0] sm:$0x1] %vm27_vm4, %v26_v35   ;;  %vm123_vm4 = vcmask 318752  }
  0x7c   :  { %v32_v36 = vpop.permute.xlu0 %31   ;;  %v38_v37 = vpop.permute.xlu1 %37  }
  0x7d   :  { %34 = vst.msk [vmem:[#allocation0] sm:$0x1] %vm33_vm5, %v32_v36   ;;  %vm129_vm5 = vcmask 294152  }
  0x7e   :  { %40 = vst.msk [vmem:[#allocation0] sm:$0x1] %vm39_vm6, %v38_v37   ;;  %vm135_vm6 = vcmask 269552  }
  0x80   :  { %v44_v38 = vpop.permute.xlu0 %43   ;;  %v50_v39 = vpop.permute.xlu1 %49  }
  0x81   :  { %46 = vst.msk [vmem:[#allocation0] sm:$0x1] %vm45_vm7, %v44_v38   ;;  %vm141_vm7 = vcmask 244952  }
  0x82   :  { %52 = vst.msk [vmem:[#allocation0] sm:$0x1] %vm51_vm8, %v50_v39   ;;  %vm147_vm8 = vcmask 220352  }
  0x84   :  { %v56_v40 = vpop.permute.xlu0 %55   ;;  %v62_v41 = vpop.permute.xlu1 %61  }
  0x85   :  { %58 = vst.msk [vmem:[#allocation0] sm:$0x1] %vm57_vm9, %v56_v40   ;;  %vm153_vm9 = vcmask 195752  }
  0x86   :  { %64 = vst.msk [vmem:[#allocation0] sm:$0x1] %vm63_vm10, %v62_v41   ;;  %vm159_vm10 = vcmask 171152  }
  0x88   :  { %v68_v42 = vpop.permute.xlu0 %67   ;;  %v74_v43 = vpop.permute.xlu1 %73  }
  0x89   :  { %70 = vst.msk [vmem:[#allocation0] sm:$0x1] %vm69_vm11, %v68_v42   ;;  %vm165_vm11 = vcmask 146552  }
  0x8a   :  { %76 = vst.msk [vmem:[#allocation0] sm:$0x1] %vm75_vm12, %v74_v43   ;;  %vm171_vm12 = vcmask 121952  }
  0x8c   :  { %v80_v44 = vpop.permute.xlu0 %79   ;;  %v86_v45 = vpop.permute.xlu1 %85  }
  0x8d   :  { %82 = vst.msk [vmem:[#allocation0] sm:$0x1] %vm81_vm13, %v80_v44   ;;  %vm177_vm13 = vcmask 97352  }
  0x8e   :  { %88 = vst.msk [vmem:[#allocation0] sm:$0x1] %vm87_vm14, %v86_v45   ;;  %vm183_vm14 = vcmask 72752  }
  0x90   :  { %v92_v46 = vpop.permute.xlu0 %91   ;;  %v98_v47 = vpop.permute.xlu1 %97  }
  0x91   :  { %94 = vst.msk [vmem:[#allocation0] sm:$0x1] %vm93_vm15, %v92_v46   ;;  %vm189_vm15 = vcmask 48152  }
  0x92   :  { %100 = vst.msk [vmem:[#allocation0] sm:$0x1] %vm99_vm0, %v98_v47  }
  0x94   :  { %v104_v48 = vpop.permute.xlu0 %103   ;;  %v110_v49 = vpop.permute.xlu1 %109  }
  0x95   :  { %106 = vst.msk [vmem:[#allocation0] sm:$0x1] %vm105_vm1, %v104_v48  }
  0x96   :  { %112 = vst.msk [vmem:[#allocation0] sm:$0x1] %vm111_vm2, %v110_v49  }
  0x98   :  { %v116_v50 = vpop.permute.xlu0 %115   ;;  %v122_v51 = vpop.permute.xlu1 %121  }
  0x99   :  { %118 = vst.msk [vmem:[#allocation0] sm:$0x1] %vm117_vm3, %v116_v50  }
  0x9a   :  { %124 = vst.msk [vmem:[#allocation0] sm:$0x1] %vm123_vm4, %v122_v51  }
  0x9c   :  { %v128_v52 = vpop.permute.xlu0 %127   ;;  %v134_v53 = vpop.permute.xlu1 %133  }
  0x9d   :  { %130 = vst.msk [vmem:[#allocation0] sm:$0x1] %vm129_vm5, %v128_v52  }
  0x9e   :  { %136 = vst.msk [vmem:[#allocation0] sm:$0x1] %vm135_vm6, %v134_v53  }
  0xa0   :  { %v140_v54 = vpop.permute.xlu0 %139   ;;  %v146_v55 = vpop.permute.xlu1 %145  }
  0xa1   :  { %142 = vst.msk [vmem:[#allocation0] sm:$0x1] %vm141_vm7, %v140_v54  }
  0xa2   :  { %148 = vst.msk [vmem:[#allocation0] sm:$0x1] %vm147_vm8, %v146_v55  }
  0xa4   :  { %v152_v56 = vpop.permute.xlu0 %151   ;;  %v158_v57 = vpop.permute.xlu1 %157  }
  0xa5   :  { %154 = vst.msk [vmem:[#allocation0] sm:$0x1] %vm153_vm9, %v152_v56  }
  0xa6   :  { %160 = vst.msk [vmem:[#allocation0] sm:$0x1] %vm159_vm10, %v158_v57  }
  0xa8   :  { %v164_v58 = vpop.permute.xlu0 %163   ;;  %v170_v59 = vpop.permute.xlu1 %169  }
  0xa9   :  { %166 = vst.msk [vmem:[#allocation0] sm:$0x1] %vm165_vm11, %v164_v58  }
  0xaa   :  { %172 = vst.msk [vmem:[#allocation0] sm:$0x1] %vm171_vm12, %v170_v59  }
  0xac   :  { %v176_v60 = vpop.permute.xlu0 %175   ;;  %v182_v61 = vpop.permute.xlu1 %181  }
  0xad   :  { %178 = vst.msk [vmem:[#allocation0] sm:$0x1] %vm177_vm13, %v176_v60  }
  0xae   :  { %184 = vst.msk [vmem:[#allocation0] sm:$0x1] %vm183_vm14, %v182_v61  }
  0xb0   :  { %v188_v62 = vpop.permute.xlu0 %187  }
  0xb1   :  { %190 = vst.msk [vmem:[#allocation0] sm:$0x1] %vm189_vm15, %v188_v62  }
  0xb8   :  { %v194_v63 = vld [vmem:[#allocation0] sm:$0x1] }
  0xb9   :  { %196 = vst [vmem:[%s400_s1] sm:$0x1] %v194_v63 }

// kernel: phase_encoder_v4.1
= control target key start
LH: loop header
LB: loop body
LE: loop exit
PB: predicated region body
PF: predicated region fallthrough
CT: control target
= control target key end

     0   :  { %10 = vsyncpa [#allocation4], 0  ;;  %s5295_s0 = inlined_call_operand.vmem [shape: f32[48], index: 0, kind: input, shape index: {}]   ;;  %s5296_s1 = inlined_call_operand.vmem [shape: f32[8], index: 1, kind: input, shape index: {}]   ;;  %s5297_s2 = inlined_call_operand.vmem [shape: f32[96], index: 2, kind: input, shape index: {}]   ;;  %s5298_s3 = inlined_call_operand.vmem [shape: f32[4], index: 3, kind: input, shape index: {}]   ;;  %s5299_s4 = inlined_call_operand.vmem [shape: f32[2,32,130], index: 4, kind: input, shape index: {}]   ;;  %s5300_s5 = inlined_call_operand.vmem [shape: f32[4,32,128], index: 5, kind: output, shape index: {}]  }
   0x1   :  { %11 = vsyncpa [#allocation6], 0 }
   0x2   :  { %12 = vsyncpa [#allocation9], 0  ;;  %s3731_s18 = smov 0   ;;  %s3733_s19 = smov 0  }
   0x3   :  { %s3735_s20 = smov 0  }
   0x4 LB: > { %s3747_s21 = sadd.s32 4294967295, %s3691_s20   ;;  %s3750_s22 = sadd.s32 1, %s3691_s20   ;;  %s3691_s20 = sphi %s3735_s20, %s5318_s20   ;;  %s3687_s19 = sphi %s3733_s19, %s5317_s19   ;;  %s3683_s18 = sphi %s3731_s18, %s5316_s18  }
   0x5   : > { %s106_s23 = ssub.s32 %s3691_s20, %s3750_s22  ;;  %s109_s24 = sadd.s32 1, %s3687_s19 }
   0x6   : > { %p107_p0 = scmp.eq.s32.totalorder %s106_s23, 0  ;;  %p116_p1 = scmp.ne.s32.totalorder %s3687_s19, %s3683_s18 }
   0x7   : > { %p117_p2 = scmp.eq.s32.totalorder %s3691_s20, 0  ;;  %p146_p3 = scmp.eq.s32.totalorder %s3747_s21, 1 }
   0x8   : > { %s3760_s25 = scalar_select %p107_p0, %s3687_s19, %s109_s24  }
   0x9   : > { %p3762_p4 = por %p117_p2, %p116_p1  ;;  %p3766_p5 = por %p146_p3, %p116_p1 }
   0xa   : > { %p3285_p6 = scmp.ge.s32.totalorder %s3691_s20, 1  ;;  %p159_p7 = scmp.lt.s32.totalorder %s3691_s20, 3 }
   0xb   : > { %s5303_s26 = scalar_select %p3762_p4, 1, 0 }
   0xc   : > { %s5304_s27 = scalar_select %p3766_p5, 1, 0 }
   0xd   : > { %p5301_p8 = scmp.eq.s32.totalorder %s3747_s21, 0  ;;  %p3773_p9 = pnand %p3285_p6, %p159_p7 }
   0xe   : > { %s183_s6 = sshll.u32 %s5296_s1, 4  ;;  %s172_s9 = sshll.u32 %s5295_s0, 4  ;;  %s184_s6 = int_to_ptr.vmem [resolvable:$true] %s183_s6  ;;  %s173_s9 = int_to_ptr.vmem [resolvable:$true] %s172_s9 }
   0xf   : > { %s5305_s28 = scalar_select %p3773_p9, 1, 0 }
  0x10   : > { %p3488_p10 = pneg %p3773_p9  ;;  %s194_s13 = sshll.u32 %s5297_s2, 4  ;;  %s3794_s13 = int_to_ptr.vmem [resolvable:$true] %s194_s13 }
  0x11   : > { %s205_s16 = sshll.u32 %s5298_s3, 4  ;;  %s3597_s17 = scalar_lea.vmem %s184_s6, 16  ;;  %s206_s16 = int_to_ptr.vmem [resolvable:$true] %s205_s16 }
  0x12   : > { %p3787_p11 = pnand %p5301_p8, %p3488_p10  ;;  %p3598_p12 = scmp.ne.s32.totalorder %s184_s6, %s3597_s17 }
  0x13   : > { %p3605_p2 = scmp.lt.s32.totalorder %s184_s6, %s184_s6  ;;  %p3606_p3 = scmp.lt.s32.totalorder %s3597_s17, %s3597_s17 }
  0x14   : > { %p3599_p13 = pneg %p3787_p11 }
  0x15   : > { %p3607_p6 = por %p3606_p3, %p3605_p2 }
  0x16   : > { %p3600_p0 = pnand %p3599_p13, %p3598_p12 }
  0x18   : > { %p3601_p1 = pneg %p3600_p0 }
  0x1a   : > { %p3608_p7 = pnand %p3607_p6, %p3601_p1 }
  0x1c   : > { %3611 = shalt.err (!%p3608_p7)
}
  0x1d   : > { %s3693_s23 = smov [#allocation5]   ;;  %s3612_s24 = scalar_lea.vmem %s173_s9, 16 }
  0x1e   : > { %3494 = dma.vmem_to_smem (!%p3787_p11), %s184_s6, 16, %s3693_s23, [#allocation6]  }
  0x1f   : > { %p3613_p10 = scmp.ne.s32.totalorder %s173_s9, %s3612_s24  ;;  %p3620_p9 = scmp.lt.s32.totalorder %s173_s9, %s173_s9 }
  0x20   : > { %p3621_p4 = scmp.lt.s32.totalorder %s3612_s24, %s3612_s24 }
  0x21   : > { %p3615_p8 = pnand %p3613_p10, %p3599_p13 }
  0x22   : > { %p3622_p12 = por %p3621_p4, %p3620_p9 }
  0x23   : > { %p3616_p5 = pneg %p3615_p8 }
  0x25   : > { %p3623_p0 = pnand %p3622_p12, %p3616_p5 }
  0x27   : > { %3626 = shalt.err (!%p3623_p0)
}
  0x28   : > { %s3694_s29 = smov [#allocation3]   ;;  %s3627_s30 = scalar_lea.vmem %s3794_s13, 16 }
  0x29   : > { %3491 = dma.vmem_to_smem (!%p3787_p11), %s173_s9, 16, %s3694_s29, [#allocation4]  }
  0x2a   : > { %p3628_p1 = scmp.ne.s32.totalorder %s3794_s13, %s3627_s30  ;;  %p3635_p8 = scmp.lt.s32.totalorder %s3794_s13, %s3794_s13 }
  0x2b   : > { %p3636_p6 = scmp.lt.s32.totalorder %s3627_s30, %s3627_s30 }
  0x2c   : > { %p3630_p2 = pnand %p3628_p1, %p3599_p13 }
  0x2d   : > { %p3637_p4 = por %p3636_p6, %p3635_p8 }
  0x2e   : > { %p3631_p3 = pneg %p3630_p2 }
  0x30   : > { %p3638_p5 = pnand %p3637_p4, %p3631_p3 }
  0x32   : > { %3641 = shalt.err (!%p3638_p5)
}
  0x33   : > { %s3695_s6 = smov [#allocation7]   ;;  %s3642_s9 = scalar_lea.vmem %s206_s16, 16 }
  0x34   : > { %3497 = dma.vmem_to_smem (!%p3787_p11), %s3794_s13, 16, %s3695_s6, [#allocation6]  }
  0x35   : > { %p3643_p9 = scmp.ne.s32.totalorder %s206_s16, %s3642_s9  ;;  %p3650_p12 = scmp.lt.s32.totalorder %s206_s16, %s206_s16 }
  0x36   : > { %p3651_p0 = scmp.lt.s32.totalorder %s3642_s9, %s3642_s9 }
  0x37   : > { %p3645_p7 = pnand %p3643_p9, %p3599_p13 }
  0x38   : > { %p3652_p1 = por %p3651_p0, %p3650_p12 }
  0x39   : > { %p3646_p10 = pneg %p3645_p7 }
  0x3b   : > { %p3653_p2 = pnand %p3652_p1, %p3646_p10 }
  0x3d   : > { %3656 = shalt.err (!%p3653_p2)
}
  0x3e   : > { %s3696_s11 = smov [#allocation8]   ;;  %p3290_p3 = scmp.ge.s32.totalorder %s3691_s20, 2 }
  0x3f   : > { %3500 = dma.vmem_to_smem (!%p3787_p11), %s206_s16, 16, %s3696_s11, [#allocation9]  }
  0x40   : > { %212 = sbr.rel (%p3290_p3) target bundleno = 79 (0x4f), region = 32  ;;  %p5307_p8 = scmp.ne.s32.totalorder (!%p3290_p3), %s5303_s26, 0 }
  0x47   : > { %215 = sbr.rel (!%p5307_p8) target bundleno = 79 (0x4f), region = 36  ;;  %s217_s12 = sand.u32 (%p5307_p8), 1, %s3687_s19  }
  0x48   : > { %s3470_s13 = sshll.u32 (%p5307_p8), %s3691_s20, 5  ;;  %s3291_s14 = sshll.u32 (%p5307_p8), %s217_s12, 6 }
  0x49   : > { %s223_s23 = scalar_lea.vmem (%p5307_p8), %s5299_s4, %s3470_s13  ;;  %s219_s10 = scalar_lea.vmem (%p5307_p8), [#allocation10], %s3291_s14 }
  0x4a   : > { %v236_v0 = vld [vmem:[%s223_s23] sm:$0xff] (%p5307_p8)  ;;  %v238_v1 = vld [vmem:[%s223_s23 + $0x8] sm:$0xff] (%p5307_p8)  ;;  %v240_v2 = vld [vmem:[%s223_s23 + $0x10] sm:$0xff] (%p5307_p8) }
  0x4b   : > { %237 = vst [vmem:[%s219_s10] sm:$0xff] (%p5307_p8), %v236_v0  ;;  %239 = vst [vmem:[%s219_s10 + $0x8] sm:$0xff] (%p5307_p8), %v238_v1  ;;  %v242_v3 = vld [vmem:[%s223_s23 + $0x18] sm:$0xff] (%p5307_p8)  ;;  %v244_v4 = vld [vmem:[%s223_s23 + $0x40] sm:$0xff] (%p5307_p8) }
  0x4c   : > { %241 = vst [vmem:[%s219_s10 + $0x10] sm:$0xff] (%p5307_p8), %v240_v2  ;;  %v246_v5 = vld [vmem:[%s223_s23 + $0x48] sm:$0xff] (%p5307_p8)  ;;  %243 = vst [vmem:[%s219_s10 + $0x18] sm:$0xff] (%p5307_p8), %v242_v3  ;;  %v248_v6 = vld [vmem:[%s223_s23 + $0x50] sm:$0xff] (%p5307_p8) }
  0x4d   : > { %245 = vst [vmem:[%s219_s10 + $0x20] sm:$0xff] (%p5307_p8), %v244_v4  ;;  %247 = vst [vmem:[%s219_s10 + $0x28] sm:$0xff] (%p5307_p8), %v246_v5  ;;  %v250_v7 = vld [vmem:[%s223_s23 + $0x58] sm:$0xff] (%p5307_p8) }
  0x4e   : > { %249 = vst [vmem:[%s219_s10 + $0x30] sm:$0xff] %v248_v6  ;;  %251 = vst [vmem:[%s219_s10 + $0x38] sm:$0xff] %v250_v7 }
  0x4f PF: > { %p5308_p11 = scmp.ne.s32.totalorder %s5305_s28, 0 }
  0x50   : > { %p5309_p13 = scmp.eq.s32.totalorder (!%p5308_p11), %s3747_s21, 0 }
  0x51   : > { %260 = sbr.rel (%p5308_p11) target bundleno = 1686 (0x696), region = 59 }
  0x58   : > { %3670 = dma.done.wait (%p5309_p13), [#allocation4], 16   ;;  %p5310_p6 = pmov %p5309_p13 }
  0x5a   : > { %3672 = vsyncadd (%p5310_p6), [#allocation4], 4294967280  ;;  %p5311_p4 = pmov %p5310_p6 }
  0x5c   : > { %3674 = dma.done.wait (%p5311_p4), [#allocation6], 32   ;;  %p5312_p5 = pmov %p5311_p4 }
  0x5d   : > { %p5313_p9 = pmov %p5311_p4 }
  0x5e   : > { %3676 = vsyncadd (%p5312_p5), [#allocation6], 4294967264 }
  0x5f   : > { %3678 = dma.done.wait (%p5313_p9), [#allocation9], 16   ;;  %p5314_p7 = pmov %p5311_p4 }
  0x60   : > { %s279_s20 = sand.u32 1, %s3683_s18  }
  0x61   : > { %3680 = vsyncadd (%p5314_p7), [#allocation9], 4294967280  ;;  %s3853_s26 = sshll.u32 %s279_s20, 6 }
  0x62   : > { %s3856_s28 = scalar_lea.vmem [#allocation10], %s3853_s26 }
  0x63   : > { %285 = sfence }
  0x64   : > { %s3306_s16 = sld [smem:[#allocation3 + $0x1]]  ;;  %s3307_s24 = sld [smem:[#allocation3 + $0x2]]  ;;  %v3859_v8 = vld [vmem:[%s3856_s28 + $0x10] sm:$0xff]  ;;  %v3862_v9 = vld [vmem:[%s3856_s28] sm:$0xff]  ;;  %v3865_v11 = vld [vmem:[%s3856_s28 + $0x18] sm:$0xff]  ;;  %vm376_vm0 = vcmask 1039360  }
  0x65   : > { %v3868_v12 = vld [vmem:[%s3856_s28 + $0x8] sm:$0xff]  ;;  %s3697_s18 = smov 127   ;;  %s3309_s29 = sld [smem:[#allocation3 + $0x4]]  ;;  %v3888_v24 = vld [vmem:[%s3856_s28 + $0x20] sm:$0xff]  ;;  %v3895_v27 = vld [vmem:[%s3856_s28 + $0x38] sm:$0xff]  ;;  %vm401_vm1 = vcmask 1031168  }
  0x66   : > { %s3698_s30 = smov 126   ;;  %v3885_v22 = vld [vmem:[%s3856_s28 + $0x28] sm:$0xff]  ;;  %s3310_s6 = sld [smem:[#allocation3 + $0x5]]  ;;  %v3898_v28 = vld [vmem:[%s3856_s28 + $0x30] sm:$0xff]  ;;  %vm309_vm2 = vcmask 15360   ;;  %vm470_vm3 = vcmask 1047560  }
  0x67   : > { %s3313_s7 = sld [smem:[#allocation3 + $0x7]]  ;;  %s3314_s8 = sld [smem:[#allocation3 + $0x8]]  ;;  %vm472_vm4 = vcmask 7168  }
  0x68   : > { %s3316_s9 = sld [smem:[#allocation3 + $0xa]]  ;;  %s3317_s11 = sld [smem:[#allocation3 + $0xb]] }
  0x69   : > { %s3320_s12 = sld [smem:[#allocation3 + $0xd]]  ;;  %s3321_s13 = sld [smem:[#allocation3 + $0xe]] }
  0x6a   : > { %v359_v10 = vstv %s3306_s16  ;;  %v384_v17 = vstv %s3307_s24  ;;  %s3323_s14 = sld [smem:[#allocation3 + $0x10]]  ;;  %s3324_s15 = sld [smem:[#allocation3 + $0x11]] }
  0x6b   : > { %v362_v13 = vmul.f32 %v359_v10, %v3859_v8  ;;  %v360_v14 = vmul.f32 %v359_v10, %v3862_v9  ;;  %v363_v15 = vmul.f32 %v359_v10, %v3865_v11  ;;  %v361_v16 = vmul.f32 %v359_v10, %v3868_v12  ;;  %s3327_s17 = sld [smem:[#allocation3 + $0x13]]  ;;  %s3974_s10 = sld [smem:[#allocation3 + $0x12]] }
  0x6c   : > { %v386_v18 = vmul.f32 %v384_v17, %v3868_v12  ;;  %v385_v19 = vmul.f32 %v384_v17, %v3862_v9  ;;  %v388_v20 = vmul.f32 %v384_v17, %v3865_v11  ;;  %v387_v21 = vmul.f32 %v384_v17, %v3859_v8  ;;  %s3972_s23 = sld [smem:[#allocation5 + $0x3]]  ;;  %s3328_s20 = sld [smem:[#allocation3 + $0x14]] }
  0x6d   : > { %372 = vrot.lane.b32.xlu1 %v362_v13, %s3697_s18  ;;  %368 = vrot.lane.b32.xlu0 %v360_v14, %s3697_s18  ;;  %v415_v23 = vstv %s3309_s29  ;;  %v439_v31 = vstv %s3310_s6  ;;  %s3330_s16 = sld [smem:[#allocation3 + $0x16]]  ;;  %s3331_s24 = sld [smem:[#allocation3 + $0x17]] }
  0x6e   : > { %v417_v25 = vmul.f32 %v3885_v22, %v415_v23  ;;  %v416_v26 = vmul.f32 %v3888_v24, %v415_v23  ;;  %v419_v29 = vmul.f32 %v3895_v27, %v415_v23  ;;  %v418_v30 = vmul.f32 %v3898_v28, %v415_v23  ;;  %s352_s29 = sld [smem:[#allocation3]]  ;;  %p5315_p10 = scmp.ne.s32.totalorder %s5304_s27, 0 }
  0x6f   : > { %v441_v32 = vmul.f32 %v3885_v22, %v439_v31  ;;  %v440_v33 = vmul.f32 %v3888_v24, %v439_v31  ;;  %v443_v34 = vmul.f32 %v3895_v27, %v439_v31  ;;  %v442_v35 = vmul.f32 %v3898_v28, %v439_v31  ;;  %s4017_s6 = sld [smem:[#allocation5]] }
  0x70   : > { %v485_v36 = vstv %s3313_s7  ;;  %v509_v41 = vstv %s3314_s8  ;;  %v539_v46 = vstv %s3316_s9  ;;  %v563_v51 = vstv %s3317_s11  ;;  %s4027_s7 = sld [smem:[#allocation3 + $0x3]]  ;;  %s3700_s8 = smov 1  }
  0x71   : > { %374 = vrot.lane.b32.xlu1 %v363_v15, %s3697_s18  ;;  %370 = vrot.lane.b32.xlu0 %v361_v16, %s3697_s18  ;;  %v487_v37 = vmul.f32 %v485_v36, %v3868_v12  ;;  %v486_v38 = vmul.f32 %v485_v36, %v3862_v9  ;;  %v489_v39 = vmul.f32 %v485_v36, %v3865_v11  ;;  %v608_v56 = vstv %s3320_s12  ;;  %s3312_s9 = sld [smem:[#allocation3 + $0x6]]  ;;  %s3311_s11 = sld [smem:[#allocation5 + $0x1]] }
  0x72   : > { %v488_v40 = vmul.f32 %v485_v36, %v3859_v8  ;;  %v511_v42 = vmul.f32 %v509_v41, %v3868_v12  ;;  %v510_v43 = vmul.f32 %v509_v41, %v3862_v9  ;;  %v513_v44 = vmul.f32 %v509_v41, %v3865_v11  ;;  %s3315_s12 = sld [smem:[#allocation3 + $0x9]] }
  0x73   : > { %v512_v45 = vmul.f32 %v509_v41, %v3859_v8  ;;  %v541_v47 = vmul.f32 %v3885_v22, %v539_v46  ;;  %v540_v48 = vmul.f32 %v3888_v24, %v539_v46  ;;  %v543_v49 = vmul.f32 %v3895_v27, %v539_v46 }
  0x74   : > { %v542_v50 = vmul.f32 %v3898_v28, %v539_v46  ;;  %v565_v52 = vmul.f32 %v3885_v22, %v563_v51  ;;  %v564_v53 = vmul.f32 %v3888_v24, %v563_v51  ;;  %v567_v54 = vmul.f32 %v3895_v27, %v563_v51 }
  0x75   : > { %395 = vrot.lane.b32.xlu1 %v386_v18, %s3698_s30  ;;  %393 = vrot.lane.b32.xlu0 %v385_v19, %s3698_s30  ;;  %v566_v55 = vmul.f32 %v3898_v28, %v563_v51  ;;  %v610_v57 = vmul.f32 %v608_v56, %v3868_v12  ;;  %v609_v58 = vmul.f32 %v608_v56, %v3862_v9  ;;  %v632_v61 = vstv %s3321_s13  ;;  %s3319_s13 = sld [smem:[#allocation3 + $0xc]] }
  0x76   : > { %v612_v59 = vmul.f32 %v608_v56, %v3865_v11  ;;  %v611_v60 = vmul.f32 %v608_v56, %v3859_v8  ;;  %v634_v62 = vmul.f32 %v632_v61, %v3868_v12  ;;  %v633_v63 = vmul.f32 %v632_v61, %v3862_v9 }
  0x77   : > { %v636_v0 = vmul.f32 %v632_v61, %v3865_v11  ;;  %v635_v1 = vmul.f32 %v632_v61, %v3859_v8  ;;  %v662_v2 = vstv %s3323_s14  ;;  %v686_v7 = vstv %s3324_s15  ;;  %s3318_s14 = sld [smem:[#allocation5 + $0x2]]  ;;  %s3322_s15 = sld [smem:[#allocation3 + $0xf]] }
  0x78   : > { %v664_v3 = vmul.f32 %v3885_v22, %v662_v2  ;;  %v663_v4 = vmul.f32 %v3888_v24, %v662_v2  ;;  %v666_v5 = vmul.f32 %v3895_v27, %v662_v2  ;;  %v665_v6 = vmul.f32 %v3898_v28, %v662_v2 }
  0x79   : > { %399 = vrot.lane.b32.xlu1 %v388_v20, %s3698_s30  ;;  %397 = vrot.lane.b32.xlu0 %v387_v21, %s3698_s30  ;;  %v688_v10 = vmul.f32 %v3885_v22, %v686_v7  ;;  %v687_v13 = vmul.f32 %v3888_v24, %v686_v7  ;;  %v690_v14 = vmul.f32 %v3895_v27, %v686_v7  ;;  %v731_v16 = vstv %s3327_s17  ;;  %s3329_s17 = sld [smem:[#allocation3 + $0x15]] }
  0x7a   : > { %v689_v15 = vmul.f32 %v3898_v28, %v686_v7  ;;  %v732_v17 = vmul.f32 %v731_v16, %v3862_v9  ;;  %v733_v18 = vmul.f32 %v731_v16, %v3868_v12  ;;  %v725_v19 = vstv %s3974_s10  ;;  %s3335_s10 = sld [smem:[#allocation3 + $0x1a]] }
  0x7b   : > { %v727_v20 = vmul.f32 %v725_v19, %v3859_v8  ;;  %v723_v21 = vstv %s3972_s23  ;;  %v353_v46 = vstv %s352_s29  ;;  %v3699_v56 = vmov 0.0   ;;  %s3334_s23 = sld [smem:[#allocation3 + $0x19]]  ;;  %s3332_s29 = sld [smem:[#allocation5 + $0x4]] }
  0x7c   : > { %v355_v51 = vmul.f32 %v353_v46, %v3859_v8  ;;  %308 = vst [vmem:[#allocation2] sm:$0xff] %v3699_v56  ;;  %310 = vst.msk [vmem:[#allocation2 + $0x8] sm:$0xff] %vm309_vm2, %v3699_v56 }
  0x7d   : > { %426 = vrot.lane.b32.xlu1 %v417_v25, %s3697_s18  ;;  %424 = vrot.lane.b32.xlu0 %v416_v26, %s3697_s18  ;;  %v3991_v23 = vadd.f32 %v727_v20, %v723_v21  ;;  %v734_v25 = vmul.f32 %v731_v16, %v3859_v8  ;;  %v735_v26 = vmul.f32 %v731_v16, %v3865_v11 }
  0x7e   : > { %311 = vst [vmem:[#allocation2 + $0x10] sm:$0xff] %v3699_v56  ;;  %312 = vst.msk [vmem:[#allocation2 + $0x18] sm:$0xff] %vm309_vm2, %v3699_v56 }
  0x7f   : > { %313 = vst [vmem:[#allocation2 + $0x20] sm:$0xff] %v3699_v56  ;;  %314 = vst.msk [vmem:[#allocation2 + $0x28] sm:$0xff] %vm309_vm2, %v3699_v56 }
  0x80   : > { %315 = vst [vmem:[#allocation2 + $0x30] sm:$0xff] %v3699_v56  ;;  %316 = vst.msk [vmem:[#allocation2 + $0x38] sm:$0xff] %vm309_vm2, %v3699_v56 }
  0x81   : > { %430 = vrot.lane.b32.xlu1 %v419_v29, %s3697_s18  ;;  %428 = vrot.lane.b32.xlu0 %v418_v30, %s3697_s18  ;;  %v755_v29 = vstv %s3328_s20  ;;  %317 = vst [vmem:[#allocation2 + $0x40] sm:$0xff] %v3699_v56  ;;  %318 = vst.msk [vmem:[#allocation2 + $0x48] sm:$0xff] %vm309_vm2, %v3699_v56  ;;  %s3337_s20 = sld [smem:[#allocation3 + $0x1c]] }
  0x82   : > { %v756_v30 = vmul.f32 %v755_v29, %v3862_v9  ;;  %v757_v31 = vmul.f32 %v755_v29, %v3868_v12  ;;  %319 = vst [vmem:[#allocation2 + $0x50] sm:$0xff] %v3699_v56  ;;  %320 = vst.msk [vmem:[#allocation2 + $0x58] sm:$0xff] %vm309_vm2, %v3699_v56 }
  0x83   : > { %321 = vst [vmem:[#allocation2 + $0x60] sm:$0xff] %v3699_v56  ;;  %322 = vst.msk [vmem:[#allocation2 + $0x68] sm:$0xff] %vm309_vm2, %v3699_v56 }
  0x84   : > { %323 = vst [vmem:[#allocation2 + $0x70] sm:$0xff] %v3699_v56  ;;  %324 = vst.msk [vmem:[#allocation2 + $0x78] sm:$0xff] %vm309_vm2, %v3699_v56 }
  0x85   : > { %450 = vrot.lane.b32.xlu1 %v441_v32, %s3698_s30  ;;  %448 = vrot.lane.b32.xlu0 %v440_v33, %s3698_s30  ;;  %v758_v32 = vmul.f32 %v755_v29, %v3859_v8  ;;  %v759_v33 = vmul.f32 %v755_v29, %v3865_v11  ;;  %325 = vst [vmem:[#allocation2 + $0x80] sm:$0xff] %v3699_v56  ;;  %326 = vst.msk [vmem:[#allocation2 + $0x88] sm:$0xff] %vm309_vm2, %v3699_v56 }
  0x86   : > { %327 = vst [vmem:[#allocation2 + $0x90] sm:$0xff] %v3699_v56  ;;  %328 = vst.msk [vmem:[#allocation2 + $0x98] sm:$0xff] %vm309_vm2, %v3699_v56 }
  0x87   : > { %329 = vst [vmem:[#allocation2 + $0xa0] sm:$0xff] %v3699_v56  ;;  %330 = vst.msk [vmem:[#allocation2 + $0xa8] sm:$0xff] %vm309_vm2, %v3699_v56 }
  0x88   : > { %331 = vst [vmem:[#allocation2 + $0xb0] sm:$0xff] %v3699_v56  ;;  %332 = vst.msk [vmem:[#allocation2 + $0xb8] sm:$0xff] %vm309_vm2, %v3699_v56 }
  0x89   : > { %454 = vrot.lane.b32.xlu1 %v443_v34, %s3698_s30  ;;  %452 = vrot.lane.b32.xlu0 %v442_v35, %s3698_s30  ;;  %v785_v34 = vstv %s3330_s16  ;;  %333 = vst [vmem:[#allocation2 + $0xc0] sm:$0xff] %v3699_v56  ;;  %334 = vst.msk [vmem:[#allocation2 + $0xc8] sm:$0xff] %vm309_vm2, %v3699_v56  ;;  %s3338_s16 = sld [smem:[#allocation3 + $0x1d]] }
  0x8a   : > { %v786_v35 = vmul.f32 %v3888_v24, %v785_v34  ;;  %v787_v36 = vmul.f32 %v3885_v22, %v785_v34  ;;  %335 = vst [vmem:[#allocation2 + $0xd0] sm:$0xff] %v3699_v56  ;;  %336 = vst.msk [vmem:[#allocation2 + $0xd8] sm:$0xff] %vm309_vm2, %v3699_v56 }
  0x8b   : > { %337 = vst [vmem:[#allocation2 + $0xe0] sm:$0xff] %v3699_v56  ;;  %338 = vst.msk [vmem:[#allocation2 + $0xe8] sm:$0xff] %vm309_vm2, %v3699_v56 }
  0x8c   : > { %339 = vst [vmem:[#allocation2 + $0xf0] sm:$0xff] %v3699_v56  ;;  %340 = vst.msk [vmem:[#allocation2 + $0xf8] sm:$0xff] %vm309_vm2, %v3699_v56 }
  0x8d   : > { %496 = vrot.lane.b32.xlu1 %v487_v37, %s3697_s18  ;;  %494 = vrot.lane.b32.xlu0 %v486_v38, %s3697_s18  ;;  %v788_v37 = vmul.f32 %v3898_v28, %v785_v34  ;;  %v789_v38 = vmul.f32 %v3895_v27, %v785_v34 }
  0x91   : > { %500 = vrot.lane.b32.xlu1 %v489_v39, %s3697_s18  ;;  %498 = vrot.lane.b32.xlu0 %v488_v40, %s3697_s18  ;;  %v4013_v39 = vstv %s3331_s24  ;;  %s3333_s24 = sld [smem:[#allocation3 + $0x18]] }
  0x95   : > { %520 = vrot.lane.b32.xlu1 %v511_v42, %s3698_s30  ;;  %518 = vrot.lane.b32.xlu0 %v510_v43, %s3698_s30  ;;  %v810_v42 = vmul.f32 %v3888_v24, %v4013_v39  ;;  %v811_v43 = vmul.f32 %v3885_v22, %v4013_v39 }
  0x99   : > { %524 = vrot.lane.b32.xlu1 %v513_v44, %s3698_s30  ;;  %522 = vrot.lane.b32.xlu0 %v512_v45, %s3698_s30 }
  0x9d   : > { %550 = vrot.lane.b32.xlu1 %v541_v47, %s3697_s18  ;;  %548 = vrot.lane.b32.xlu0 %v540_v48, %s3697_s18  ;;  %v354_v47 = vmul.f32 %v353_v46, %v3862_v9 }
  0xa1   : > { %554 = vrot.lane.b32.xlu1 %v543_v49, %s3697_s18  ;;  %552 = vrot.lane.b32.xlu0 %v542_v50, %s3697_s18  ;;  %v351_v50 = vstv %s4017_s6  ;;  %s3336_s6 = sld [smem:[#allocation3 + $0x1b]] }
  0xa5   : > { %574 = vrot.lane.b32.xlu1 %v565_v52, %s3698_s30  ;;  %572 = vrot.lane.b32.xlu0 %v564_v53, %s3698_s30  ;;  %v356_v52 = vadd.f32 %v354_v47, %v351_v50 }
  0xa9   : > { %578 = vrot.lane.b32.xlu1 %v567_v54, %s3698_s30  ;;  %576 = vrot.lane.b32.xlu0 %v566_v55, %s3698_s30 }
  0xad   : > { %619 = vrot.lane.b32.xlu1 %v610_v57, %s3697_s18  ;;  %617 = vrot.lane.b32.xlu0 %v609_v58, %s3697_s18  ;;  %v409_v58 = vstv %s4027_s7  ;;  %s3341_s7 = sld [smem:[#allocation3 + $0x1f]] }
  0xb1   : > { %623 = vrot.lane.b32.xlu1 %v612_v59, %s3697_s18  ;;  %621 = vrot.lane.b32.xlu0 %v611_v60, %s3697_s18  ;;  %v357_v59 = vadd.f32 %v355_v51, %v351_v50 }
  0xb5   : > { %643 = vrot.lane.b32.xlu1 %v634_v62, %s3698_s30  ;;  %641 = vrot.lane.b32.xlu0 %v633_v63, %s3698_s30 }
  0xb9   : > { %647 = vrot.lane.b32.xlu1 %v636_v0, %s3698_s30  ;;  %645 = vrot.lane.b32.xlu0 %v635_v1, %s3698_s30  ;;  %v410_v1 = vmul.f32 %v3888_v24, %v409_v58 }
  0xbd   : > { %673 = vrot.lane.b32.xlu1 %v664_v3, %s3697_s18  ;;  %671 = vrot.lane.b32.xlu0 %v663_v4, %s3697_s18 }
  0xc1   : > { %677 = vrot.lane.b32.xlu1 %v666_v5, %s3697_s18  ;;  %675 = vrot.lane.b32.xlu0 %v665_v6, %s3697_s18 }
  0xc5   : > { %697 = vrot.lane.b32.xlu1 %v688_v10, %s3698_s30  ;;  %695 = vrot.lane.b32.xlu0 %v687_v13, %s3698_s30  ;;  %v411_v13 = vmul.f32 %v3898_v28, %v409_v58 }
  0xc9   : > { %701 = vrot.lane.b32.xlu1 %v690_v14, %s3698_s30  ;;  %699 = vrot.lane.b32.xlu0 %v689_v15, %s3698_s30 }
  0xcd   : > { %740 = vrot.lane.b32.xlu0 %v732_v17, %s3697_s18  ;;  %742 = vrot.lane.b32.xlu1 %v733_v18, %s3697_s18 }
  0xd1   : > { %744 = vrot.lane.b32.xlu0 %v734_v25, %s3697_s18  ;;  %746 = vrot.lane.b32.xlu1 %v735_v26, %s3697_s18 }
  0xd5   : > { %764 = vrot.lane.b32.xlu0 %v756_v30, %s3698_s30  ;;  %766 = vrot.lane.b32.xlu1 %v757_v31, %s3698_s30 }
  0xd9   : > { %768 = vrot.lane.b32.xlu0 %v758_v32, %s3698_s30  ;;  %770 = vrot.lane.b32.xlu1 %v759_v33, %s3698_s30 }
  0xdd   : > { %794 = vrot.lane.b32.xlu0 %v786_v35, %s3697_s18  ;;  %796 = vrot.lane.b32.xlu1 %v787_v36, %s3697_s18 }
  0xdf   : > { %v4015_v40 = vpop.permute.xlu1 %372  ;;  %v369_v41 = vpop.permute.xlu0 %368 }
  0xe1   : > { %798 = vrot.lane.b32.xlu0 %v788_v37, %s3697_s18  ;;  %800 = vrot.lane.b32.xlu1 %v789_v38, %s3697_s18  ;;  %v479_v37 = vstv %s3312_s9  ;;  %s3342_s9 = sld [smem:[#allocation3 + $0x20]] }
  0xe2   : > { %v480_v38 = vmul.f32 %v479_v37, %v3862_v9 }
  0xe3   : > { %v375_v44 = vpop.permute.xlu1 %374  ;;  %v371_v45 = vpop.permute.xlu0 %370 }
  0xe4   : > { %v377_v55 = vsel %vm376_vm0, %v369_v41, %v371_v45  ;;  %v378_v63 = vsel %vm376_vm0, %v4015_v40, %v375_v44  ;;  %v481_v44 = vmul.f32 %v479_v37, %v3859_v8 }
  0xe5   : > { %818 = vrot.lane.b32.xlu0 %v810_v42, %s3698_s30  ;;  %820 = vrot.lane.b32.xlu1 %v811_v43, %s3698_s30  ;;  %v381_v60 = vadd.f32 %v377_v55, %v356_v52  ;;  %v382_v3 = vadd.f32 %v378_v63, %v357_v59  ;;  %v477_v42 = vstv %s3311_s11  ;;  %s3344_s11 = sld [smem:[#allocation3 + $0x22]] }
  0xe6   : > { %v482_v43 = vadd.f32 %v480_v38, %v477_v42  ;;  %v483_v51 = vadd.f32 %v481_v44, %v477_v42 }
  0xe7   : > { %v396_v48 = vpop.permute.xlu1 %395  ;;  %v394_v49 = vpop.permute.xlu0 %393 }
  0xe8   : > { %v402_v57 = vsel %vm401_vm1, %v394_v49, %v396_v48  ;;  %v533_v49 = vstv %s3315_s12  ;;  %s3345_s12 = sld [smem:[#allocation3 + $0x23]] }
  0xe9   : > { %v406_v0 = vadd.f32 %v402_v57, %v381_v60  ;;  %v534_v56 = vmul.f32 %v3888_v24, %v533_v49 }
  0xeb   : > { %v400_v53 = vpop.permute.xlu1 %399  ;;  %v398_v54 = vpop.permute.xlu0 %397  ;;  %v412_v10 = vadd.f32 %v410_v1, %v406_v0  ;;  %v535_v0 = vmul.f32 %v3898_v28, %v533_v49 }
  0xec   : > { %v403_v2 = vsel %vm401_vm1, %v398_v54, %v400_v53 }
  0xed   : > { %v407_v7 = vadd.f32 %v403_v2, %v382_v3 }
  0xef   : > { %v427_v61 = vpop.permute.xlu1 %426  ;;  %v425_v62 = vpop.permute.xlu0 %424  ;;  %v413_v20 = vadd.f32 %v411_v13, %v407_v7 }
  0xf0   : > { %v432_v6 = vsel %vm376_vm0, %v425_v62, %v427_v61 }
  0xf1   : > { %v436_v14 = vadd.f32 %v432_v6, %v412_v10 }
  0xf3   : > { %v431_v4 = vpop.permute.xlu1 %430  ;;  %v429_v5 = vpop.permute.xlu0 %428 }
  0xf4   : > { %v433_v17 = vsel %vm376_vm0, %v429_v5, %v431_v4 }
  0xf5   : > { %v437_v26 = vadd.f32 %v433_v17, %v413_v20 }
  0xf7   : > { %v451_v15 = vpop.permute.xlu1 %450  ;;  %v449_v16 = vpop.permute.xlu0 %448 }
  0xf8   : > { %v456_v18 = vsel %vm401_vm1, %v449_v16, %v451_v15 }
  0xf9   : > { %v460_v25 = vadd.f32 %v456_v18, %v436_v14 }
  0xfb   : > { %v455_v29 = vpop.permute.xlu1 %454  ;;  %v453_v30 = vpop.permute.xlu0 %452  ;;  %464 = vrot.lane.b32.xlu0 %v460_v25, %s3700_s8 }
  0xfc   : > { %v457_v31 = vsel %vm401_vm1, %v453_v30, %v455_v29 }
  0xfd   : > { %v461_v32 = vadd.f32 %v457_v31, %v437_v26  ;;  %v602_v26 = vstv %s3319_s13  ;;  %s3340_s13 = sld [smem:[#allocation3 + $0x1e]] }
  0xfe   : > { %v603_v29 = vmul.f32 %v602_v26, %v3862_v9 }
  0xff   : > { %v497_v33 = vpop.permute.xlu1 %496  ;;  %466 = vrot.lane.b32.xlu1 %v461_v32, %s3700_s8  ;;  %v495_v34 = vpop.permute.xlu0 %494  ;;  %v600_v32 = vstv %s3318_s14  ;;  %s3343_s14 = sld [smem:[#allocation3 + $0x21]] }
 0x100   : > { %v502_v47 = vsel %vm376_vm0, %v495_v34, %v497_v33  ;;  %v605_v33 = vadd.f32 %v603_v29, %v600_v32  ;;  %v604_v34 = vmul.f32 %v602_v26, %v3859_v8  ;;  %v779_v29 = vstv %s3329_s17  ;;  %s3349_s17 = sld [smem:[#allocation3 + $0x26]] }
 0x101   : > { %v506_v50 = vadd.f32 %v502_v47, %v482_v43 }
 0x102   : > { %v606_v42 = vadd.f32 %v604_v34, %v600_v32  ;;  %v780_v34 = vmul.f32 %v3888_v24, %v779_v29 }
 0x103   : > { %v501_v35 = vpop.permute.xlu1 %500  ;;  %v499_v36 = vpop.permute.xlu0 %498 }
 0x104   : > { %v503_v54 = vsel %vm376_vm0, %v499_v36, %v501_v35 }
 0x105   : > { %v507_v58 = vadd.f32 %v503_v54, %v483_v51 }
 0x107   : > { %v521_v40 = vpop.permute.xlu1 %520  ;;  %v519_v41 = vpop.permute.xlu0 %518 }
 0x108   : > { %v526_v48 = vsel %vm401_vm1, %v519_v41, %v521_v40  ;;  %v656_v40 = vstv %s3322_s15  ;;  %s3348_s15 = sld [smem:[#allocation3 + $0x25]] }
 0x109   : > { %v530_v55 = vadd.f32 %v526_v48, %v506_v50  ;;  %v657_v47 = vmul.f32 %v3888_v24, %v656_v40 }
 0x10b   : > { %v525_v45 = vpop.permute.xlu1 %524  ;;  %v523_v46 = vpop.permute.xlu0 %522  ;;  %v536_v63 = vadd.f32 %v534_v56, %v530_v55  ;;  %v658_v55 = vmul.f32 %v3898_v28, %v656_v40 }
 0x10c   : > { %v527_v57 = vsel %vm401_vm1, %v523_v46, %v525_v45 }
 0x10d   : > { %v531_v62 = vadd.f32 %v527_v57, %v507_v58 }
 0x10f   : > { %v551_v52 = vpop.permute.xlu1 %550  ;;  %v549_v53 = vpop.permute.xlu0 %548  ;;  %v537_v6 = vadd.f32 %v535_v0, %v531_v62 }
 0x110   : > { %v556_v61 = vsel %vm376_vm0, %v549_v53, %v551_v52 }
 0x111   : > { %v560_v1 = vadd.f32 %v556_v61, %v536_v63 }
 0x113   : > { %v555_v59 = vpop.permute.xlu1 %554  ;;  %v553_v60 = vpop.permute.xlu0 %552 }
 0x114   : > { %v557_v4 = vsel %vm376_vm0, %v553_v60, %v555_v59 }
 0x115   : > { %v561_v10 = vadd.f32 %v557_v4, %v537_v6 }
 0x117   : > { %v575_v2 = vpop.permute.xlu1 %574  ;;  %v573_v3 = vpop.permute.xlu0 %572 }
 0x118   : > { %v580_v5 = vsel %vm401_vm1, %v573_v3, %v575_v2  ;;  %v812_v2 = vmul.f32 %v3898_v28, %v4013_v39 }
 0x119   : > { %v584_v7 = vadd.f32 %v580_v5, %v560_v1  ;;  %v813_v5 = vmul.f32 %v3895_v27, %v4013_v39 }
 0x11b   : > { %v579_v13 = vpop.permute.xlu1 %578  ;;  %v577_v14 = vpop.permute.xlu0 %576  ;;  %588 = vrot.lane.b32.xlu0 %v584_v7, %s3700_s8 }
 0x11c   : > { %v581_v15 = vsel %vm401_vm1, %v577_v14, %v579_v13 }
 0x11d   : > { %v585_v16 = vadd.f32 %v581_v15, %v561_v10  ;;  %v726_v10 = vmul.f32 %v725_v19, %v3862_v9 }
 0x11f   : > { %v620_v17 = vpop.permute.xlu1 %619  ;;  %590 = vrot.lane.b32.xlu1 %v585_v16, %s3700_s8  ;;  %v618_v18 = vpop.permute.xlu0 %617  ;;  %v728_v15 = vadd.f32 %v726_v10, %v723_v21 }
 0x120   : > { %v625_v37 = vsel %vm376_vm0, %v618_v18, %v620_v17 }
 0x121   : > { %v629_v41 = vadd.f32 %v625_v37, %v605_v33 }
 0x123   : > { %v624_v20 = vpop.permute.xlu1 %623  ;;  %v622_v25 = vpop.permute.xlu0 %621 }
 0x124   : > { %v626_v45 = vsel %vm376_vm0, %v622_v25, %v624_v20 }
 0x125   : > { %v630_v49 = vadd.f32 %v626_v45, %v606_v42 }
 0x127   : > { %v644_v30 = vpop.permute.xlu1 %643  ;;  %v642_v31 = vpop.permute.xlu0 %641 }
 0x128   : > { %v649_v38 = vsel %vm401_vm1, %v642_v31, %v644_v30  ;;  %v781_v31 = vmul.f32 %v3898_v28, %v779_v29 }
 0x129   : > { %v653_v46 = vadd.f32 %v649_v38, %v629_v41 }
 0x12b   : > { %v648_v35 = vpop.permute.xlu1 %647  ;;  %v646_v36 = vpop.permute.xlu0 %645  ;;  %v659_v54 = vadd.f32 %v657_v47, %v653_v46  ;;  %v854_v46 = vstv %s3334_s23  ;;  %s3351_s23 = sld [smem:[#allocation3 + $0x28]] }
 0x12c   : > { %v650_v48 = vsel %vm401_vm1, %v646_v36, %v648_v35  ;;  %v858_v10 = vmul.f32 %v854_v46, %v3865_v11 }
 0x12d   : > { %v654_v53 = vadd.f32 %v650_v48, %v630_v49  ;;  %v855_v48 = vmul.f32 %v854_v46, %v3862_v9  ;;  %v857_v49 = vmul.f32 %v854_v46, %v3859_v8 }
 0x12f   : > { %v674_v43 = vpop.permute.xlu1 %673  ;;  %v672_v44 = vpop.permute.xlu0 %671  ;;  %v660_v61 = vadd.f32 %v658_v55, %v654_v53  ;;  %v908_v53 = vstv %s3337_s20  ;;  %s3347_s20 = sld [smem:[#allocation3 + $0x24]] }
 0x130   : > { %v679_v52 = vsel %vm376_vm0, %v672_v44, %v674_v43 }
 0x131   : > { %v683_v56 = vadd.f32 %v679_v52, %v659_v54  ;;  %v909_v54 = vmul.f32 %v3888_v24, %v908_v53 }
 0x133   : > { %v678_v50 = vpop.permute.xlu1 %677  ;;  %v676_v51 = vpop.permute.xlu0 %675 }
 0x134   : > { %v680_v59 = vsel %vm376_vm0, %v676_v51, %v678_v50  ;;  %v878_v50 = vstv %s3335_s10  ;;  %s3352_s10 = sld [smem:[#allocation3 + $0x29]] }
 0x135   : > { %v684_v63 = vadd.f32 %v680_v59, %v660_v61  ;;  %v879_v51 = vmul.f32 %v878_v50, %v3862_v9  ;;  %v881_v52 = vmul.f32 %v878_v50, %v3859_v8 }
 0x137   : > { %v698_v57 = vpop.permute.xlu1 %697  ;;  %v696_v58 = vpop.permute.xlu0 %695 }
 0x138   : > { %v703_v60 = vsel %vm401_vm1, %v696_v58, %v698_v57  ;;  %v932_v57 = vstv %s3338_s16  ;;  %s3346_s16 = sld [smem:[#allocation5 + $0x6]] }
 0x139   : > { %v707_v62 = vadd.f32 %v703_v60, %v683_v56  ;;  %v911_v56 = vmul.f32 %v3898_v28, %v908_v53  ;;  %v933_v59 = vmul.f32 %v3888_v24, %v932_v57  ;;  %v935_v60 = vmul.f32 %v3898_v28, %v932_v57 }
 0x13b   : > { %v702_v0 = vpop.permute.xlu1 %701  ;;  %v700_v1 = vpop.permute.xlu0 %699  ;;  %711 = vrot.lane.b32.xlu0 %v707_v62, %s3700_s8 }
 0x13c   : > { %v704_v3 = vsel %vm401_vm1, %v700_v1, %v702_v0 }
 0x13d   : > { %v708_v4 = vadd.f32 %v704_v3, %v684_v63 }
 0x13f   : > { %713 = vrot.lane.b32.xlu1 %v708_v4, %s3700_s8  ;;  %822 = vrot.lane.b32.xlu0 %v812_v2, %s3698_s30  ;;  %v741_v6 = vpop.permute.xlu0 %740  ;;  %v743_v7 = vpop.permute.xlu1 %742 }
 0x140   : > { %v748_v16 = vsel %vm376_vm0, %v741_v6, %v743_v7  ;;  %v856_v7 = vmul.f32 %v854_v46, %v3868_v12 }
 0x141   : > { %v752_v20 = vadd.f32 %v748_v16, %v728_v15  ;;  %v910_v15 = vmul.f32 %v3885_v22, %v908_v53  ;;  %v912_v16 = vmul.f32 %v3895_v27, %v908_v53 }
 0x143   : > { %824 = vrot.lane.b32.xlu1 %v813_v5, %s3698_s30  ;;  %v745_v13 = vpop.permute.xlu0 %744  ;;  %v747_v14 = vpop.permute.xlu1 %746 }
 0x144   : > { %v749_v17 = vsel %vm376_vm0, %v745_v13, %v747_v14  ;;  %v880_v13 = vmul.f32 %v878_v50, %v3868_v12  ;;  %v882_v14 = vmul.f32 %v878_v50, %v3865_v11  ;;  %v936_v11 = vmul.f32 %v3895_v27, %v932_v57 }
 0x145   : > { %v753_v25 = vadd.f32 %v749_v17, %v3991_v23 }
 0x147   : > { %v765_v18 = vpop.permute.xlu0 %764  ;;  %v767_v39 = vpop.permute.xlu1 %766 }
 0x148   : > { %v772_v26 = vsel %vm401_vm1, %v765_v18, %v767_v39  ;;  %v934_v18 = vmul.f32 %v3885_v22, %v932_v57  ;;  %v848_v22 = vstv %s3333_s24  ;;  %s3350_s24 = sld [smem:[#allocation3 + $0x27]] }
 0x149   : > { %v776_v33 = vadd.f32 %v772_v26, %v752_v20 }
 0x14b   : > { %v769_v19 = vpop.permute.xlu0 %768  ;;  %v771_v30 = vpop.permute.xlu1 %770  ;;  %v782_v38 = vadd.f32 %v780_v34, %v776_v33 }
 0x14c   : > { %v773_v32 = vsel %vm401_vm1, %v769_v19, %v771_v30 }
 0x14d   : > { %v777_v21 = vadd.f32 %v773_v32, %v753_v25 }
 0x14f   : > { %v795_v35 = vpop.permute.xlu0 %794  ;;  %v797_v36 = vpop.permute.xlu1 %796  ;;  %v783_v37 = vadd.f32 %v781_v31, %v777_v21  ;;  %v849_v31 = vmul.f32 %v848_v22, %v3862_v9  ;;  %v846_v21 = vstv %s3332_s29  ;;  %s3355_s29 = sld [smem:[#allocation3 + $0x2b]] }
 0x150   : > { %v802_v23 = vsel %vm376_vm0, %v795_v35, %v797_v36  ;;  %v850_v35 = vmul.f32 %v848_v22, %v3859_v8  ;;  %v4228_v22 = vld [vmem:[%s3856_s28 + $0x38] sm:$0xff] }
 0x151   : > { %v806_v42 = vadd.f32 %v802_v23, %v782_v38  ;;  %v851_v34 = vadd.f32 %v849_v31, %v846_v21 }
 0x153   : > { %v799_v40 = vpop.permute.xlu0 %798  ;;  %v801_v41 = vpop.permute.xlu1 %800 }
 0x154   : > { %v803_v1 = vsel %vm376_vm0, %v799_v40, %v801_v41  ;;  %v902_v40 = vstv %s3336_s6  ;;  %s3356_s6 = sld [smem:[#allocation3 + $0x2c]] }
 0x155   : > { %v807_v3 = vadd.f32 %v803_v1, %v783_v37  ;;  %v903_v46 = vmul.f32 %v3888_v24, %v902_v40  ;;  %v904_v53 = vmul.f32 %v3898_v28, %v902_v40 }
 0x157   : > { %v819_v43 = vpop.permute.xlu0 %818  ;;  %v821_v44 = vpop.permute.xlu1 %820 }
 0x158   : > { %v826_v45 = vsel %vm401_vm1, %v819_v43, %v821_v44 }
 0x159   : > { %v830_v47 = vadd.f32 %v826_v45, %v806_v42  ;;  %v852_v42 = vadd.f32 %v850_v35, %v846_v21 }
 0x15b   : > { %834 = vrot.lane.b32.xlu0 %v830_v47, %s3700_s8 }
 0x15f   : > { %863 = vrot.lane.b32.xlu0 %v855_v48, %s3697_s18 }
 0x163   : > { %867 = vrot.lane.b32.xlu0 %v857_v49, %s3697_s18 }
 0x167   : > { %887 = vrot.lane.b32.xlu0 %v879_v51, %s3698_s30 }
 0x16b   : > { %891 = vrot.lane.b32.xlu0 %v881_v52, %s3698_s30 }
 0x16d   : > { %v465_v55 = vpop.permute.xlu0 %464 }
 0x16e   : > { %471 = vst.msk [vmem:[#allocation2] sm:$0xff] %vm470_vm3, %v465_v55 }
 0x16f   : > { %473 = vst.msk [vmem:[#allocation2 + $0x8] sm:$0xff] %vm472_vm4, %v465_v55  ;;  %917 = vrot.lane.b32.xlu0 %v909_v54, %s3697_s18 }
 0x171   : > { %v467_v58 = vpop.permute.xlu1 %466 }
 0x172   : > { %474 = vst.msk [vmem:[#allocation2 + $0x10] sm:$0xff] %vm470_vm3, %v467_v58 }
 0x173   : > { %475 = vst.msk [vmem:[#allocation2 + $0x18] sm:$0xff] %vm472_vm4, %v467_v58  ;;  %921 = vrot.lane.b32.xlu0 %v911_v56, %s3697_s18  ;;  %v977_v58 = vstv %s3341_s7  ;;  %s3358_s7 = sld [smem:[#allocation3 + $0x2e]] }
 0x177   : > { %941 = vrot.lane.b32.xlu0 %v933_v59, %s3698_s30 }
 0x17b   : > { %945 = vrot.lane.b32.xlu0 %v935_v60, %s3698_s30 }
 0x18d   : > { %v589_v61 = vpop.permute.xlu0 %588 }
 0x18e   : > { %595 = vst.msk [vmem:[#allocation2 + $0x20] sm:$0xff] %vm470_vm3, %v589_v61 }
 0x18f   : > { %596 = vst.msk [vmem:[#allocation2 + $0x28] sm:$0xff] %vm472_vm4, %v589_v61 }
 0x191   : > { %v591_v62 = vpop.permute.xlu1 %590 }
 0x192   : > { %597 = vst.msk [vmem:[#allocation2 + $0x30] sm:$0xff] %vm470_vm3, %v591_v62 }
 0x193   : > { %598 = vst.msk [vmem:[#allocation2 + $0x38] sm:$0xff] %vm472_vm4, %v591_v62 }
 0x1ad   : > { %v712_v63 = vpop.permute.xlu0 %711 }
 0x1ae   : > { %718 = vst.msk [vmem:[#allocation2 + $0x40] sm:$0xff] %vm470_vm3, %v712_v63 }
 0x1af   : > { %719 = vst.msk [vmem:[#allocation2 + $0x48] sm:$0xff] %vm472_vm4, %v712_v63 }
 0x1b1   : > { %v714_v0 = vpop.permute.xlu1 %713  ;;  %v823_v2 = vpop.permute.xlu0 %822 }
 0x1b2   : > { %720 = vst.msk [vmem:[#allocation2 + $0x50] sm:$0xff] %vm470_vm3, %v714_v0 }
 0x1b3   : > { %721 = vst.msk [vmem:[#allocation2 + $0x58] sm:$0xff] %vm472_vm4, %v714_v0  ;;  %v978_v0 = vmul.f32 %v977_v58, %v3862_v9  ;;  %v4186_v9 = vld [vmem:[%s3856_s28 + $0x18] sm:$0xff] }
 0x1b5   : > { %v825_v4 = vpop.permute.xlu1 %824 }
 0x1b6   : > { %v827_v5 = vsel %vm401_vm1, %v823_v2, %v825_v4  ;;  %v4180_v4 = vld [vmem:[%s3856_s28 + $0x10] sm:$0xff] }
 0x1b7   : > { %v831_v6 = vadd.f32 %v827_v5, %v807_v3  ;;  %v979_v3 = vmul.f32 %v977_v58, %v3868_v12  ;;  %v980_v5 = vmul.f32 %v4180_v4, %v977_v58  ;;  %v4196_v12 = vld [vmem:[%s3856_s28 + $0x8] sm:$0xff] }
 0x1b9   : > { %836 = vrot.lane.b32.xlu1 %v831_v6, %s3700_s8  ;;  %v1001_v6 = vstv %s3342_s9  ;;  %s3359_s9 = sld [smem:[#allocation3 + $0x2f]] }
 0x1bd   : > { %865 = vrot.lane.b32.xlu1 %v856_v7, %s3697_s18  ;;  %v981_v7 = vmul.f32 %v4186_v9, %v977_v58 }
 0x1c1   : > { %869 = vrot.lane.b32.xlu1 %v858_v10, %s3697_s18  ;;  %v4190_v10 = vld [vmem:[%s3856_s28] sm:$0xff] }
 0x1c5   : > { %889 = vrot.lane.b32.xlu1 %v880_v13, %s3698_s30  ;;  %v1002_v13 = vmul.f32 %v4190_v10, %v1001_v6 }
 0x1c9   : > { %893 = vrot.lane.b32.xlu1 %v882_v14, %s3698_s30  ;;  %v1003_v14 = vmul.f32 %v4196_v12, %v1001_v6 }
 0x1cd   : > { %919 = vrot.lane.b32.xlu1 %v910_v15, %s3697_s18  ;;  %v835_v17 = vpop.permute.xlu0 %834  ;;  %v1004_v15 = vmul.f32 %v4180_v4, %v1001_v6 }
 0x1ce   : > { %841 = vst.msk [vmem:[#allocation2 + $0x60] sm:$0xff] %vm470_vm3, %v835_v17 }
 0x1cf   : > { %842 = vst.msk [vmem:[#allocation2 + $0x68] sm:$0xff] %vm472_vm4, %v835_v17  ;;  %v1005_v17 = vmul.f32 %v4186_v9, %v1001_v6 }
 0x1d1   : > { %923 = vrot.lane.b32.xlu1 %v912_v16, %s3697_s18  ;;  %v864_v39 = vpop.permute.xlu0 %863  ;;  %v1031_v16 = vstv %s3344_s11  ;;  %s3354_s11 = sld [smem:[#allocation3 + $0x2a]] }
 0x1d5   : > { %943 = vrot.lane.b32.xlu1 %v934_v18, %s3698_s30  ;;  %v868_v20 = vpop.permute.xlu0 %867  ;;  %v1032_v18 = vmul.f32 %v3888_v24, %v1031_v16 }
 0x1d9   : > { %947 = vrot.lane.b32.xlu1 %v936_v11, %s3698_s30  ;;  %v888_v26 = vpop.permute.xlu0 %887  ;;  %v4207_v11 = vld [vmem:[%s3856_s28 + $0x28] sm:$0xff] }
 0x1dd   : > { %v892_v19 = vpop.permute.xlu0 %891 }
 0x1e1   : > { %v918_v33 = vpop.permute.xlu0 %917 }
 0x1e5   : > { %v922_v38 = vpop.permute.xlu0 %921 }
 0x1e9   : > { %v942_v49 = vpop.permute.xlu0 %941 }
 0x1ed   : > { %v946_v61 = vpop.permute.xlu0 %945 }
 0x22b   : > { %v837_v25 = vpop.permute.xlu1 %836 }
 0x22c   : > { %843 = vst.msk [vmem:[#allocation2 + $0x70] sm:$0xff] %vm470_vm3, %v837_v25 }
 0x22d   : > { %844 = vst.msk [vmem:[#allocation2 + $0x78] sm:$0xff] %vm472_vm4, %v837_v25  ;;  %v1055_v25 = vstv %s3345_s12  ;;  %s3353_s12 = sld [smem:[#allocation5 + $0x7]] }
 0x22f   : > { %v866_v29 = vpop.permute.xlu1 %865 }
 0x230   : > { %v871_v37 = vsel %vm376_vm0, %v864_v39, %v866_v29  ;;  %v1033_v39 = vmul.f32 %v4207_v11, %v1031_v16  ;;  %v4215_v29 = vld [vmem:[%s3856_s28 + $0x20] sm:$0xff] }
 0x231   : > { %v875_v41 = vadd.f32 %v871_v37, %v851_v34  ;;  %v1056_v24 = vmul.f32 %v4215_v29, %v1055_v25  ;;  %v971_v37 = vstv %s3340_s13  ;;  %s3357_s13 = sld [smem:[#allocation3 + $0x2d]] }
 0x233   : > { %v870_v30 = vpop.permute.xlu1 %869 }
 0x234   : > { %v872_v44 = vsel %vm376_vm0, %v868_v20, %v870_v30  ;;  %v1034_v20 = vmul.f32 %v3898_v28, %v1031_v16  ;;  %v4222_v30 = vld [vmem:[%s3856_s28 + $0x30] sm:$0xff]  ;;  %s3339_s28 = sld [smem:[#allocation5 + $0x5]] }
 0x235   : > { %v876_v48 = vadd.f32 %v872_v44, %v852_v42  ;;  %v1058_v28 = vmul.f32 %v4222_v30, %v1055_v25 }
 0x237   : > { %v890_v32 = vpop.permute.xlu1 %889 }
 0x238   : > { %v895_v23 = vsel %vm401_vm1, %v888_v26, %v890_v32  ;;  %v1035_v26 = vmul.f32 %v3895_v27, %v1031_v16  ;;  %v1059_v27 = vmul.f32 %v4228_v22, %v1055_v25 }
 0x239   : > { %v899_v45 = vadd.f32 %v895_v23, %v875_v41 }
 0x23a   : > { %v969_v41 = vstv %s3339_s28  ;;  %s3360_s28 = sld [smem:[#allocation7 + $0x1]] }
 0x23b   : > { %v894_v36 = vpop.permute.xlu1 %893  ;;  %v905_v52 = vadd.f32 %v903_v46, %v899_v45 }
 0x23c   : > { %v896_v47 = vsel %vm401_vm1, %v892_v19, %v894_v36  ;;  %v1057_v19 = vmul.f32 %v4207_v11, %v1055_v25 }
 0x23d   : > { %v900_v51 = vadd.f32 %v896_v47, %v876_v48  ;;  %v1025_v48 = vstv %s3343_s14  ;;  %s3361_s14 = sld [smem:[#allocation7 + $0x2]] }
 0x23f   : > { %v920_v43 = vpop.permute.xlu1 %919  ;;  %v906_v59 = vadd.f32 %v904_v53, %v900_v51 }
 0x240   : > { %v925_v50 = vsel %vm376_vm0, %v918_v33, %v920_v43  ;;  %v973_v43 = vmul.f32 %v4180_v4, %v971_v37 }
 0x241   : > { %v929_v54 = vadd.f32 %v925_v50, %v905_v52 }
 0x243   : > { %v924_v8 = vpop.permute.xlu1 %923 }
 0x244   : > { %v926_v56 = vsel %vm376_vm0, %v922_v38, %v924_v8  ;;  %v972_v38 = vmul.f32 %v4190_v10, %v971_v37 }
 0x245   : > { %v930_v62 = vadd.f32 %v926_v56, %v906_v59 }
 0x246   : > { %v974_v42 = vadd.f32 %v972_v38, %v969_v41 }
 0x247   : > { %v944_v55 = vpop.permute.xlu1 %943 }
 0x248   : > { %v949_v57 = vsel %vm401_vm1, %v942_v49, %v944_v55  ;;  %v975_v49 = vadd.f32 %v973_v43, %v969_v41 }
 0x249   : > { %v953_v60 = vadd.f32 %v949_v57, %v929_v54  ;;  %v1026_v54 = vmul.f32 %v4215_v29, %v1025_v48 }
 0x24b   : > { %v948_v63 = vpop.permute.xlu1 %947  ;;  %957 = vrot.lane.b32.xlu0 %v953_v60, %s3700_s8 }
 0x24c   : > { %v950_v1 = vsel %vm401_vm1, %v946_v61, %v948_v63 }
 0x24d   : > { %v954_v2 = vadd.f32 %v950_v1, %v930_v62  ;;  %v1027_v62 = vmul.f32 %v4222_v30, %v1025_v48 }
 0x24f   : > { %959 = vrot.lane.b32.xlu1 %v954_v2, %s3700_s8  ;;  %986 = vrot.lane.b32.xlu0 %v978_v0, %s3697_s18 }
 0x253   : > { %988 = vrot.lane.b32.xlu1 %v979_v3, %s3697_s18  ;;  %990 = vrot.lane.b32.xlu0 %v980_v5, %s3697_s18  ;;  %v1100_v3 = vstv %s3348_s15  ;;  %s3363_s15 = sld [smem:[#allocation7 + $0x4]] }
 0x254   : > { %v1104_v25 = vmul.f32 %v4186_v9, %v1100_v3 }
 0x257   : > { %992 = vrot.lane.b32.xlu1 %v981_v7, %s3697_s18  ;;  %1010 = vrot.lane.b32.xlu0 %v1002_v13, %s3698_s30 }
 0x25b   : > { %1012 = vrot.lane.b32.xlu1 %v1003_v14, %s3698_s30  ;;  %1014 = vrot.lane.b32.xlu0 %v1004_v15, %s3698_s30  ;;  %v1101_v15 = vmul.f32 %v4190_v10, %v1100_v3 }
 0x25f   : > { %1016 = vrot.lane.b32.xlu1 %v1005_v17, %s3698_s30  ;;  %1040 = vrot.lane.b32.xlu0 %v1032_v18, %s3697_s18  ;;  %v1102_v18 = vmul.f32 %v4196_v12, %v1100_v3 }
 0x263   : > { %1042 = vrot.lane.b32.xlu1 %v1033_v39, %s3697_s18  ;;  %1044 = vrot.lane.b32.xlu0 %v1034_v20, %s3697_s18  ;;  %v1103_v39 = vmul.f32 %v4180_v4, %v1100_v3  ;;  %v1124_v20 = vstv %s3349_s17  ;;  %s3366_s17 = sld [smem:[#allocation7 + $0x7]] }
 0x267   : > { %1046 = vrot.lane.b32.xlu1 %v1035_v26, %s3697_s18  ;;  %1064 = vrot.lane.b32.xlu0 %v1056_v24, %s3698_s30  ;;  %v1125_v26 = vmul.f32 %v4190_v10, %v1124_v20  ;;  %v1126_v24 = vmul.f32 %v4196_v12, %v1124_v20 }
 0x26b   : > { %1066 = vrot.lane.b32.xlu1 %v1057_v19, %s3698_s30  ;;  %1068 = vrot.lane.b32.xlu0 %v1058_v28, %s3698_s30  ;;  %v1127_v19 = vmul.f32 %v4180_v4, %v1124_v20  ;;  %v1154_v28 = vstv %s3351_s23  ;;  %s3367_s23 = sld [smem:[#allocation7 + $0x8]] }
 0x26f   : > { %1070 = vrot.lane.b32.xlu1 %v1059_v27, %s3698_s30  ;;  %v1128_v27 = vmul.f32 %v4186_v9, %v1124_v20 }
 0x2bd   : > { %v958_v31 = vpop.permute.xlu0 %957 }
 0x2be   : > { %964 = vst.msk [vmem:[#allocation2 + $0x80] sm:$0xff] %vm470_vm3, %v958_v31 }
 0x2bf   : > { %965 = vst.msk [vmem:[#allocation2 + $0x88] sm:$0xff] %vm472_vm4, %v958_v31  ;;  %v1155_v31 = vmul.f32 %v4215_v29, %v1154_v28 }
 0x2c1   : > { %v960_v32 = vpop.permute.xlu1 %959  ;;  %v987_v33 = vpop.permute.xlu0 %986 }
 0x2c2   : > { %966 = vst.msk [vmem:[#allocation2 + $0x90] sm:$0xff] %vm470_vm3, %v960_v32 }
 0x2c3   : > { %967 = vst.msk [vmem:[#allocation2 + $0x98] sm:$0xff] %vm472_vm4, %v960_v32  ;;  %v1156_v32 = vmul.f32 %v4207_v11, %v1154_v28 }
 0x2c5   : > { %v989_v21 = vpop.permute.xlu1 %988  ;;  %v991_v34 = vpop.permute.xlu0 %990 }
 0x2c6   : > { %v994_v46 = vsel %vm376_vm0, %v987_v33, %v989_v21  ;;  %v1157_v33 = vmul.f32 %v4222_v30, %v1154_v28  ;;  %v1178_v21 = vstv %s3352_s10  ;;  %s3369_s10 = sld [smem:[#allocation7 + $0xa]] }
 0x2c7   : > { %v998_v8 = vadd.f32 %v994_v46, %v974_v42  ;;  %v1181_v37 = vmul.f32 %v4222_v30, %v1178_v21  ;;  %v1182_v38 = vmul.f32 %v4228_v22, %v1178_v21  ;;  %v1094_v46 = vstv %s3347_s20  ;;  %s3370_s20 = sld [smem:[#allocation7 + $0xb]] }
 0x2c9   : > { %v993_v35 = vpop.permute.xlu1 %992  ;;  %v1011_v36 = vpop.permute.xlu0 %1010 }
 0x2ca   : > { %v995_v52 = vsel %vm376_vm0, %v991_v34, %v993_v35  ;;  %v1158_v34 = vmul.f32 %v4228_v22, %v1154_v28  ;;  %v1179_v35 = vmul.f32 %v4215_v29, %v1178_v21 }
 0x2cb   : > { %v999_v56 = vadd.f32 %v995_v52, %v975_v49  ;;  %v1092_v49 = vstv %s3346_s16  ;;  %s3372_s16 = sld [smem:[#allocation7 + $0xd]] }
 0x2cd   : > { %v1013_v23 = vpop.permute.xlu1 %1012  ;;  %v1015_v40 = vpop.permute.xlu0 %1014 }
 0x2ce   : > { %v1018_v47 = vsel %vm401_vm1, %v1011_v36, %v1013_v23  ;;  %v1180_v36 = vmul.f32 %v4207_v11, %v1178_v21 }
 0x2cf   : > { %v1022_v53 = vadd.f32 %v1018_v47, %v998_v8  ;;  %v1095_v47 = vmul.f32 %v4190_v10, %v1094_v46 }
 0x2d1   : > { %v1017_v44 = vpop.permute.xlu1 %1016  ;;  %v1041_v45 = vpop.permute.xlu0 %1040  ;;  %v1028_v61 = vadd.f32 %v1026_v54, %v1022_v53 }
 0x2d2   : > { %v1019_v55 = vsel %vm401_vm1, %v1015_v40, %v1017_v44 }
 0x2d3   : > { %v1023_v60 = vadd.f32 %v1019_v55, %v999_v56  ;;  %v1148_v56 = vstv %s3350_s24  ;;  %s3373_s24 = sld [smem:[#allocation7 + $0xe]] }
 0x2d5   : > { %v1043_v50 = vpop.permute.xlu1 %1042  ;;  %v1045_v51 = vpop.permute.xlu0 %1044  ;;  %v1029_v5 = vadd.f32 %v1027_v62, %v1023_v60 }
 0x2d6   : > { %v1048_v59 = vsel %vm376_vm0, %v1041_v45, %v1043_v50  ;;  %v1097_v50 = vadd.f32 %v1095_v47, %v1092_v49 }
 0x2d7   : > { %v1052_v63 = vadd.f32 %v1048_v59, %v1028_v61 }
 0x2d9   : > { %v1047_v57 = vpop.permute.xlu1 %1046  ;;  %v1065_v58 = vpop.permute.xlu0 %1064 }
 0x2da   : > { %v1049_v1 = vsel %vm376_vm0, %v1045_v51, %v1047_v57  ;;  %v1096_v51 = vmul.f32 %v4180_v4, %v1094_v46 }
 0x2db   : > { %v1053_v13 = vadd.f32 %v1049_v1, %v1029_v5 }
 0x2dd   : > { %v1067_v0 = vpop.permute.xlu1 %1066  ;;  %v1069_v7 = vpop.permute.xlu0 %1068 }
 0x2de   : > { %v1072_v2 = vsel %vm401_vm1, %v1065_v58, %v1067_v0  ;;  %v1098_v58 = vadd.f32 %v1096_v51, %v1092_v49 }
 0x2df   : > { %v1076_v6 = vadd.f32 %v1072_v2, %v1052_v63  ;;  %v1149_v63 = vmul.f32 %v4215_v29, %v1148_v56 }
 0x2e1   : > { %v1071_v14 = vpop.permute.xlu1 %1070  ;;  %1080 = vrot.lane.b32.xlu0 %v1076_v6, %s3700_s8 }
 0x2e2   : > { %v1073_v16 = vsel %vm401_vm1, %v1069_v7, %v1071_v14 }
 0x2e3   : > { %v1077_v17 = vadd.f32 %v1073_v16, %v1053_v13  ;;  %v1150_v13 = vmul.f32 %v4222_v30, %v1148_v56 }
 0x2e5   : > { %1082 = vrot.lane.b32.xlu1 %v1077_v17, %s3700_s8  ;;  %1109 = vrot.lane.b32.xlu0 %v1101_v15, %s3697_s18 }
 0x2e9   : > { %1111 = vrot.lane.b32.xlu1 %v1102_v18, %s3697_s18  ;;  %1113 = vrot.lane.b32.xlu0 %v1103_v39, %s3697_s18  ;;  %v1223_v18 = vstv %s3355_s29  ;;  %s3375_s29 = sld [smem:[#allocation7 + $0x10]] }
 0x2ea   : > { %v1227_v21 = vmul.f32 %v4186_v9, %v1223_v18 }
 0x2ed   : > { %1115 = vrot.lane.b32.xlu1 %v1104_v25, %s3697_s18  ;;  %1133 = vrot.lane.b32.xlu0 %v1125_v26, %s3698_s30 }
 0x2f1   : > { %1135 = vrot.lane.b32.xlu1 %v1126_v24, %s3698_s30  ;;  %1137 = vrot.lane.b32.xlu0 %v1127_v19, %s3698_s30  ;;  %v1224_v19 = vmul.f32 %v4190_v10, %v1223_v18 }
 0x2f5   : > { %1139 = vrot.lane.b32.xlu1 %v1128_v27, %s3698_s30  ;;  %1163 = vrot.lane.b32.xlu0 %v1155_v31, %s3697_s18  ;;  %v1225_v31 = vmul.f32 %v4196_v12, %v1223_v18 }
 0x2f9   : > { %1165 = vrot.lane.b32.xlu1 %v1156_v32, %s3697_s18  ;;  %1167 = vrot.lane.b32.xlu0 %v1157_v33, %s3697_s18  ;;  %v1226_v32 = vmul.f32 %v4180_v4, %v1223_v18  ;;  %v1247_v33 = vstv %s3356_s6  ;;  %s3376_s6 = sld [smem:[#allocation7 + $0x11]] }
 0x2fd   : > { %1169 = vrot.lane.b32.xlu1 %v1158_v34, %s3697_s18  ;;  %1187 = vrot.lane.b32.xlu0 %v1179_v35, %s3698_s30  ;;  %v1248_v34 = vmul.f32 %v4190_v10, %v1247_v33  ;;  %v1249_v35 = vmul.f32 %v4196_v12, %v1247_v33 }
 0x301   : > { %1189 = vrot.lane.b32.xlu1 %v1180_v36, %s3698_s30  ;;  %1191 = vrot.lane.b32.xlu0 %v1181_v37, %s3698_s30  ;;  %v1250_v36 = vmul.f32 %v4180_v4, %v1247_v33  ;;  %v1277_v37 = vstv %s3358_s7  ;;  %s3378_s7 = sld [smem:[#allocation7 + $0x13]] }
 0x302   : > { %v1280_v12 = vmul.f32 %v4222_v30, %v1277_v37 }
 0x305   : > { %1193 = vrot.lane.b32.xlu1 %v1182_v38, %s3698_s30  ;;  %v1251_v38 = vmul.f32 %v4186_v9, %v1247_v33  ;;  %v4352_v33 = vld [vmem:[#allocation2 + $0x10] sm:$0xff] }
 0x353   : > { %v1081_v23 = vpop.permute.xlu0 %1080 }
 0x354   : > { %1087 = vst.msk [vmem:[#allocation2 + $0xa0] sm:$0xff] %vm470_vm3, %v1081_v23 }
 0x355   : > { %1088 = vst.msk [vmem:[#allocation2 + $0xa8] sm:$0xff] %vm472_vm4, %v1081_v23  ;;  %v1278_v23 = vmul.f32 %v4215_v29, %v1277_v37 }
 0x357   : > { %v1083_v40 = vpop.permute.xlu1 %1082  ;;  %v1110_v41 = vpop.permute.xlu0 %1109 }
 0x358   : > { %1089 = vst.msk [vmem:[#allocation2 + $0xb0] sm:$0xff] %vm470_vm3, %v1083_v40 }
 0x359   : > { %1090 = vst.msk [vmem:[#allocation2 + $0xb8] sm:$0xff] %vm472_vm4, %v1083_v40  ;;  %v1279_v40 = vmul.f32 %v4207_v11, %v1277_v37 }
 0x35b   : > { %v1112_v42 = vpop.permute.xlu1 %1111  ;;  %v1114_v43 = vpop.permute.xlu0 %1113 }
 0x35c   : > { %v1117_v54 = vsel %vm376_vm0, %v1110_v41, %v1112_v42  ;;  %v1301_v41 = vstv %s3359_s9  ;;  %v1281_v42 = vmul.f32 %v4228_v22, %v1277_v37  ;;  %v1402_v37 = vstv %s3361_s14  ;;  %s3379_s9 = sld [smem:[#allocation7 + $0x14]]  ;;  %s4527_s14 = sld [smem:[#allocation7 + $0x3]] }
 0x35d   : > { %v1121_v57 = vadd.f32 %v1117_v54, %v1097_v50  ;;  %v1303_v9 = vmul.f32 %v4207_v11, %v1301_v41  ;;  %v1215_v54 = vstv %s3353_s12  ;;  %s4516_s12 = sld [smem:[#allocation7]] }
 0x35f   : > { %v1116_v44 = vpop.permute.xlu1 %1115  ;;  %v1134_v45 = vpop.permute.xlu0 %1133 }
 0x360   : > { %v1118_v61 = vsel %vm376_vm0, %v1114_v43, %v1116_v44  ;;  %v1302_v43 = vmul.f32 %v4215_v29, %v1301_v41  ;;  %v1304_v44 = vmul.f32 %v4222_v30, %v1301_v41 }
 0x361   : > { %v1122_v1 = vadd.f32 %v1118_v61, %v1098_v58  ;;  %v1271_v61 = vstv %s3357_s13  ;;  %s4522_s13 = sld [smem:[#allocation8]] }
 0x363   : > { %v1136_v48 = vpop.permute.xlu1 %1135  ;;  %v1138_v8 = vpop.permute.xlu0 %1137 }
 0x364   : > { %v1141_v55 = vsel %vm401_vm1, %v1134_v45, %v1136_v48  ;;  %v1305_v45 = vmul.f32 %v4228_v22, %v1301_v41  ;;  %v1217_v22 = vstv %s3354_s11  ;;  %v4370_v41 = vld [vmem:[#allocation2 + $0x20] sm:$0xff]  ;;  %s3381_s11 = sld [smem:[#allocation7 + $0x16]] }
 0x365   : > { %v1145_v62 = vadd.f32 %v1141_v55, %v1121_v57  ;;  %v1218_v51 = vmul.f32 %v4190_v10, %v1217_v22  ;;  %v1219_v56 = vmul.f32 %v4180_v4, %v1217_v22 }
 0x367   : > { %v1140_v52 = vpop.permute.xlu1 %1139  ;;  %v1164_v53 = vpop.permute.xlu0 %1163  ;;  %v1151_v7 = vadd.f32 %v1149_v63, %v1145_v62  ;;  %v1220_v55 = vadd.f32 %v1218_v51, %v1215_v54  ;;  %v1221_v63 = vadd.f32 %v1219_v56, %v1215_v54  ;;  %v4394_v51 = vld [vmem:[#allocation2 + $0x40] sm:$0xff]  ;;  %v4402_v56 = vld [vmem:[#allocation2 + $0x48] sm:$0xff] }
 0x368   : > { %v1142_v0 = vsel %vm401_vm1, %v1138_v8, %v1140_v52 }
 0x369   : > { %v1146_v6 = vadd.f32 %v1142_v0, %v1122_v1 }
 0x36b   : > { %v1166_v59 = vpop.permute.xlu1 %1165  ;;  %v1168_v60 = vpop.permute.xlu0 %1167  ;;  %v1152_v39 = vadd.f32 %v1150_v13, %v1146_v6 }
 0x36c   : > { %v1171_v5 = vsel %vm376_vm0, %v1164_v53, %v1166_v59 }
 0x36d   : > { %v1175_v14 = vadd.f32 %v1171_v5, %v1151_v7 }
 0x36f   : > { %v1170_v2 = vpop.permute.xlu1 %1169  ;;  %v1188_v3 = vpop.permute.xlu0 %1187 }
 0x370   : > { %v1172_v16 = vsel %vm376_vm0, %v1168_v60, %v1170_v2 }
 0x371   : > { %v1176_v26 = vadd.f32 %v1172_v16, %v1152_v39  ;;  %v1273_v16 = vmul.f32 %v4222_v30, %v1271_v61 }
 0x373   : > { %v1190_v15 = vpop.permute.xlu1 %1189  ;;  %v1192_v25 = vpop.permute.xlu0 %1191 }
 0x374   : > { %v1195_v17 = vsel %vm401_vm1, %v1188_v3, %v1190_v15  ;;  %v1272_v3 = vmul.f32 %v4215_v29, %v1271_v61 }
 0x375   : > { %v1199_v20 = vadd.f32 %v1195_v17, %v1175_v14 }
 0x377   : > { %v1194_v24 = vpop.permute.xlu1 %1193  ;;  %1203 = vrot.lane.b32.xlu0 %v1199_v20, %s3700_s8 }
 0x378   : > { %v1196_v28 = vsel %vm401_vm1, %v1192_v25, %v1194_v24  ;;  %v4347_v24 = vld [vmem:[#allocation2] sm:$0xff] }
 0x379   : > { %v1200_v27 = vadd.f32 %v1196_v28, %v1176_v26 }
 0x37b   : > { %1205 = vrot.lane.b32.xlu1 %v1200_v27, %s3700_s8  ;;  %1232 = vrot.lane.b32.xlu0 %v1224_v19, %s3697_s18  ;;  %v1378_v19 = vstv %s3360_s28  ;;  %s3382_s28 = sld [smem:[#allocation7 + $0x17]] }
 0x37f   : > { %1234 = vrot.lane.b32.xlu1 %v1225_v31, %s3697_s18  ;;  %1236 = vrot.lane.b32.xlu0 %v1226_v32, %s3697_s18  ;;  %v1379_v32 = vmul.f32 %v1378_v19, %v4347_v24 }
 0x383   : > { %1238 = vrot.lane.b32.xlu1 %v1227_v21, %s3697_s18  ;;  %1256 = vrot.lane.b32.xlu0 %v1248_v34, %s3698_s30  ;;  %v4354_v21 = vld [vmem:[#allocation2 + $0x8] sm:$0xff] }
 0x384   : > { %v1380_v34 = vmul.f32 %v1378_v19, %v4354_v21 }
 0x387   : > { %1258 = vrot.lane.b32.xlu1 %v1249_v35, %s3698_s30  ;;  %1260 = vrot.lane.b32.xlu0 %v1250_v36, %s3698_s30  ;;  %v1381_v35 = vmul.f32 %v1378_v19, %v4352_v33  ;;  %v4360_v36 = vld [vmem:[#allocation2 + $0x18] sm:$0xff] }
 0x38b   : > { %1262 = vrot.lane.b32.xlu1 %v1251_v38, %s3698_s30  ;;  %1286 = vrot.lane.b32.xlu0 %v1278_v23, %s3697_s18  ;;  %v1382_v38 = vmul.f32 %v1378_v19, %v4360_v36  ;;  %v1403_v23 = vmul.f32 %v1402_v37, %v4347_v24  ;;  %v4450_v19 = vld [vmem:[#allocation2 + $0x88] sm:$0xff] }
 0x38f   : > { %1288 = vrot.lane.b32.xlu1 %v1279_v40, %s3697_s18  ;;  %1290 = vrot.lane.b32.xlu0 %v1280_v12, %s3697_s18  ;;  %v1404_v40 = vmul.f32 %v1402_v37, %v4354_v21  ;;  %v1405_v12 = vmul.f32 %v1402_v37, %v4352_v33 }
 0x393   : > { %1292 = vrot.lane.b32.xlu1 %v1281_v42, %s3697_s18  ;;  %1310 = vrot.lane.b32.xlu0 %v1302_v43, %s3698_s30  ;;  %v1432_v42 = vstv %s3363_s15  ;;  %v1406_v43 = vmul.f32 %v1402_v37, %v4360_v36  ;;  %s3385_s15 = sld [smem:[#allocation7 + $0x19]] }
 0x397   : > { %1312 = vrot.lane.b32.xlu1 %v1303_v9, %s3698_s30  ;;  %1314 = vrot.lane.b32.xlu0 %v1304_v44, %s3698_s30  ;;  %v1433_v9 = vmul.f32 %v1432_v42, %v4370_v41  ;;  %v4376_v44 = vld [vmem:[#allocation2 + $0x30] sm:$0xff] }
 0x39b   : > { %1316 = vrot.lane.b32.xlu1 %v1305_v45, %s3698_s30  ;;  %v4378_v45 = vld [vmem:[#allocation2 + $0x28] sm:$0xff] }
 0x3e9   : > { %v1204_v46 = vpop.permute.xlu0 %1203 }
 0x3ea   : > { %1210 = vst.msk [vmem:[#allocation2 + $0xc0] sm:$0xff] %vm470_vm3, %v1204_v46 }
 0x3eb   : > { %1211 = vst.msk [vmem:[#allocation2 + $0xc8] sm:$0xff] %vm472_vm4, %v1204_v46  ;;  %v1434_v46 = vmul.f32 %v1432_v42, %v4378_v45 }
 0x3ed   : > { %v1206_v47 = vpop.permute.xlu1 %1205  ;;  %v1233_v48 = vpop.permute.xlu0 %1232 }
 0x3ee   : > { %1212 = vst.msk [vmem:[#allocation2 + $0xd0] sm:$0xff] %vm470_vm3, %v1206_v47 }
 0x3ef   : > { %1213 = vst.msk [vmem:[#allocation2 + $0xd8] sm:$0xff] %vm472_vm4, %v1206_v47  ;;  %v1435_v47 = vmul.f32 %v1432_v42, %v4376_v44 }
 0x3f1   : > { %v1235_v11 = vpop.permute.xlu1 %1234  ;;  %v1237_v8 = vpop.permute.xlu0 %1236 }
 0x3f2   : > { %v1240_v59 = vsel %vm376_vm0, %v1233_v48, %v1235_v11  ;;  %v4384_v48 = vld [vmem:[#allocation2 + $0x38] sm:$0xff] }
 0x3f3   : > { %v1244_v62 = vadd.f32 %v1240_v59, %v1220_v55  ;;  %v4400_v55 = vld [vmem:[#allocation2 + $0x50] sm:$0xff]  ;;  %v4408_v59 = vld [vmem:[#allocation2 + $0x58] sm:$0xff] }
 0x3f5   : > { %v1239_v49 = vpop.permute.xlu1 %1238  ;;  %v1257_v50 = vpop.permute.xlu0 %1256 }
 0x3f6   : > { %v1241_v2 = vsel %vm376_vm0, %v1237_v8, %v1239_v49  ;;  %v1436_v8 = vmul.f32 %v1432_v42, %v4384_v48  ;;  %v4472_v42 = vld [vmem:[#allocation2 + $0xb0] sm:$0xff] }
 0x3f7   : > { %v1245_v4 = vadd.f32 %v1241_v2, %v1221_v63  ;;  %v1540_v2 = vstv %s3369_s10  ;;  %s3389_s10 = sld [smem:[#allocation7 + $0x1d]] }
 0x3f9   : > { %v1259_v52 = vpop.permute.xlu1 %1258  ;;  %v1261_v53 = vpop.permute.xlu0 %1260 }
 0x3fa   : > { %v1264_v60 = vsel %vm401_vm1, %v1257_v50, %v1259_v52  ;;  %v1486_v52 = vstv %s3366_s17  ;;  %s4563_s17 = sld [smem:[#allocation7 + $0x6]] }
 0x3fb   : > { %v1268_v10 = vadd.f32 %v1264_v60, %v1244_v62  ;;  %v1487_v54 = vmul.f32 %v1486_v52, %v4394_v51  ;;  %v1510_v60 = vstv %s3367_s23  ;;  %v1490_v61 = vmul.f32 %v1486_v52, %v4408_v59  ;;  %s3388_s23 = sld [smem:[#allocation7 + $0x1c]] }
 0x3fc   : > { %v1511_v62 = vmul.f32 %v1510_v60, %v4394_v51  ;;  %v1512_v63 = vmul.f32 %v1510_v60, %v4402_v56 }
 0x3fd   : > { %v1263_v57 = vpop.permute.xlu1 %1262  ;;  %v1287_v58 = vpop.permute.xlu0 %1286  ;;  %v1274_v15 = vadd.f32 %v1272_v3, %v1268_v10  ;;  %v1514_v10 = vmul.f32 %v1510_v60, %v4408_v59 }
 0x3fe   : > { %v1265_v5 = vsel %vm401_vm1, %v1261_v53, %v1263_v57  ;;  %v1488_v57 = vmul.f32 %v1486_v52, %v4402_v56 }
 0x3ff   : > { %v1269_v14 = vadd.f32 %v1265_v5, %v1245_v4  ;;  %v4424_v5 = vld [vmem:[#allocation2 + $0x70] sm:$0xff]  ;;  %v4426_v4 = vld [vmem:[#allocation2 + $0x68] sm:$0xff] }
 0x401   : > { %v1289_v0 = vpop.permute.xlu1 %1288  ;;  %v1291_v1 = vpop.permute.xlu0 %1290  ;;  %v1275_v25 = vadd.f32 %v1273_v16, %v1269_v14  ;;  %v1564_v14 = vstv %s3370_s20  ;;  %s4588_s20 = sld [smem:[#allocation7 + $0x9]] }
 0x402   : > { %v1294_v13 = vsel %vm376_vm0, %v1287_v58, %v1289_v0  ;;  %v1489_v58 = vmul.f32 %v1486_v52, %v4400_v55  ;;  %v1513_v0 = vmul.f32 %v1510_v60, %v4400_v55  ;;  %v4490_v52 = vld [vmem:[#allocation2 + $0xc0] sm:$0xff]  ;;  %v4498_v60 = vld [vmem:[#allocation2 + $0xc8] sm:$0xff] }
 0x403   : > { %v1298_v17 = vadd.f32 %v1294_v13, %v1274_v15  ;;  %v4432_v13 = vld [vmem:[#allocation2 + $0x78] sm:$0xff] }
 0x404   : > { %v1544_v15 = vmul.f32 %v1540_v2, %v4432_v13 }
 0x405   : > { %v1293_v6 = vpop.permute.xlu1 %1292  ;;  %v1311_v7 = vpop.permute.xlu0 %1310 }
 0x406   : > { %v1295_v39 = vsel %vm376_vm0, %v1291_v1, %v1293_v6  ;;  %v4418_v1 = vld [vmem:[#allocation2 + $0x60] sm:$0xff]  ;;  %v1542_v6 = vmul.f32 %v1540_v2, %v4426_v4 }
 0x407   : > { %v1299_v28 = vadd.f32 %v1295_v39, %v1275_v25  ;;  %v1541_v3 = vmul.f32 %v1540_v2, %v4418_v1  ;;  %v1565_v16 = vmul.f32 %v1564_v14, %v4418_v1  ;;  %v4442_v39 = vld [vmem:[#allocation2 + $0x80] sm:$0xff]  ;;  %v1568_v25 = vmul.f32 %v1564_v14, %v4432_v13 }
 0x409   : > { %v1313_v18 = vpop.permute.xlu1 %1312  ;;  %v1315_v26 = vpop.permute.xlu0 %1314 }
 0x40a   : > { %v1318_v20 = vsel %vm401_vm1, %v1311_v7, %v1313_v18  ;;  %v1543_v7 = vmul.f32 %v1540_v2, %v4424_v5  ;;  %v1567_v18 = vmul.f32 %v1564_v14, %v4424_v5 }
 0x40b   : > { %v1322_v29 = vadd.f32 %v1318_v20, %v1298_v17  ;;  %v1566_v17 = vmul.f32 %v1564_v14, %v4426_v4  ;;  %v1594_v20 = vstv %s3372_s16  ;;  %s3391_s16 = sld [smem:[#allocation7 + $0x1f]] }
 0x40d   : > { %v1317_v27 = vpop.permute.xlu1 %1316  ;;  %1326 = vrot.lane.b32.xlu0 %v1322_v29, %s3700_s8  ;;  %v1595_v29 = vmul.f32 %v1594_v20, %v4442_v39 }
 0x40e   : > { %v1319_v31 = vsel %vm401_vm1, %v1315_v26, %v1317_v27  ;;  %v4448_v26 = vld [vmem:[#allocation2 + $0x90] sm:$0xff] }
 0x40f   : > { %v1323_v30 = vadd.f32 %v1319_v31, %v1299_v28  ;;  %v1596_v28 = vmul.f32 %v1594_v20, %v4450_v19  ;;  %v1597_v27 = vmul.f32 %v1594_v20, %v4448_v26  ;;  %v4456_v31 = vld [vmem:[#allocation2 + $0x98] sm:$0xff] }
 0x411   : > { %1328 = vrot.lane.b32.xlu1 %v1323_v30, %s3700_s8  ;;  %1387 = vrot.lane.b32.xlu0 %v1379_v32, %s3697_s18  ;;  %s3364_s8 = sld [smem:[#allocation7 + $0x5]]  ;;  %v1618_v30 = vstv %s3373_s24  ;;  %v1598_v32 = vmul.f32 %v1594_v20, %v4456_v31  ;;  %s3392_s24 = sld [smem:[#allocation7 + $0x20]] }
 0x412   : > { %v1621_v37 = vmul.f32 %v1618_v30, %v4448_v26 }
 0x415   : > { %1389 = vrot.lane.b32.xlu1 %v1380_v34, %s3697_s18  ;;  %1391 = vrot.lane.b32.xlu0 %v1381_v35, %s3697_s18  ;;  %v1619_v34 = vmul.f32 %v1618_v30, %v4442_v39  ;;  %v1620_v35 = vmul.f32 %v1618_v30, %v4450_v19 }
 0x417   : > { %v1456_v11 = vstv %s3364_s8  ;;  %s3386_s8 = sld [smem:[#allocation7 + $0x1a]] }
 0x418   : > { %v1457_v49 = vmul.f32 %v1456_v11, %v4370_v41  ;;  %v1458_v50 = vmul.f32 %v1456_v11, %v4378_v45  ;;  %v1459_v22 = vmul.f32 %v1456_v11, %v4376_v44  ;;  %v1460_v53 = vmul.f32 %v1456_v11, %v4384_v48 }
 0x419   : > { %1393 = vrot.lane.b32.xlu1 %v1382_v38, %s3697_s18  ;;  %1411 = vrot.lane.b32.xlu0 %v1403_v23, %s3698_s30  ;;  %v4466_v38 = vld [vmem:[#allocation2 + $0xa0] sm:$0xff]  ;;  %v1648_v23 = vstv %s3375_s29  ;;  %v1672_v11 = vstv %s3376_s6  ;;  %s4613_s29 = sld [smem:[#allocation7 + $0xc]]  ;;  %s3394_s6 = sld [smem:[#allocation7 + $0x22]] }
 0x41d   : > { %1413 = vrot.lane.b32.xlu1 %v1404_v40, %s3698_s30  ;;  %1415 = vrot.lane.b32.xlu0 %v1405_v12, %s3698_s30  ;;  %v1622_v40 = vmul.f32 %v1618_v30, %v4456_v31  ;;  %v1649_v12 = vmul.f32 %v1648_v23, %v4466_v38 }
 0x421   : > { %1417 = vrot.lane.b32.xlu1 %v1406_v43, %s3698_s30  ;;  %1441 = vrot.lane.b32.xlu0 %v1433_v9, %s3697_s18  ;;  %v4474_v43 = vld [vmem:[#allocation2 + $0xa8] sm:$0xff] }
 0x422   : > { %v1650_v9 = vmul.f32 %v1648_v23, %v4474_v43 }
 0x425   : > { %1443 = vrot.lane.b32.xlu1 %v1434_v46, %s3697_s18  ;;  %1445 = vrot.lane.b32.xlu0 %v1435_v47, %s3697_s18  ;;  %v1651_v46 = vmul.f32 %v1648_v23, %v4472_v42  ;;  %v4480_v47 = vld [vmem:[#allocation2 + $0xb8] sm:$0xff] }
 0x429   : > { %1447 = vrot.lane.b32.xlu1 %v1436_v8, %s3697_s18  ;;  %1465 = vrot.lane.b32.xlu0 %v1457_v49, %s3698_s30  ;;  %v1652_v8 = vmul.f32 %v1648_v23, %v4480_v47  ;;  %v1673_v49 = vmul.f32 %v1672_v11, %v4466_v38 }
 0x42d   : > { %1467 = vrot.lane.b32.xlu1 %v1458_v50, %s3698_s30  ;;  %1469 = vrot.lane.b32.xlu0 %v1459_v22, %s3698_s30  ;;  %v1674_v50 = vmul.f32 %v1672_v11, %v4474_v43  ;;  %v1675_v22 = vmul.f32 %v1672_v11, %v4472_v42 }
 0x431   : > { %1471 = vrot.lane.b32.xlu1 %v1460_v53, %s3698_s30  ;;  %1495 = vrot.lane.b32.xlu0 %v1487_v54, %s3697_s18  ;;  %v1702_v53 = vstv %s3378_s7  ;;  %v1676_v54 = vmul.f32 %v1672_v11, %v4480_v47  ;;  %s3395_s7 = sld [smem:[#allocation7 + $0x23]] }
 0x435   : > { %1497 = vrot.lane.b32.xlu1 %v1488_v57, %s3697_s18  ;;  %1499 = vrot.lane.b32.xlu0 %v1489_v58, %s3697_s18  ;;  %v1703_v57 = vmul.f32 %v1702_v53, %v4490_v52  ;;  %v4496_v58 = vld [vmem:[#allocation2 + $0xd0] sm:$0xff] }
 0x439   : > { %1501 = vrot.lane.b32.xlu1 %v1490_v61, %s3697_s18  ;;  %1519 = vrot.lane.b32.xlu0 %v1511_v62, %s3698_s30  ;;  %v1704_v61 = vmul.f32 %v1702_v53, %v4498_v60  ;;  %v1705_v62 = vmul.f32 %v1702_v53, %v4496_v58 }
 0x43d   : > { %1521 = vrot.lane.b32.xlu1 %v1512_v63, %s3698_s30  ;;  %1523 = vrot.lane.b32.xlu0 %v1513_v0, %s3698_s30  ;;  %v4504_v63 = vld [vmem:[#allocation2 + $0xd8] sm:$0xff]  ;;  %v1726_v0 = vstv %s3379_s9  ;;  %s4638_s9 = sld [smem:[#allocation7 + $0xf]] }
 0x43e   : > { %v1706_v2 = vmul.f32 %v1702_v53, %v4504_v63  ;;  %v1730_v14 = vmul.f32 %v1726_v0, %v4504_v63 }
 0x441   : > { %1525 = vrot.lane.b32.xlu1 %v1514_v10, %s3698_s30  ;;  %1549 = vrot.lane.b32.xlu0 %v1541_v3, %s3697_s18  ;;  %v1727_v10 = vmul.f32 %v1726_v0, %v4490_v52  ;;  %v1728_v3 = vmul.f32 %v1726_v0, %v4498_v60 }
 0x445   : > { %1551 = vrot.lane.b32.xlu1 %v1542_v6, %s3697_s18  ;;  %1553 = vrot.lane.b32.xlu0 %v1543_v7, %s3697_s18  ;;  %v1729_v6 = vmul.f32 %v1726_v0, %v4496_v58 }
 0x449   : > { %1555 = vrot.lane.b32.xlu1 %v1544_v15, %s3697_s18  ;;  %1573 = vrot.lane.b32.xlu0 %v1565_v16, %s3698_s30 }
 0x44d   : > { %1575 = vrot.lane.b32.xlu1 %v1566_v17, %s3698_s30  ;;  %1577 = vrot.lane.b32.xlu0 %v1567_v18, %s3698_s30  ;;  %v1756_v17 = vstv %s3381_s11  ;;  %v1372_v18 = vstv %s4516_s12  ;;  %s3397_s11 = sld [smem:[#allocation7 + $0x25]]  ;;  %s3398_s12 = sld [smem:[#allocation7 + $0x26]] }
 0x451   : > { %1579 = vrot.lane.b32.xlu1 %v1568_v25, %s3698_s30  ;;  %1603 = vrot.lane.b32.xlu0 %v1595_v29, %s3697_s18 }
 0x455   : > { %1605 = vrot.lane.b32.xlu1 %v1596_v28, %s3697_s18  ;;  %1607 = vrot.lane.b32.xlu0 %v1597_v27, %s3697_s18 }
 0x459   : > { %1609 = vrot.lane.b32.xlu1 %v1598_v32, %s3697_s18  ;;  %1627 = vrot.lane.b32.xlu0 %v1619_v34, %s3698_s30  ;;  %v1373_v32 = vmul.f32 %v1372_v18, %v4347_v24  ;;  %v1370_v34 = vstv %s4522_s13  ;;  %s4663_s13 = sld [smem:[#allocation7 + $0x12]] }
 0x45b   : > { %v1375_v11 = vadd.f32 %v1373_v32, %v1370_v34 }
 0x45d   : > { %1629 = vrot.lane.b32.xlu1 %v1620_v35, %s3698_s30  ;;  %1631 = vrot.lane.b32.xlu0 %v1621_v37, %s3698_s30 }
 0x461   : > { %1633 = vrot.lane.b32.xlu1 %v1622_v40, %s3698_s30  ;;  %1657 = vrot.lane.b32.xlu0 %v1649_v12, %s3697_s18 }
 0x465   : > { %1659 = vrot.lane.b32.xlu1 %v1650_v9, %s3697_s18  ;;  %1661 = vrot.lane.b32.xlu0 %v1651_v46, %s3697_s18 }
 0x469   : > { %1663 = vrot.lane.b32.xlu1 %v1652_v8, %s3697_s18  ;;  %1681 = vrot.lane.b32.xlu0 %v1673_v49, %s3698_s30  ;;  %v1374_v8 = vmul.f32 %v1372_v18, %v4352_v33  ;;  %v1780_v49 = vstv %s3382_s28  ;;  %s3400_s28 = sld [smem:[#allocation7 + $0x28]] }
 0x46d   : > { %1683 = vrot.lane.b32.xlu1 %v1674_v50, %s3698_s30  ;;  %1685 = vrot.lane.b32.xlu0 %v1675_v22, %s3698_s30  ;;  %v1426_v50 = vstv %s4527_s14  ;;  %s3401_s14 = sld [smem:[#allocation7 + $0x29]] }
 0x471   : > { %1687 = vrot.lane.b32.xlu1 %v1676_v54, %s3698_s30  ;;  %1711 = vrot.lane.b32.xlu0 %v1703_v57, %s3697_s18 }
 0x475   : > { %1713 = vrot.lane.b32.xlu1 %v1704_v61, %s3697_s18  ;;  %1715 = vrot.lane.b32.xlu0 %v1705_v62, %s3697_s18 }
 0x479   : > { %1717 = vrot.lane.b32.xlu1 %v1706_v2, %s3697_s18  ;;  %1735 = vrot.lane.b32.xlu0 %v1727_v10, %s3698_s30  ;;  %v1376_v2 = vadd.f32 %v1374_v8, %v1370_v34 }
 0x47d   : > { %1737 = vrot.lane.b32.xlu1 %v1728_v3, %s3698_s30  ;;  %1739 = vrot.lane.b32.xlu0 %v1729_v6, %s3698_s30  ;;  %v1427_v3 = vmul.f32 %v1426_v50, %v4370_v41 }
 0x47f   : > { %v1327_v7 = vpop.permute.xlu0 %1326 }
 0x480   : > { %1333 = vst.msk [vmem:[#allocation2 + $0xe0] sm:$0xff] %vm470_vm3, %v1327_v7 }
 0x481   : > { %1334 = vst.msk [vmem:[#allocation2 + $0xe8] sm:$0xff] %vm472_vm4, %v1327_v7  ;;  %1741 = vrot.lane.b32.xlu1 %v1730_v14, %s3698_s30 }
 0x483   : > { %v1329_v15 = vpop.permute.xlu1 %1328  ;;  %v1388_v16 = vpop.permute.xlu0 %1387 }
 0x484   : > { %1335 = vst.msk [vmem:[#allocation2 + $0xf0] sm:$0xff] %vm470_vm3, %v1329_v15 }
 0x485   : > { %1336 = vst.msk [vmem:[#allocation2 + $0xf8] sm:$0xff] %vm472_vm4, %v1329_v15 }
 0x487   : > { %v4529_v20 = vld [vmem:[#allocation2 + $0xe0] sm:$0xff]  ;;  %v1390_v25 = vpop.permute.xlu1 %1389  ;;  %v1392_v29 = vpop.permute.xlu0 %1391 }
 0x488   : > { %v4531_v28 = vld [vmem:[#allocation2 + $0xe8] sm:$0xff]  ;;  %v1757_v30 = vmul.f32 %v1756_v17, %v4529_v20  ;;  %v1395_v12 = vsel %vm376_vm0, %v1388_v16, %v1390_v25  ;;  %v1781_v0 = vmul.f32 %v1780_v49, %v4529_v20 }
 0x489   : > { %v1758_v27 = vmul.f32 %v1756_v17, %v4531_v28  ;;  %v1399_v22 = vadd.f32 %v1395_v12, %v1375_v11  ;;  %v1782_v62 = vmul.f32 %v1780_v49, %v4531_v28 }
 0x48a   : > { %1765 = vrot.lane.b32.xlu0 %v1757_v30, %s3697_s18 }
 0x48b   : > { %1767 = vrot.lane.b32.xlu1 %v1758_v27, %s3697_s18  ;;  %v4539_v35 = vld [vmem:[#allocation2 + $0xf0] sm:$0xff]  ;;  %v1394_v37 = vpop.permute.xlu1 %1393  ;;  %v1412_v23 = vpop.permute.xlu0 %1411  ;;  %v1428_v27 = vmul.f32 %v1426_v50, %v4376_v44  ;;  %v1480_v50 = vstv %s4563_s17  ;;  %s3404_s17 = sld [smem:[#allocation7 + $0x2c]] }
 0x48c   : > { %v4541_v40 = vld [vmem:[#allocation2 + $0xf8] sm:$0xff]  ;;  %v1759_v46 = vmul.f32 %v1756_v17, %v4539_v35  ;;  %v1396_v57 = vsel %vm376_vm0, %v1392_v29, %v1394_v37  ;;  %v1783_v18 = vmul.f32 %v1780_v49, %v4539_v35  ;;  %v1814_v29 = vstv %s3385_s15  ;;  %s4688_s15 = sld [smem:[#allocation7 + $0x15]] }
 0x48d   : > { %v1760_v9 = vmul.f32 %v1756_v17, %v4541_v40  ;;  %v1400_v6 = vadd.f32 %v1396_v57, %v1376_v2  ;;  %v1784_v17 = vmul.f32 %v1780_v49, %v4541_v40  ;;  %v1816_v37 = vmul.f32 %v1814_v29, %v4354_v21 }
 0x48e   : > { %1769 = vrot.lane.b32.xlu0 %v1759_v46, %s3697_s18  ;;  %v1818_v11 = vmul.f32 %v1814_v29, %v4360_v36  ;;  %v1817_v8 = vmul.f32 %v1814_v29, %v4352_v33  ;;  %v1838_v49 = vstv %s3386_s8  ;;  %s3403_s8 = sld [smem:[#allocation7 + $0x2b]] }
 0x48f   : > { %1771 = vrot.lane.b32.xlu1 %v1760_v9, %s3697_s18  ;;  %v1414_v53 = vpop.permute.xlu1 %1413  ;;  %v1416_v54 = vpop.permute.xlu0 %1415 }
 0x490   : > { %v1419_v61 = vsel %vm401_vm1, %v1412_v23, %v1414_v53  ;;  %v1815_v23 = vmul.f32 %v1814_v29, %v4347_v24 }
 0x491   : > { %v1423_v10 = vadd.f32 %v1419_v61, %v1399_v22 }
 0x492   : > { %1789 = vrot.lane.b32.xlu0 %v1781_v0, %s3698_s30  ;;  %v1839_v0 = vmul.f32 %v1838_v49, %v4347_v24  ;;  %v1482_v24 = vmul.f32 %v1480_v50, %v4400_v55 }
 0x493   : > { %1791 = vrot.lane.b32.xlu1 %v1782_v62, %s3698_s30  ;;  %v1418_v7 = vpop.permute.xlu1 %1417  ;;  %v1442_v14 = vpop.permute.xlu0 %1441  ;;  %v1429_v15 = vadd.f32 %v1427_v3, %v1423_v10  ;;  %v1840_v62 = vmul.f32 %v1838_v49, %v4354_v21  ;;  %v1481_v10 = vmul.f32 %v1480_v50, %v4394_v51 }
 0x494   : > { %v1420_v16 = vsel %vm401_vm1, %v1416_v54, %v1418_v7 }
 0x495   : > { %v1424_v25 = vadd.f32 %v1420_v16, %v1400_v6  ;;  %v1842_v16 = vmul.f32 %v1838_v49, %v4360_v36 }
 0x496   : > { %1793 = vrot.lane.b32.xlu0 %v1783_v18, %s3698_s30  ;;  %v1868_v18 = vstv %s3388_s23  ;;  %s3406_s23 = sld [smem:[#allocation7 + $0x2e]] }
 0x497   : > { %1795 = vrot.lane.b32.xlu1 %v1784_v17, %s3698_s30  ;;  %v1444_v30 = vpop.permute.xlu1 %1443  ;;  %v1446_v32 = vpop.permute.xlu0 %1445  ;;  %v1430_v34 = vadd.f32 %v1428_v27, %v1424_v25  ;;  %v1841_v17 = vmul.f32 %v1838_v49, %v4352_v33  ;;  %v1869_v36 = vmul.f32 %v1868_v18, %v4370_v41 }
 0x498   : > { %v1449_v46 = vsel %vm376_vm0, %v1442_v14, %v1444_v30  ;;  %v1870_v30 = vmul.f32 %v1868_v18, %v4378_v45 }
 0x499   : > { %v1453_v22 = vadd.f32 %v1449_v46, %v1429_v15 }
 0x49a   : > { %1823 = vrot.lane.b32.xlu0 %v1815_v23, %s3697_s18  ;;  %v1871_v23 = vmul.f32 %v1868_v18, %v4376_v44 }
 0x49b   : > { %1825 = vrot.lane.b32.xlu1 %v1816_v37, %s3697_s18  ;;  %v1448_v12 = vpop.permute.xlu1 %1447  ;;  %v1466_v9 = vpop.permute.xlu0 %1465  ;;  %v1872_v37 = vmul.f32 %v1868_v18, %v4384_v48 }
 0x49c   : > { %v1450_v57 = vsel %vm376_vm0, %v1446_v32, %v1448_v12  ;;  %v1892_v12 = vstv %s3389_s10  ;;  %s4726_s10 = sld [smem:[#allocation7 + $0x18]] }
 0x49d   : > { %v1454_v3 = vadd.f32 %v1450_v57, %v1430_v34 }
 0x49e   : > { %1827 = vrot.lane.b32.xlu0 %v1817_v8, %s3697_s18 }
 0x49f   : > { %1829 = vrot.lane.b32.xlu1 %v1818_v11, %s3697_s18  ;;  %v1468_v53 = vpop.permute.xlu1 %1467  ;;  %v1470_v54 = vpop.permute.xlu0 %1469 }
 0x4a0   : > { %v1473_v61 = vsel %vm401_vm1, %v1466_v9, %v1468_v53  ;;  %v1534_v9 = vstv %s4588_s20  ;;  %v1893_v53 = vmul.f32 %v1892_v12, %v4370_v41  ;;  %s3407_s20 = sld [smem:[#allocation7 + $0x2f]] }
 0x4a1   : > { %v1477_v2 = vadd.f32 %v1473_v61, %v1453_v22  ;;  %v1894_v22 = vmul.f32 %v1892_v12, %v4378_v45  ;;  %v1535_v57 = vmul.f32 %v1534_v9, %v4418_v1  ;;  %v1536_v41 = vmul.f32 %v1534_v9, %v4424_v5 }
 0x4a2   : > { %1847 = vrot.lane.b32.xlu0 %v1839_v0, %s3698_s30 }
 0x4a3   : > { %1849 = vrot.lane.b32.xlu1 %v1840_v62, %s3698_s30  ;;  %v1472_v6 = vpop.permute.xlu1 %1471  ;;  %v1496_v7 = vpop.permute.xlu0 %1495  ;;  %v1483_v14 = vadd.f32 %v1481_v10, %v1477_v2 }
 0x4a4   : > { %v1474_v15 = vsel %vm401_vm1, %v1470_v54, %v1472_v6  ;;  %v1895_v6 = vmul.f32 %v1892_v12, %v4376_v44 }
 0x4a5   : > { %v1478_v21 = vadd.f32 %v1474_v15, %v1454_v3  ;;  %v1896_v3 = vmul.f32 %v1892_v12, %v4384_v48 }
 0x4a6   : > { %1851 = vrot.lane.b32.xlu0 %v1841_v17, %s3698_s30 }
 0x4a7   : > { %1853 = vrot.lane.b32.xlu1 %v1842_v16, %s3698_s30  ;;  %v1498_v25 = vpop.permute.xlu1 %1497  ;;  %v1500_v29 = vpop.permute.xlu0 %1499  ;;  %v1484_v27 = vadd.f32 %v1482_v24, %v1478_v21 }
 0x4a8   : > { %v1503_v34 = vsel %vm376_vm0, %v1496_v7, %v1498_v25  ;;  %v1922_v7 = vstv %s3391_s16  ;;  %s4734_s16 = sld [smem:[#allocation8 + $0x1]] }
 0x4a9   : > { %v1507_v46 = vadd.f32 %v1503_v34, %v1483_v14  ;;  %v1924_v17 = vmul.f32 %v1922_v7, %v4402_v56  ;;  %v1923_v48 = vmul.f32 %v1922_v7, %v4394_v51  ;;  %v1926_v24 = vmul.f32 %v1922_v7, %v4408_v59 }
 0x4aa   : > { %1877 = vrot.lane.b32.xlu0 %v1869_v36, %s3697_s18  ;;  %v1925_v25 = vmul.f32 %v1922_v7, %v4400_v55  ;;  %v1642_v7 = vstv %s4638_s9  ;;  %s3415_s9 = sld [smem:[#allocation7 + $0x34]] }
 0x4ab   : > { %1879 = vrot.lane.b32.xlu1 %v1870_v30, %s3697_s18  ;;  %v1502_v33 = vpop.permute.xlu1 %1501  ;;  %v1520_v32 = vpop.permute.xlu0 %1519 }
 0x4ac   : > { %v1504_v49 = vsel %vm376_vm0, %v1500_v29, %v1502_v33  ;;  %v1946_v29 = vstv %s3392_s24  ;;  %s4737_s24 = scalar_lea.vmem [#allocation11], %s3853_s26  ;;  %s4746_s26 = sld [smem:[#allocation7 + $0x1b]] }
 0x4ad   : > { %v1508_v61 = vadd.f32 %v1504_v49, %v1484_v27  ;;  %v1588_v27 = vstv %s4613_s29  ;;  %s3412_s29 = sld [smem:[#allocation7 + $0x31]] }
 0x4ae   : > { %1881 = vrot.lane.b32.xlu0 %v1871_v23, %s3697_s18  ;;  %v1947_v23 = vmul.f32 %v1946_v29, %v4394_v51  ;;  %v1589_v9 = vmul.f32 %v1588_v27, %v4442_v39  ;;  %v1590_v51 = vmul.f32 %v1588_v27, %v4448_v26 }
 0x4af   : > { %1883 = vrot.lane.b32.xlu1 %v1872_v37, %s3697_s18  ;;  %v1522_v11 = vpop.permute.xlu1 %1521  ;;  %v1524_v8 = vpop.permute.xlu0 %1523  ;;  %v1948_v37 = vmul.f32 %v1946_v29, %v4402_v56 }
 0x4b0   : > { %v1527_v50 = vsel %vm401_vm1, %v1520_v32, %v1522_v11 }
 0x4b1   : > { %v1531_v54 = vadd.f32 %v1527_v50, %v1507_v46 }
 0x4b2   : > { %1901 = vrot.lane.b32.xlu0 %v1893_v53, %s3698_s30  ;;  %v1949_v53 = vmul.f32 %v1946_v29, %v4400_v55 }
 0x4b3   : > { %1903 = vrot.lane.b32.xlu1 %v1894_v22, %s3698_s30  ;;  %v1526_v62 = vpop.permute.xlu1 %1525  ;;  %v1550_v0 = vpop.permute.xlu0 %1549  ;;  %v1537_v2 = vadd.f32 %v1535_v57, %v1531_v54  ;;  %v1950_v22 = vmul.f32 %v1946_v29, %v4408_v59  ;;  %v1976_v54 = vstv %s3394_s6  ;;  %s3413_s6 = sld [smem:[#allocation7 + $0x32]] }
 0x4b4   : > { %v1528_v10 = vsel %vm401_vm1, %v1524_v8, %v1526_v62  ;;  %v1977_v59 = vmul.f32 %v1976_v54, %v4418_v1 }
 0x4b5   : > { %v1532_v45 = vadd.f32 %v1528_v10, %v1508_v61 }
 0x4b6   : > { %1905 = vrot.lane.b32.xlu0 %v1895_v6, %s3698_s30  ;;  %v1979_v6 = vmul.f32 %v1976_v54, %v4424_v5 }
 0x4b7   : > { %1907 = vrot.lane.b32.xlu1 %v1896_v3, %s3698_s30  ;;  %v1552_v14 = vpop.permute.xlu1 %1551  ;;  %v1554_v15 = vpop.permute.xlu0 %1553  ;;  %v1538_v16 = vadd.f32 %v1536_v41, %v1532_v45  ;;  %v1980_v3 = vmul.f32 %v1976_v54, %v4432_v13  ;;  %v2000_v45 = vstv %s3395_s7  ;;  %s4785_s7 = sld [smem:[#allocation7 + $0x1e]] }
 0x4b8   : > { %v1557_v18 = vsel %vm376_vm0, %v1550_v0, %v1552_v14  ;;  %v1978_v0 = vmul.f32 %v1976_v54, %v4426_v4 }
 0x4b9   : > { %v1561_v30 = vadd.f32 %v1557_v18, %v1537_v2  ;;  %v1643_v18 = vmul.f32 %v1642_v7, %v4466_v38 }
 0x4ba   : > { %1931 = vrot.lane.b32.xlu0 %v1923_v48, %s3697_s18  ;;  %v2002_v48 = vmul.f32 %v2000_v45, %v4426_v4 }
 0x4bb   : > { %1933 = vrot.lane.b32.xlu1 %v1924_v17, %s3697_s18  ;;  %v1556_v44 = vpop.permute.xlu1 %1555  ;;  %v1574_v21 = vpop.permute.xlu0 %1573 }
 0x4bc   : > { %v1558_v32 = vsel %vm376_vm0, %v1554_v15, %v1556_v44  ;;  %v2001_v44 = vmul.f32 %v2000_v45, %v4418_v1  ;;  %v1644_v1 = vmul.f32 %v1642_v7, %v4472_v42  ;;  %v2084_v7 = vstv %s3400_s28  ;;  %s3419_s28 = sld [smem:[#allocation7 + $0x38]] }
 0x4bd   : > { %v1562_v46 = vadd.f32 %v1558_v32, %v1538_v16  ;;  %v2030_v32 = vstv %s3397_s11  ;;  %s3416_s11 = sld [smem:[#allocation7 + $0x35]] }
 0x4be   : > { %1935 = vrot.lane.b32.xlu0 %v1925_v25, %s3697_s18 }
 0x4bf   : > { %1937 = vrot.lane.b32.xlu1 %v1926_v24, %s3697_s18  ;;  %v1576_v36 = vpop.permute.xlu1 %1575  ;;  %v1578_v33 = vpop.permute.xlu0 %1577 }
 0x4c0   : > { %v1581_v34 = vsel %vm401_vm1, %v1574_v21, %v1576_v36  ;;  %v2004_v36 = vmul.f32 %v2000_v45, %v4432_v13  ;;  %v2031_v13 = vmul.f32 %v2030_v32, %v4442_v39 }
 0x4c1   : > { %v1585_v12 = vadd.f32 %v1581_v34, %v1561_v30 }
 0x4c2   : > { %1955 = vrot.lane.b32.xlu0 %v1947_v23, %s3698_s30 }
 0x4c3   : > { %1957 = vrot.lane.b32.xlu1 %v1948_v37, %s3698_s30  ;;  %v1580_v11 = vpop.permute.xlu1 %1579  ;;  %v1604_v8 = vpop.permute.xlu0 %1603  ;;  %v1591_v49 = vadd.f32 %v1589_v9, %v1585_v12  ;;  %v2032_v12 = vmul.f32 %v2030_v32, %v4450_v19 }
 0x4c4   : > { %v1582_v50 = vsel %vm401_vm1, %v1578_v33, %v1580_v11  ;;  %v2003_v33 = vmul.f32 %v2000_v45, %v4424_v5  ;;  %v2034_v11 = vmul.f32 %v2030_v32, %v4456_v31 }
 0x4c5   : > { %v1586_v56 = vadd.f32 %v1582_v50, %v1562_v46  ;;  %v1696_v50 = vstv %s4663_s13  ;;  %s3418_s13 = sld [smem:[#allocation7 + $0x37]] }
 0x4c6   : > { %1959 = vrot.lane.b32.xlu0 %v1949_v53, %s3698_s30 }
 0x4c7   : > { %1961 = vrot.lane.b32.xlu1 %v1950_v22, %s3698_s30  ;;  %v1606_v57 = vpop.permute.xlu1 %1605  ;;  %v1608_v61 = vpop.permute.xlu0 %1607  ;;  %v1592_v62 = vadd.f32 %v1590_v51, %v1586_v56 }
 0x4c8   : > { %v1611_v10 = vsel %vm376_vm0, %v1604_v8, %v1606_v57  ;;  %v2033_v8 = vmul.f32 %v2030_v32, %v4448_v26 }
 0x4c9   : > { %v1615_v41 = vadd.f32 %v1611_v10, %v1591_v49  ;;  %v2054_v49 = vstv %s3398_s12  ;;  %s4818_s12 = sld [smem:[#allocation7 + $0x21]] }
 0x4ca   : > { %1985 = vrot.lane.b32.xlu0 %v1977_v59, %s3697_s18  ;;  %v2056_v57 = vmul.f32 %v2054_v49, %v4450_v19  ;;  %v2057_v45 = vmul.f32 %v2054_v49, %v4448_v26 }
 0x4cb   : > { %1987 = vrot.lane.b32.xlu1 %v1978_v0, %s3697_s18  ;;  %v1610_v55 = vpop.permute.xlu1 %1609  ;;  %v1628_v2 = vpop.permute.xlu0 %1627  ;;  %v1697_v0 = vmul.f32 %v1696_v50, %v4490_v52 }
 0x4cc   : > { %v1612_v16 = vsel %vm376_vm0, %v1608_v61, %v1610_v55  ;;  %v2055_v61 = vmul.f32 %v2054_v49, %v4442_v39  ;;  %v1698_v39 = vmul.f32 %v1696_v50, %v4496_v58 }
 0x4cd   : > { %v1616_v24 = vadd.f32 %v1612_v16, %v1592_v62  ;;  %v2086_v16 = vmul.f32 %v2084_v7, %v4474_v43 }
 0x4ce   : > { %1989 = vrot.lane.b32.xlu0 %v1979_v6, %s3697_s18  ;;  %v2058_v6 = vmul.f32 %v2054_v49, %v4456_v31  ;;  %v2085_v31 = vmul.f32 %v2084_v7, %v4466_v38 }
 0x4cf   : > { %1991 = vrot.lane.b32.xlu1 %v1980_v3, %s3697_s18  ;;  %v1630_v14 = vpop.permute.xlu1 %1629  ;;  %v1632_v15 = vpop.permute.xlu0 %1631 }
 0x4d0   : > { %v1635_v17 = vsel %vm401_vm1, %v1628_v2, %v1630_v14 }
 0x4d1   : > { %v1639_v21 = vadd.f32 %v1635_v17, %v1615_v41 }
 0x4d2   : > { %2009 = vrot.lane.b32.xlu0 %v2001_v44, %s3698_s30  ;;  %v2087_v44 = vmul.f32 %v2084_v7, %v4472_v42 }
 0x4d3   : > { %2011 = vrot.lane.b32.xlu1 %v2002_v48, %s3698_s30  ;;  %v1634_v25 = vpop.permute.xlu1 %1633  ;;  %v1658_v29 = vpop.permute.xlu0 %1657  ;;  %v1645_v27 = vadd.f32 %v1643_v18, %v1639_v21  ;;  %v2088_v48 = vmul.f32 %v2084_v7, %v4480_v47  ;;  %v2108_v18 = vstv %s3401_s14  ;;  %s4851_s14 = sld [smem:[#allocation7 + $0x24]] }
 0x4d4   : > { %v1636_v30 = vsel %vm401_vm1, %v1632_v15, %v1634_v25 }
 0x4d5   : > { %v1640_v4 = vadd.f32 %v1636_v30, %v1616_v24  ;;  %v1750_v24 = vstv %s4688_s15  ;;  %s3421_s15 = sld [smem:[#allocation7 + $0x3a]] }
 0x4d6   : > { %2013 = vrot.lane.b32.xlu0 %v2003_v33, %s3698_s30  ;;  %v2109_v33 = vmul.f32 %v2108_v18, %v4466_v38  ;;  %v1751_v32 = vmul.f32 %v1750_v24, %v4529_v20  ;;  %v1752_v38 = vmul.f32 %v1750_v24, %v4539_v35 }
 0x4d7   : > { %2015 = vrot.lane.b32.xlu1 %v2004_v36, %s3698_s30  ;;  %v1660_v34 = vpop.permute.xlu1 %1659  ;;  %v1662_v37 = vpop.permute.xlu0 %1661  ;;  %v1646_v23 = vadd.f32 %v1644_v1, %v1640_v4  ;;  %v2110_v36 = vmul.f32 %v2108_v18, %v4474_v43 }
 0x4d8   : > { %v1665_v46 = vsel %vm376_vm0, %v1658_v29, %v1660_v34 }
 0x4d9   : > { %v1669_v22 = vadd.f32 %v1665_v46, %v1645_v27 }
 0x4da   : > { %2039 = vrot.lane.b32.xlu0 %v2031_v13, %s3697_s18  ;;  %v2112_v13 = vmul.f32 %v2108_v18, %v4480_v47 }
 0x4db   : > { %2041 = vrot.lane.b32.xlu1 %v2032_v12, %s3697_s18  ;;  %v1664_v5 = vpop.permute.xlu1 %1663  ;;  %v1682_v9 = vpop.permute.xlu0 %1681 }
 0x4dc   : > { %v1666_v54 = vsel %vm376_vm0, %v1662_v37, %v1664_v5  ;;  %v2111_v5 = vmul.f32 %v2108_v18, %v4472_v42 }
 0x4dd   : > { %v1670_v59 = vadd.f32 %v1666_v54, %v1646_v23 }
 0x4de   : > { %2043 = vrot.lane.b32.xlu0 %v2033_v8, %s3697_s18 }
 0x4df   : > { %2045 = vrot.lane.b32.xlu1 %v2034_v11, %s3697_s18  ;;  %v1684_v53 = vpop.permute.xlu1 %1683  ;;  %v1686_v56 = vpop.permute.xlu0 %1685 }
 0x4e0   : > { %v1689_v51 = vsel %vm401_vm1, %v1682_v9, %v1684_v53  ;;  %v2138_v9 = vstv %s3403_s8  ;;  %s3422_s8 = sld [smem:[#allocation7 + $0x3b]] }
 0x4e1   : > { %v1693_v62 = vadd.f32 %v1689_v51, %v1669_v22  ;;  %v2140_v11 = vmul.f32 %v2138_v9, %v4498_v60  ;;  %v2139_v8 = vmul.f32 %v2138_v9, %v4490_v52  ;;  %v2142_v49 = vmul.f32 %v2138_v9, %v4504_v63 }
 0x4e2   : > { %2063 = vrot.lane.b32.xlu0 %v2055_v61, %s3698_s30  ;;  %v2141_v50 = vmul.f32 %v2138_v9, %v4496_v58  ;;  %v2162_v22 = vstv %s3404_s17  ;;  %s4884_s17 = sld [smem:[#allocation7 + $0x27]] }
 0x4e3   : > { %2065 = vrot.lane.b32.xlu1 %v2056_v57, %s3698_s30  ;;  %v1688_v55 = vpop.permute.xlu1 %1687  ;;  %v1712_v2 = vpop.permute.xlu0 %1711  ;;  %v1699_v10 = vadd.f32 %v1697_v0, %v1693_v62  ;;  %v2164_v54 = vmul.f32 %v2162_v22, %v4498_v60  ;;  %v2163_v51 = vmul.f32 %v2162_v22, %v4490_v52 }
 0x4e4   : > { %v1690_v3 = vsel %vm401_vm1, %v1686_v56, %v1688_v55  ;;  %v2165_v55 = vmul.f32 %v2162_v22, %v4496_v58 }
 0x4e5   : > { %v1694_v19 = vadd.f32 %v1690_v3, %v1670_v59  ;;  %v2166_v59 = vmul.f32 %v2162_v22, %v4504_v63 }
 0x4e6   : > { %2067 = vrot.lane.b32.xlu0 %v2057_v45, %s3698_s30 }
 0x4e7   : > { %2069 = vrot.lane.b32.xlu1 %v2058_v6, %s3698_s30  ;;  %v1714_v41 = vpop.permute.xlu1 %1713  ;;  %v1716_v14 = vpop.permute.xlu0 %1715  ;;  %v1700_v15 = vadd.f32 %v1698_v39, %v1694_v19  ;;  %v1808_v39 = vstv %s4726_s10  ;;  %s3425_s10 = sld [smem:[#allocation7 + $0x3e]] }
 0x4e8   : > { %v1719_v17 = vsel %vm376_vm0, %v1712_v2, %v1714_v41  ;;  %v2192_v2 = vstv %s3406_s23  ;;  %s3424_s23 = sld [smem:[#allocation7 + $0x3d]] }
 0x4e9   : > { %v1723_v25 = vadd.f32 %v1719_v17, %v1699_v10  ;;  %v2194_v6 = vmul.f32 %v2192_v2, %v4531_v28  ;;  %v2193_v45 = vmul.f32 %v2192_v2, %v4529_v20 }
 0x4ea   : > { %2093 = vrot.lane.b32.xlu0 %v2085_v31, %s3697_s18  ;;  %v2216_v31 = vstv %s3407_s20  ;;  %s4917_s20 = sld [smem:[#allocation7 + $0x2a]] }
 0x4eb   : > { %2095 = vrot.lane.b32.xlu1 %v2086_v16, %s3697_s18  ;;  %v1718_v26 = vpop.permute.xlu1 %1717  ;;  %v1736_v21 = vpop.permute.xlu0 %1735  ;;  %v2195_v16 = vmul.f32 %v2192_v2, %v4539_v35  ;;  %v2218_v18 = vmul.f32 %v2216_v31, %v4531_v28  ;;  %v2217_v24 = vmul.f32 %v2216_v31, %v4529_v20  ;;  %v2219_v28 = vmul.f32 %v2216_v31, %v4539_v35  ;;  %v4775_v35 = vld [vmem:[#allocation2 + $0x8] sm:$0xff] }
 0x4ec   : > { %v1720_v27 = vsel %vm376_vm0, %v1716_v14, %v1718_v26  ;;  %v4751_v26 = vld [vmem:[#allocation2] sm:$0xff] }
 0x4ed   : > { %v1724_v1 = vadd.f32 %v1720_v27, %v1700_v15  ;;  %v2196_v15 = vmul.f32 %v2192_v2, %v4541_v40  ;;  %v1809_v17 = vmul.f32 %v4751_v26, %v1808_v39  ;;  %v4760_v27 = vld [vmem:[#allocation2 + $0x10] sm:$0xff] }
 0x4ee   : > { %2097 = vrot.lane.b32.xlu0 %v2087_v44, %s3697_s18 }
 0x4ef   : > { %2099 = vrot.lane.b32.xlu1 %v2088_v48, %s3697_s18  ;;  %v1738_v29 = vpop.permute.xlu1 %1737  ;;  %v1740_v34 = vpop.permute.xlu0 %1739  ;;  %v1806_v48 = vstv %s4734_s16  ;;  %s3427_s16 = sld [smem:[#allocation7 + $0x40]] }
 0x4f0   : > { %v1743_v30 = vsel %vm401_vm1, %v1736_v21, %v1738_v29  ;;  %v1811_v29 = vadd.f32 %v1809_v17, %v1806_v48 }
 0x4f1   : > { %v1747_v4 = vadd.f32 %v1743_v30, %v1723_v25  ;;  %v1810_v30 = vmul.f32 %v4760_v27, %v1808_v39 }
 0x4f2   : > { %2117 = vrot.lane.b32.xlu0 %v2109_v33, %s3698_s30 }
 0x4f3   : > { %2119 = vrot.lane.b32.xlu1 %v2110_v36, %s3698_s30  ;;  %v1742_v37 = vpop.permute.xlu1 %1741  ;;  %v1753_v23 = vadd.f32 %v1751_v32, %v1747_v4  ;;  %v1862_v36 = vstv %s4746_s26  ;;  %s3428_s26 = sld [smem:[#allocation7 + $0x41]] }
 0x4f4   : > { %v1744_v12 = vsel %vm401_vm1, %v1740_v34, %v1742_v37  ;;  %v2251_v37 = vstv %s3412_s29  ;;  %s4950_s29 = sld [smem:[#allocation7 + $0x2d]] }
 0x4f5   : > { %v1748_v43 = vadd.f32 %v1744_v12, %v1724_v1  ;;  %v2220_v1 = vmul.f32 %v2216_v31, %v4541_v40 }
 0x4f6   : > { %2121 = vrot.lane.b32.xlu0 %v2111_v5, %s3698_s30 }
 0x4f7   : > { %2123 = vrot.lane.b32.xlu1 %v2112_v13, %s3698_s30  ;;  %v1754_v46 = vadd.f32 %v1752_v38, %v1748_v43  ;;  %v4772_v13 = vld [vmem:[#allocation2 + $0x20] sm:$0xff]  ;;  %v2253_v38 = vmul.f32 %v4775_v35, %v2251_v37 }
 0x4f8   : > { %v1863_v5 = vmul.f32 %v4772_v13, %v1862_v36 }
 0x4fa   : > { %2147 = vrot.lane.b32.xlu0 %v2139_v8, %s3697_s18 }
 0x4fb   : > { %2149 = vrot.lane.b32.xlu1 %v2140_v11, %s3697_s18 }
 0x4fc   : > { %v1766_v42 = vpop.permute.xlu0 %1765 }
 0x4fd   : > { %v1768_v47 = vpop.permute.xlu1 %1767 }
 0x4fe   : > { %2151 = vrot.lane.b32.xlu0 %v2141_v50, %s3697_s18  ;;  %v1773_v57 = vsel %vm376_vm0, %v1766_v42, %v1768_v47  ;;  %v4782_v42 = vld [vmem:[#allocation2 + $0x30] sm:$0xff] }
 0x4ff   : > { %2153 = vrot.lane.b32.xlu1 %v2142_v49, %s3697_s18  ;;  %v1777_v61 = vadd.f32 %v1773_v57, %v1753_v23  ;;  %v1812_v23 = vadd.f32 %v1810_v30, %v1806_v48  ;;  %v1864_v49 = vmul.f32 %v4782_v42, %v1862_v36  ;;  %v2275_v57 = vstv %s3413_s6  ;;  %v4820_v30 = vld [vmem:[#allocation2 + $0x38] sm:$0xff]  ;;  %s3430_s6 = sld [smem:[#allocation7 + $0x43]] }
 0x500   : > { %v1770_v56 = vpop.permute.xlu0 %1769 }
 0x501   : > { %v1772_v53 = vpop.permute.xlu1 %1771 }
 0x502   : > { %2171 = vrot.lane.b32.xlu0 %v2163_v51, %s3698_s30  ;;  %v1774_v60 = vsel %vm376_vm0, %v1770_v56, %v1772_v53  ;;  %v4787_v53 = vld [vmem:[#allocation2 + $0x18] sm:$0xff] }
 0x503   : > { %2173 = vrot.lane.b32.xlu1 %v2164_v54, %s3698_s30  ;;  %v1778_v3 = vadd.f32 %v1774_v60, %v1754_v46  ;;  %v2252_v46 = vmul.f32 %v4751_v26, %v2251_v37  ;;  %v2255_v56 = vmul.f32 %v4787_v53, %v2251_v37  ;;  %v2254_v54 = vmul.f32 %v4760_v27, %v2251_v37 }
 0x504   : > { %v1790_v0 = vpop.permute.xlu0 %1789  ;;  %v1916_v60 = vstv %s4785_s7  ;;  %s3431_s7 = sld [smem:[#allocation7 + $0x44]] }
 0x505   : > { %v1792_v62 = vpop.permute.xlu1 %1791 }
 0x506   : > { %v1797_v52 = vsel %vm401_vm1, %v1790_v0, %v1792_v62  ;;  %2175 = vrot.lane.b32.xlu0 %v2165_v55, %s3698_s30  ;;  %v2277_v0 = vmul.f32 %v4775_v35, %v2275_v57 }
 0x507   : > { %v1801_v10 = vadd.f32 %v1797_v52, %v1777_v61  ;;  %2177 = vrot.lane.b32.xlu1 %v2166_v59, %s3698_s30  ;;  %v2276_v59 = vmul.f32 %v4751_v26, %v2275_v57 }
 0x508   : > { %v1794_v63 = vpop.permute.xlu0 %1793 }
 0x509   : > { %1803 = vst [vmem:[%s4737_s24] sm:$0xff] %v1801_v10  ;;  %v1796_v58 = vpop.permute.xlu1 %1795 }
 0x50a   : > { %v1798_v19 = vsel %vm401_vm1, %v1794_v63, %v1796_v58  ;;  %2201 = vrot.lane.b32.xlu0 %v2193_v45, %s3697_s18  ;;  %v2278_v58 = vmul.f32 %v4760_v27, %v2275_v57  ;;  %v2305_v45 = vstv %s3415_s9  ;;  %s3433_s9 = sld [smem:[#allocation7 + $0x46]] }
 0x50b   : > { %v1802_v7 = vadd.f32 %v1798_v19, %v1778_v3  ;;  %2203 = vrot.lane.b32.xlu1 %v2194_v6, %s3697_s18  ;;  %v2279_v3 = vmul.f32 %v4787_v53, %v2275_v57  ;;  %v2306_v17 = vmul.f32 %v4772_v13, %v2305_v45  ;;  %v2309_v36 = vmul.f32 %v4820_v30, %v2305_v45 }
 0x50c   : > { %v1824_v14 = vpop.permute.xlu0 %1823 }
 0x50d   : > { %1804 = vst [vmem:[%s4737_s24 + $0x8] sm:$0xff] %v1802_v7  ;;  %v1826_v41 = vpop.permute.xlu1 %1825  ;;  %v4805_v7 = vld [vmem:[#allocation2 + $0x40] sm:$0xff] }
 0x50e   : > { %2205 = vrot.lane.b32.xlu0 %v2195_v16, %s3697_s18  ;;  %v1831_v25 = vsel %vm376_vm0, %v1824_v14, %v1826_v41  ;;  %v1917_v39 = vmul.f32 %v4805_v7, %v1916_v60  ;;  %v4808_v16 = vld [vmem:[#allocation2 + $0x28] sm:$0xff] }
 0x50f   : > { %2207 = vrot.lane.b32.xlu1 %v2196_v15, %s3697_s18  ;;  %v1835_v33 = vadd.f32 %v1831_v25, %v1811_v29  ;;  %v2307_v31 = vmul.f32 %v4808_v16, %v2305_v45 }
 0x510   : > { %v1828_v21 = vpop.permute.xlu0 %1827 }
 0x511   : > { %v1830_v44 = vpop.permute.xlu1 %1829 }
 0x512   : > { %2225 = vrot.lane.b32.xlu0 %v2217_v24, %s3698_s30  ;;  %v1832_v20 = vsel %vm376_vm0, %v1828_v21, %v1830_v44 }
 0x513   : > { %2227 = vrot.lane.b32.xlu1 %v2218_v18, %s3698_s30  ;;  %v1836_v43 = vadd.f32 %v1832_v20, %v1812_v23  ;;  %v4815_v18 = vld [vmem:[#allocation2 + $0x50] sm:$0xff]  ;;  %v1970_v23 = vstv %s4818_s12  ;;  %s3434_s12 = sld [smem:[#allocation7 + $0x47]] }
 0x514   : > { %v1848_v32 = vpop.permute.xlu0 %1847  ;;  %v1918_v24 = vmul.f32 %v4815_v18, %v1916_v60 }
 0x515   : > { %v1850_v4 = vpop.permute.xlu1 %1849 }
 0x516   : > { %v1855_v34 = vsel %vm401_vm1, %v1848_v32, %v1850_v4  ;;  %2229 = vrot.lane.b32.xlu0 %v2219_v28, %s3698_s30  ;;  %v2329_v32 = vstv %s3416_s11  ;;  %s4994_s11 = sld [smem:[#allocation7 + $0x30]] }
 0x517   : > { %v1859_v12 = vadd.f32 %v1855_v34, %v1835_v33  ;;  %2231 = vrot.lane.b32.xlu1 %v2220_v1, %s3698_s30  ;;  %v2308_v33 = vmul.f32 %v4782_v42, %v2305_v45  ;;  %v2331_v20 = vmul.f32 %v4808_v16, %v2329_v32  ;;  %v2330_v34 = vmul.f32 %v4772_v13, %v2329_v32 }
 0x518   : > { %v1852_v9 = vpop.permute.xlu0 %1851 }
 0x519   : > { %v1854_v40 = vpop.permute.xlu1 %1853  ;;  %v1865_v11 = vadd.f32 %v1863_v5, %v1859_v12 }
 0x51a   : > { %v1856_v8 = vsel %vm401_vm1, %v1852_v9, %v1854_v40  ;;  %2260 = vrot.lane.b32.xlu0 %v2252_v46, %s3697_s18  ;;  %v2333_v40 = vmul.f32 %v4820_v30, %v2329_v32  ;;  %v2332_v9 = vmul.f32 %v4782_v42, %v2329_v32 }
 0x51b   : > { %v1860_v47 = vadd.f32 %v1856_v8, %v1836_v43  ;;  %2262 = vrot.lane.b32.xlu1 %v2253_v38, %s3697_s18 }
 0x51c   : > { %v1878_v22 = vpop.permute.xlu0 %1877 }
 0x51d   : > { %v1880_v50 = vpop.permute.xlu1 %1879  ;;  %v1866_v51 = vadd.f32 %v1864_v49, %v1860_v47  ;;  %v4838_v47 = vld [vmem:[#allocation2 + $0x60] sm:$0xff] }
 0x51e   : > { %2264 = vrot.lane.b32.xlu0 %v2254_v54, %s3697_s18  ;;  %v1885_v55 = vsel %vm376_vm0, %v1878_v22, %v1880_v50  ;;  %v1971_v49 = vmul.f32 %v4838_v47, %v1970_v23  ;;  %v4841_v54 = vld [vmem:[#allocation2 + $0x48] sm:$0xff] }
 0x51f   : > { %2266 = vrot.lane.b32.xlu1 %v2255_v56, %s3697_s18  ;;  %v1889_v52 = vadd.f32 %v1885_v55, %v1865_v11  ;;  %v2359_v11 = vstv %s3418_s13  ;;  %s5002_s13 = sld [smem:[#allocation8 + $0x2]] }
 0x520   : > { %v1882_v62 = vpop.permute.xlu0 %1881  ;;  %v2360_v57 = vmul.f32 %v4805_v7, %v2359_v11 }
 0x521   : > { %v1884_v61 = vpop.permute.xlu1 %1883 }
 0x522   : > { %2284 = vrot.lane.b32.xlu0 %v2276_v59, %s3698_s30  ;;  %v1886_v63 = vsel %vm376_vm0, %v1882_v62, %v1884_v61  ;;  %v4848_v59 = vld [vmem:[#allocation2 + $0x70] sm:$0xff] }
 0x523   : > { %2286 = vrot.lane.b32.xlu1 %v2277_v0, %s3698_s30  ;;  %v1890_v41 = vadd.f32 %v1886_v63, %v1866_v51  ;;  %v2361_v51 = vmul.f32 %v4841_v54, %v2359_v11  ;;  %v1972_v55 = vmul.f32 %v4848_v59, %v1970_v23  ;;  %v2383_v63 = vstv %s3419_s28  ;;  %s5013_s28 = sld [smem:[#allocation7 + $0x33]] }
 0x524   : > { %v1902_v10 = vpop.permute.xlu0 %1901 }
 0x525   : > { %v1904_v2 = vpop.permute.xlu1 %1903 }
 0x526   : > { %v1909_v6 = vsel %vm401_vm1, %v1902_v10, %v1904_v2  ;;  %2288 = vrot.lane.b32.xlu0 %v2278_v58, %s3698_s30  ;;  %v4853_v2 = vld [vmem:[#allocation2 + $0x58] sm:$0xff] }
 0x527   : > { %v1913_v19 = vadd.f32 %v1909_v6, %v1889_v52  ;;  %2290 = vrot.lane.b32.xlu1 %v2279_v3, %s3698_s30  ;;  %v2363_v10 = vmul.f32 %v4853_v2, %v2359_v11  ;;  %v2362_v3 = vmul.f32 %v4815_v18, %v2359_v11 }
 0x528   : > { %v1906_v15 = vpop.permute.xlu0 %1905 }
 0x529   : > { %v1908_v14 = vpop.permute.xlu1 %1907  ;;  %v1919_v48 = vadd.f32 %v1917_v39, %v1913_v19  ;;  %v2385_v19 = vmul.f32 %v4841_v54, %v2383_v63  ;;  %v2384_v39 = vmul.f32 %v4805_v7, %v2383_v63 }
 0x52a   : > { %v1910_v44 = vsel %vm401_vm1, %v1906_v15, %v1908_v14  ;;  %2314 = vrot.lane.b32.xlu0 %v2306_v17, %s3697_s18  ;;  %v2024_v14 = vstv %s4851_s14  ;;  %s3439_s14 = sld [smem:[#allocation7 + $0x49]] }
 0x52b   : > { %v1914_v21 = vadd.f32 %v1910_v44, %v1890_v41  ;;  %2316 = vrot.lane.b32.xlu1 %v2307_v31, %s3697_s18  ;;  %v2386_v44 = vmul.f32 %v4815_v18, %v2383_v63 }
 0x52c   : > { %v1932_v29 = vpop.permute.xlu0 %1931 }
 0x52d   : > { %v1934_v25 = vpop.permute.xlu1 %1933  ;;  %v1920_v4 = vadd.f32 %v1918_v24, %v1914_v21 }
 0x52e   : > { %2318 = vrot.lane.b32.xlu0 %v2308_v33, %s3697_s18  ;;  %v1939_v37 = vsel %vm376_vm0, %v1932_v29, %v1934_v25  ;;  %v2413_v25 = vstv %s3421_s15  ;;  %s3440_s15 = sld [smem:[#allocation7 + $0x4a]] }
 0x52f   : > { %2320 = vrot.lane.b32.xlu1 %v2309_v36, %s3697_s18  ;;  %v1943_v12 = vadd.f32 %v1939_v37, %v1919_v48  ;;  %v2387_v48 = vmul.f32 %v4853_v2, %v2383_v63  ;;  %v4871_v36 = vld [vmem:[#allocation2 + $0x80] sm:$0xff]  ;;  %v2416_v11 = vmul.f32 %v4848_v59, %v2413_v25 }
 0x530   : > { %v1936_v28 = vpop.permute.xlu0 %1935  ;;  %v2025_v33 = vmul.f32 %v4871_v36, %v2024_v14 }
 0x531   : > { %v1938_v1 = vpop.permute.xlu1 %1937 }
 0x532   : > { %2338 = vrot.lane.b32.xlu0 %v2330_v34, %s3698_s30  ;;  %v1940_v38 = vsel %vm376_vm0, %v1936_v28, %v1938_v1  ;;  %v4874_v28 = vld [vmem:[#allocation2 + $0x68] sm:$0xff]  ;;  %v2414_v34 = vmul.f32 %v4838_v47, %v2413_v25 }
 0x533   : > { %2340 = vrot.lane.b32.xlu1 %v2331_v20, %s3698_s30  ;;  %v1944_v50 = vadd.f32 %v1940_v38, %v1920_v4  ;;  %v2415_v20 = vmul.f32 %v4874_v28, %v2413_v25  ;;  %v4886_v38 = vld [vmem:[#allocation2 + $0x78] sm:$0xff] }
 0x534   : > { %v1956_v43 = vpop.permute.xlu0 %1955 }
 0x535   : > { %v1958_v5 = vpop.permute.xlu1 %1957 }
 0x536   : > { %v1963_v46 = vsel %vm401_vm1, %v1956_v43, %v1958_v5  ;;  %2342 = vrot.lane.b32.xlu0 %v2332_v9, %s3698_s30  ;;  %v4881_v5 = vld [vmem:[#allocation2 + $0x90] sm:$0xff] }
 0x537   : > { %v1967_v8 = vadd.f32 %v1963_v46, %v1943_v12  ;;  %2344 = vrot.lane.b32.xlu1 %v2333_v40, %s3698_s30  ;;  %v2026_v43 = vmul.f32 %v4881_v5, %v2024_v14  ;;  %v2417_v46 = vmul.f32 %v4886_v38, %v2413_v25  ;;  %v4907_v14 = vld [vmem:[#allocation2 + $0x88] sm:$0xff] }
 0x538   : > { %v1960_v56 = vpop.permute.xlu0 %1959 }
 0x539   : > { %v1962_v22 = vpop.permute.xlu1 %1961  ;;  %v1973_v61 = vadd.f32 %v1971_v49, %v1967_v8  ;;  %v2437_v49 = vstv %s3422_s8  ;;  %s5044_s8 = sld [smem:[#allocation7 + $0x36]] }
 0x53a   : > { %v1964_v62 = vsel %vm401_vm1, %v1960_v56, %v1962_v22  ;;  %2368 = vrot.lane.b32.xlu0 %v2360_v57, %s3697_s18  ;;  %v2439_v56 = vmul.f32 %v4874_v28, %v2437_v49 }
 0x53b   : > { %v1968_v0 = vadd.f32 %v1964_v62, %v1944_v50  ;;  %2370 = vrot.lane.b32.xlu1 %v2361_v51, %s3697_s18  ;;  %v2438_v51 = vmul.f32 %v4838_v47, %v2437_v49 }
 0x53c   : > { %v1986_v52 = vpop.permute.xlu0 %1985 }
 0x53d   : > { %v1988_v60 = vpop.permute.xlu1 %1987  ;;  %v1974_v58 = vadd.f32 %v1972_v55, %v1968_v0 }
 0x53e   : > { %2372 = vrot.lane.b32.xlu0 %v2362_v3, %s3697_s18  ;;  %v1993_v41 = vsel %vm376_vm0, %v1986_v52, %v1988_v60  ;;  %v2441_v60 = vmul.f32 %v4886_v38, %v2437_v49  ;;  %v2440_v52 = vmul.f32 %v4848_v59, %v2437_v49 }
 0x53f   : > { %2374 = vrot.lane.b32.xlu1 %v2363_v10, %s3697_s18  ;;  %v1997_v15 = vadd.f32 %v1993_v41, %v1973_v61  ;;  %v2078_v61 = vstv %s4884_s17  ;;  %s3442_s17 = sld [smem:[#allocation7 + $0x4c]] }
 0x540   : > { %v1990_v45 = vpop.permute.xlu0 %1989 }
 0x541   : > { %v1992_v6 = vpop.permute.xlu1 %1991 }
 0x542   : > { %2392 = vrot.lane.b32.xlu0 %v2384_v39, %s3698_s30  ;;  %v1994_v21 = vsel %vm376_vm0, %v1990_v45, %v1992_v6  ;;  %v4904_v6 = vld [vmem:[#allocation2 + $0xa0] sm:$0xff] }
 0x543   : > { %2394 = vrot.lane.b32.xlu1 %v2385_v19, %s3698_s30  ;;  %v1998_v4 = vadd.f32 %v1994_v21, %v1974_v58  ;;  %v2467_v58 = vstv %s3424_s23  ;;  %v2079_v45 = vmul.f32 %v4904_v6, %v2078_v61  ;;  %v4914_v21 = vld [vmem:[#allocation2 + $0xb0] sm:$0xff]  ;;  %s3443_s23 = sld [smem:[#allocation7 + $0x4d]] }
 0x544   : > { %v2010_v17 = vpop.permute.xlu0 %2009 }
 0x545   : > { %v2012_v31 = vpop.permute.xlu1 %2011 }
 0x546   : > { %v2017_v24 = vsel %vm401_vm1, %v2010_v17, %v2012_v31  ;;  %2396 = vrot.lane.b32.xlu0 %v2386_v44, %s3698_s30  ;;  %v2468_v31 = vmul.f32 %v4871_v36, %v2467_v58 }
 0x547   : > { %v2021_v29 = vadd.f32 %v2017_v24, %v1997_v15  ;;  %2398 = vrot.lane.b32.xlu1 %v2387_v48, %s3698_s30  ;;  %v2469_v15 = vmul.f32 %v4907_v14, %v2467_v58  ;;  %v2080_v24 = vmul.f32 %v4914_v21, %v2078_v61 }
 0x548   : > { %v2014_v1 = vpop.permute.xlu0 %2013 }
 0x549   : > { %v2016_v32 = vpop.permute.xlu1 %2015  ;;  %v2027_v37 = vadd.f32 %v2025_v33, %v2021_v29  ;;  %v4919_v33 = vld [vmem:[#allocation2 + $0x98] sm:$0xff] }
 0x54a   : > { %v2018_v23 = vsel %vm401_vm1, %v2014_v1, %v2016_v32  ;;  %2422 = vrot.lane.b32.xlu0 %v2414_v34, %s3697_s18  ;;  %v2470_v32 = vmul.f32 %v4881_v5, %v2467_v58 }
 0x54b   : > { %v2022_v12 = vadd.f32 %v2018_v23, %v1998_v4  ;;  %2424 = vrot.lane.b32.xlu1 %v2415_v20, %s3697_s18  ;;  %v2471_v4 = vmul.f32 %v4919_v33, %v2467_v58  ;;  %v2491_v20 = vstv %s3425_s10  ;;  %s5069_s10 = sld [smem:[#allocation7 + $0x39]] }
 0x54c   : > { %v2040_v9 = vpop.permute.xlu0 %2039  ;;  %v2493_v23 = vmul.f32 %v4907_v14, %v2491_v20  ;;  %v2494_v49 = vmul.f32 %v4881_v5, %v2491_v20 }
 0x54d   : > { %v2042_v40 = vpop.permute.xlu1 %2041  ;;  %v2028_v8 = vadd.f32 %v2026_v43, %v2022_v12  ;;  %v2492_v12 = vmul.f32 %v4871_v36, %v2491_v20 }
 0x54e   : > { %2426 = vrot.lane.b32.xlu0 %v2416_v11, %s3697_s18  ;;  %v2047_v57 = vsel %vm376_vm0, %v2040_v9, %v2042_v40  ;;  %v2132_v40 = vstv %s4917_s20  ;;  %s3445_s20 = sld [smem:[#allocation7 + $0x4f]] }
 0x54f   : > { %2428 = vrot.lane.b32.xlu1 %v2417_v46, %s3697_s18  ;;  %v2051_v62 = vadd.f32 %v2047_v57, %v2027_v37  ;;  %v4937_v57 = vld [vmem:[#allocation2 + $0xc0] sm:$0xff] }
 0x550   : > { %v2044_v22 = vpop.permute.xlu0 %2043  ;;  %v2133_v61 = vmul.f32 %v4937_v57, %v2132_v40 }
 0x551   : > { %v2046_v50 = vpop.permute.xlu1 %2045 }
 0x552   : > { %2446 = vrot.lane.b32.xlu0 %v2438_v51, %s3698_s30  ;;  %v2048_v10 = vsel %vm376_vm0, %v2044_v22, %v2046_v50 }
 0x553   : > { %2448 = vrot.lane.b32.xlu1 %v2439_v56, %s3698_s30  ;;  %v2052_v19 = vadd.f32 %v2048_v10, %v2028_v8  ;;  %v2495_v8 = vmul.f32 %v4919_v33, %v2491_v20  ;;  %v2521_v56 = vstv %s3427_s16  ;;  %s3446_s16 = sld [smem:[#allocation7 + $0x50]] }
 0x554   : > { %v2064_v55 = vpop.permute.xlu0 %2063  ;;  %v2522_v10 = vmul.f32 %v4904_v6, %v2521_v56 }
 0x555   : > { %v2066_v0 = vpop.permute.xlu1 %2065 }
 0x556   : > { %v2071_v3 = vsel %vm401_vm1, %v2064_v55, %v2066_v0  ;;  %2450 = vrot.lane.b32.xlu0 %v2440_v52, %s3698_s30 }
 0x557   : > { %v2075_v63 = vadd.f32 %v2071_v3, %v2051_v62  ;;  %2452 = vrot.lane.b32.xlu1 %v2441_v60, %s3698_s30  ;;  %v4940_v60 = vld [vmem:[#allocation2 + $0xa8] sm:$0xff] }
 0x558   : > { %v2068_v41 = vpop.permute.xlu0 %2067  ;;  %v2523_v52 = vmul.f32 %v4940_v60, %v2521_v56 }
 0x559   : > { %v2070_v39 = vpop.permute.xlu1 %2069  ;;  %v2081_v17 = vadd.f32 %v2079_v45, %v2075_v63  ;;  %v4947_v45 = vld [vmem:[#allocation2 + $0xd0] sm:$0xff] }
 0x55a   : > { %v2072_v48 = vsel %vm401_vm1, %v2068_v41, %v2070_v39  ;;  %2476 = vrot.lane.b32.xlu0 %v2468_v31, %s3697_s18 }
 0x55b   : > { %v2076_v44 = vadd.f32 %v2072_v48, %v2052_v19  ;;  %2478 = vrot.lane.b32.xlu1 %v2469_v15, %s3697_s18  ;;  %v2134_v19 = vmul.f32 %v4947_v45, %v2132_v40  ;;  %v4952_v15 = vld [vmem:[#allocation2 + $0xb8] sm:$0xff] }
 0x55c   : > { %v2094_v29 = vpop.permute.xlu0 %2093  ;;  %v2525_v31 = vmul.f32 %v4952_v15, %v2521_v56 }
 0x55d   : > { %v2096_v25 = vpop.permute.xlu1 %2095  ;;  %v2082_v1 = vadd.f32 %v2080_v24, %v2076_v44  ;;  %v2545_v44 = vstv %s3428_s26  ;;  %s5094_s26 = sld [smem:[#allocation7 + $0x3c]] }
 0x55e   : > { %2480 = vrot.lane.b32.xlu0 %v2470_v32, %s3697_s18  ;;  %v2101_v43 = vsel %vm376_vm0, %v2094_v29, %v2096_v25  ;;  %v2547_v29 = vmul.f32 %v4940_v60, %v2545_v44 }
 0x55f   : > { %2482 = vrot.lane.b32.xlu1 %v2471_v4, %s3697_s18  ;;  %v2105_v9 = vadd.f32 %v2101_v43, %v2081_v17  ;;  %v2524_v17 = vmul.f32 %v4914_v21, %v2521_v56  ;;  %v2546_v4 = vmul.f32 %v4904_v6, %v2545_v44  ;;  %v4973_v56 = vld [vmem:[#allocation2 + $0xc8] sm:$0xff] }
 0x560   : > { %v2098_v37 = vpop.permute.xlu0 %2097 }
 0x561   : > { %v2100_v34 = vpop.permute.xlu1 %2099 }
 0x562   : > { %2500 = vrot.lane.b32.xlu0 %v2492_v12, %s3698_s30  ;;  %v2102_v50 = vsel %vm376_vm0, %v2098_v37, %v2100_v34  ;;  %v2548_v12 = vmul.f32 %v4914_v21, %v2545_v44 }
 0x563   : > { %2502 = vrot.lane.b32.xlu1 %v2493_v23, %s3698_s30  ;;  %v2106_v62 = vadd.f32 %v2102_v50, %v2082_v1  ;;  %v2186_v1 = vstv %s4950_s29  ;;  %v2549_v23 = vmul.f32 %v4952_v15, %v2545_v44  ;;  %s3448_s29 = sld [smem:[#allocation7 + $0x52]] }
 0x564   : > { %v2118_v11 = vpop.permute.xlu0 %2117 }
 0x565   : > { %v2120_v46 = vpop.permute.xlu1 %2119 }
 0x566   : > { %v2125_v22 = vsel %vm401_vm1, %v2118_v11, %v2120_v46  ;;  %2504 = vrot.lane.b32.xlu0 %v2494_v49, %s3698_s30  ;;  %v4970_v11 = vld [vmem:[#allocation2 + $0xe0] sm:$0xff] }
 0x567   : > { %v2129_v51 = vadd.f32 %v2125_v22, %v2105_v9  ;;  %2506 = vrot.lane.b32.xlu1 %v2495_v8, %s3698_s30  ;;  %v2575_v9 = vstv %s3430_s6  ;;  %v2187_v8 = vmul.f32 %v4970_v11, %v2186_v1  ;;  %s3449_s6 = sld [smem:[#allocation7 + $0x53]] }
 0x568   : > { %v2122_v55 = vpop.permute.xlu0 %2121 }
 0x569   : > { %v2124_v0 = vpop.permute.xlu1 %2123  ;;  %v2135_v3 = vadd.f32 %v2133_v61, %v2129_v51  ;;  %v2577_v51 = vmul.f32 %v4973_v56, %v2575_v9  ;;  %v2576_v61 = vmul.f32 %v4937_v57, %v2575_v9 }
 0x56a   : > { %v2126_v58 = vsel %vm401_vm1, %v2122_v55, %v2124_v0  ;;  %2530 = vrot.lane.b32.xlu0 %v2522_v10, %s3697_s18 }
 0x56b   : > { %v2130_v63 = vadd.f32 %v2126_v58, %v2106_v62  ;;  %2532 = vrot.lane.b32.xlu1 %v2523_v52, %s3697_s18  ;;  %v4980_v52 = vld [vmem:[#allocation2 + $0xf0] sm:$0xff] }
 0x56c   : > { %v2148_v41 = vpop.permute.xlu0 %2147  ;;  %v2188_v10 = vmul.f32 %v4980_v52, %v2186_v1 }
 0x56d   : > { %v2150_v39 = vpop.permute.xlu1 %2149  ;;  %v2136_v48 = vadd.f32 %v2134_v19, %v2130_v63  ;;  %v4983_v63 = vld [vmem:[#allocation2 + $0xd8] sm:$0xff] }
 0x56e   : > { %2534 = vrot.lane.b32.xlu0 %v2524_v17, %s3697_s18  ;;  %v2155_v32 = vsel %vm376_vm0, %v2148_v41, %v2150_v39  ;;  %v2579_v19 = vmul.f32 %v4983_v63, %v2575_v9  ;;  %v2578_v39 = vmul.f32 %v4947_v45, %v2575_v9 }
 0x56f   : > { %2536 = vrot.lane.b32.xlu1 %v2525_v31, %s3697_s18  ;;  %v2159_v20 = vadd.f32 %v2155_v32, %v2135_v3  ;;  %v2599_v31 = vstv %s3431_s7  ;;  %s5119_s7 = sld [smem:[#allocation7 + $0x3f]] }
 0x570   : > { %v2152_v25 = vpop.permute.xlu0 %2151  ;;  %v2601_v44 = vmul.f32 %v4973_v56, %v2599_v31  ;;  %v2603_v1 = vmul.f32 %v4983_v63, %v2599_v31 }
 0x571   : > { %v2154_v24 = vpop.permute.xlu1 %2153 }
 0x572   : > { %2554 = vrot.lane.b32.xlu0 %v2546_v4, %s3698_s30  ;;  %v2156_v43 = vsel %vm376_vm0, %v2152_v25, %v2154_v24  ;;  %v2600_v24 = vmul.f32 %v4937_v57, %v2599_v31 }
 0x573   : > { %2556 = vrot.lane.b32.xlu1 %v2547_v29, %s3698_s30  ;;  %v2160_v49 = vadd.f32 %v2156_v43, %v2136_v48 }
 0x574   : > { %v2172_v37 = vpop.permute.xlu0 %2171 }
 0x575   : > { %v2174_v34 = vpop.permute.xlu1 %2173 }
 0x576   : > { %v2179_v40 = vsel %vm401_vm1, %v2172_v37, %v2174_v34  ;;  %2558 = vrot.lane.b32.xlu0 %v2548_v12, %s3698_s30 }
 0x577   : > { %v2183_v46 = vadd.f32 %v2179_v40, %v2159_v20  ;;  %2560 = vrot.lane.b32.xlu1 %v2549_v23, %s3698_s30  ;;  %v2602_v20 = vmul.f32 %v4947_v45, %v2599_v31  ;;  %v2629_v23 = vstv %s3433_s9  ;;  %s3451_s9 = sld [smem:[#allocation7 + $0x55]] }
 0x578   : > { %v2176_v22 = vpop.permute.xlu0 %2175 }
 0x579   : > { %v2178_v50 = vpop.permute.xlu1 %2177  ;;  %v2189_v62 = vadd.f32 %v2187_v8, %v2183_v46  ;;  %v5005_v46 = vld [vmem:[#allocation2 + $0xe8] sm:$0xff] }
 0x57a   : > { %v2180_v0 = vsel %vm401_vm1, %v2176_v22, %v2178_v50  ;;  %2584 = vrot.lane.b32.xlu0 %v2576_v61, %s3697_s18  ;;  %v2631_v8 = vmul.f32 %v5005_v46, %v2629_v23 }
 0x57b   : > { %v2184_v55 = vadd.f32 %v2180_v0, %v2160_v49  ;;  %2586 = vrot.lane.b32.xlu1 %v2577_v51, %s3697_s18  ;;  %v2630_v49 = vmul.f32 %v4970_v11, %v2629_v23  ;;  %v2245_v51 = vstv %s4994_s11  ;;  %v5016_v0 = vld [vmem:[#allocation2 + $0xf8] sm:$0xff]  ;;  %s3452_s11 = sld [smem:[#allocation7 + $0x56]] }
 0x57c   : > { %v2202_v58 = vpop.permute.xlu0 %2201 }
 0x57d   : > { %v2204_v3 = vpop.permute.xlu1 %2203  ;;  %v2190_v41 = vadd.f32 %v2188_v10, %v2184_v55  ;;  %v2633_v55 = vmul.f32 %v5016_v0, %v2629_v23  ;;  %v2632_v10 = vmul.f32 %v4980_v52, %v2629_v23  ;;  %v2688_v23 = vstv %s3439_s14  ;;  %s5169_s14 = sld [smem:[#allocation7 + $0x45]] }
 0x57e   : > { %2588 = vrot.lane.b32.xlu0 %v2578_v39, %s3697_s18  ;;  %v2209_v25 = vsel %vm376_vm0, %v2202_v58, %v2204_v3  ;;  %v2653_v3 = vstv %s3434_s12  ;;  %v2246_v58 = vmul.f32 %v4751_v26, %v2245_v51  ;;  %s5144_s12 = sld [smem:[#allocation7 + $0x42]] }
 0x57f   : > { %2590 = vrot.lane.b32.xlu1 %v2579_v19, %s3697_s18  ;;  %v2213_v29 = vadd.f32 %v2209_v25, %v2189_v62  ;;  %v2243_v19 = vstv %s5002_s13  ;;  %v2655_v31 = vmul.f32 %v5005_v46, %v2653_v3  ;;  %v2299_v25 = vstv %s5013_s28  ;;  %s3454_s13 = sld [smem:[#allocation7 + $0x58]]  ;;  %s3455_s28 = sld [smem:[#allocation7 + $0x59]] }
 0x580   : > { %v2206_v48 = vpop.permute.xlu0 %2205 }
 0x581   : > { %v2208_v17 = vpop.permute.xlu1 %2207 }
 0x582   : > { %2608 = vrot.lane.b32.xlu0 %v2600_v24, %s3698_s30  ;;  %v2210_v34 = vsel %vm376_vm0, %v2206_v48, %v2208_v17  ;;  %v2654_v17 = vmul.f32 %v4970_v11, %v2653_v3  ;;  %v2247_v24 = vmul.f32 %v4760_v27, %v2245_v51 }
 0x583   : > { %2610 = vrot.lane.b32.xlu1 %v2601_v44, %s3698_s30  ;;  %v2214_v43 = vadd.f32 %v2210_v34, %v2190_v41  ;;  %v2248_v44 = vadd.f32 %v2246_v58, %v2243_v19  ;;  %v2692_v58 = vmul.f32 %v4787_v53, %v2688_v23 }
 0x584   : > { %v2226_v32 = vpop.permute.xlu0 %2225 }
 0x585   : > { %v2228_v4 = vpop.permute.xlu1 %2227 }
 0x586   : > { %v2233_v37 = vsel %vm401_vm1, %v2226_v32, %v2228_v4  ;;  %2612 = vrot.lane.b32.xlu0 %v2602_v20, %s3698_s30  ;;  %v2656_v20 = vmul.f32 %v4980_v52, %v2653_v3 }
 0x587   : > { %v2237_v12 = vadd.f32 %v2233_v37, %v2213_v29  ;;  %2614 = vrot.lane.b32.xlu1 %v2603_v1, %s3698_s30  ;;  %v2657_v1 = vmul.f32 %v5016_v0, %v2653_v3 }
 0x588   : > { %v2230_v9 = vpop.permute.xlu0 %2229 }
 0x589   : > { %3408 = vst [vmem:[%s4737_s24 + $0x10] sm:$0xff] %v2237_v12  ;;  %v2232_v40 = vpop.permute.xlu1 %2231  ;;  %v2249_v12 = vadd.f32 %v2247_v24, %v2243_v19  ;;  %v2691_v19 = vmul.f32 %v4760_v27, %v2688_v23 }
 0x58a   : > { %v2234_v50 = vsel %vm401_vm1, %v2230_v9, %v2232_v40  ;;  %2638 = vrot.lane.b32.xlu0 %v2630_v49, %s3697_s18  ;;  %v2300_v40 = vmul.f32 %v4772_v13, %v2299_v25 }
 0x58b   : > { %v2238_v22 = vadd.f32 %v2234_v50, %v2214_v43  ;;  %2640 = vrot.lane.b32.xlu1 %v2631_v8, %s3697_s18  ;;  %v2690_v50 = vmul.f32 %v4775_v35, %v2688_v23 }
 0x58c   : > { %v2261_v62 = vpop.permute.xlu0 %2260 }
 0x58d   : > { %3409 = vst [vmem:[%s4737_s24 + $0x18] sm:$0xff] %v2238_v22  ;;  %v2263_v61 = vpop.permute.xlu1 %2262  ;;  %v2689_v22 = vmul.f32 %v4751_v26, %v2688_v23 }
 0x58e   : > { %2642 = vrot.lane.b32.xlu0 %v2632_v10, %s3697_s18  ;;  %v2268_v48 = vsel %vm376_vm0, %v2261_v62, %v2263_v61 }
 0x58f   : > { %2644 = vrot.lane.b32.xlu1 %v2633_v55, %s3697_s18  ;;  %v2272_v29 = vadd.f32 %v2268_v48, %v2248_v44  ;;  %v2301_v55 = vmul.f32 %v4782_v42, %v2299_v25  ;;  %v2353_v25 = vstv %s5044_s8  ;;  %s3458_s8 = sld [smem:[#allocation7 + $0x5c]] }
 0x590   : > { %v2265_v41 = vpop.permute.xlu0 %2264  ;;  %v2354_v23 = vmul.f32 %v4805_v7, %v2353_v25 }
 0x591   : > { %v2267_v39 = vpop.permute.xlu1 %2266 }
 0x592   : > { %2662 = vrot.lane.b32.xlu0 %v2654_v17, %s3698_s30  ;;  %v2269_v34 = vsel %vm376_vm0, %v2265_v41, %v2267_v39  ;;  %v2712_v41 = vstv %s3440_s15  ;;  %s3457_s15 = sld [smem:[#allocation7 + $0x5b]] }
 0x593   : > { %2664 = vrot.lane.b32.xlu1 %v2655_v31, %s3698_s30  ;;  %v2273_v9 = vadd.f32 %v2269_v34, %v2249_v12  ;;  %v2714_v48 = vmul.f32 %v4775_v35, %v2712_v41  ;;  %v2713_v44 = vmul.f32 %v4751_v26, %v2712_v41 }
 0x594   : > { %v2285_v32 = vpop.permute.xlu0 %2284 }
 0x595   : > { %v2287_v4 = vpop.permute.xlu1 %2286 }
 0x596   : > { %v2292_v37 = vsel %vm401_vm1, %v2285_v32, %v2287_v4  ;;  %2666 = vrot.lane.b32.xlu0 %v2656_v20, %s3698_s30  ;;  %v2715_v20 = vmul.f32 %v4760_v27, %v2712_v41 }
 0x597   : > { %v2296_v43 = vadd.f32 %v2292_v37, %v2272_v29  ;;  %2668 = vrot.lane.b32.xlu1 %v2657_v1, %s3698_s30  ;;  %v2716_v1 = vmul.f32 %v4787_v53, %v2712_v41  ;;  %v2742_v37 = vstv %s3442_s17  ;;  %s3460_s17 = sld [smem:[#allocation7 + $0x5e]] }
 0x598   : > { %v2289_v49 = vpop.permute.xlu0 %2288  ;;  %v2744_v53 = vmul.f32 %v4808_v16, %v2742_v37  ;;  %v2743_v27 = vmul.f32 %v4772_v13, %v2742_v37 }
 0x599   : > { %v2291_v8 = vpop.permute.xlu1 %2290  ;;  %v2302_v51 = vadd.f32 %v2300_v40, %v2296_v43 }
 0x59a   : > { %v2293_v61 = vsel %vm401_vm1, %v2289_v49, %v2291_v8  ;;  %2697 = vrot.lane.b32.xlu0 %v2689_v22, %s3697_s18 }
 0x59b   : > { %v2297_v62 = vadd.f32 %v2293_v61, %v2273_v9  ;;  %2699 = vrot.lane.b32.xlu1 %v2690_v50, %s3697_s18  ;;  %v2355_v50 = vmul.f32 %v4815_v18, %v2353_v25  ;;  %v2746_v61 = vmul.f32 %v4820_v30, %v2742_v37 }
 0x59c   : > { %v2315_v3 = vpop.permute.xlu0 %2314 }
 0x59d   : > { %v2317_v10 = vpop.permute.xlu1 %2316  ;;  %v2303_v39 = vadd.f32 %v2301_v55, %v2297_v62  ;;  %v2745_v62 = vmul.f32 %v4782_v42, %v2742_v37 }
 0x59e   : > { %2701 = vrot.lane.b32.xlu0 %v2691_v19, %s3697_s18  ;;  %v2322_v24 = vsel %vm376_vm0, %v2315_v3, %v2317_v10  ;;  %v2766_v10 = vstv %s3443_s23  ;;  %s5196_s23 = sld [smem:[#allocation7 + $0x48]] }
 0x59f   : > { %2703 = vrot.lane.b32.xlu1 %v2692_v58, %s3697_s18  ;;  %v2326_v29 = vadd.f32 %v2322_v24, %v2302_v51  ;;  %v2768_v19 = vmul.f32 %v4808_v16, %v2766_v10  ;;  %v2770_v24 = vmul.f32 %v4820_v30, %v2766_v10  ;;  %v2769_v25 = vmul.f32 %v4782_v42, %v2766_v10 }
 0x5a0   : > { %v2319_v17 = vpop.permute.xlu0 %2318 }
 0x5a1   : > { %v2321_v31 = vpop.permute.xlu1 %2320 }
 0x5a2   : > { %2721 = vrot.lane.b32.xlu0 %v2713_v44, %s3698_s30  ;;  %v2323_v34 = vsel %vm376_vm0, %v2319_v17, %v2321_v31  ;;  %v2407_v31 = vstv %s5069_s10  ;;  %s5203_s10 = sld [smem:[#allocation8 + $0x3]] }
 0x5a3   : > { %2723 = vrot.lane.b32.xlu1 %v2714_v48, %s3698_s30  ;;  %v2327_v12 = vadd.f32 %v2323_v34, %v2303_v39  ;;  %v2767_v39 = vmul.f32 %v4772_v13, %v2766_v10 }
 0x5a4   : > { %v2339_v32 = vpop.permute.xlu0 %2338 }
 0x5a5   : > { %v2341_v4 = vpop.permute.xlu1 %2340 }
 0x5a6   : > { %v2346_v35 = vsel %vm401_vm1, %v2339_v32, %v2341_v4  ;;  %2725 = vrot.lane.b32.xlu0 %v2715_v20, %s3698_s30  ;;  %v2796_v4 = vstv %s3445_s20  ;;  %v2408_v32 = vmul.f32 %v4838_v47, %v2407_v31  ;;  %s3461_s20 = sld [smem:[#allocation7 + $0x5f]] }
 0x5a7   : > { %v2350_v26 = vadd.f32 %v2346_v35, %v2326_v29  ;;  %2727 = vrot.lane.b32.xlu1 %v2716_v1, %s3698_s30  ;;  %v2798_v30 = vmul.f32 %v4841_v54, %v2796_v4  ;;  %v2797_v42 = vmul.f32 %v4805_v7, %v2796_v4 }
 0x5a8   : > { %v2343_v40 = vpop.permute.xlu0 %2342 }
 0x5a9   : > { %v2345_v43 = vpop.permute.xlu1 %2344  ;;  %v2356_v9 = vadd.f32 %v2354_v23, %v2350_v26  ;;  %v2409_v23 = vmul.f32 %v4848_v59, %v2407_v31 }
 0x5aa   : > { %v2347_v8 = vsel %vm401_vm1, %v2343_v40, %v2345_v43  ;;  %2751 = vrot.lane.b32.xlu0 %v2743_v27, %s3697_s18  ;;  %v2800_v40 = vmul.f32 %v4853_v2, %v2796_v4 }
 0x5ab   : > { %v2351_v49 = vadd.f32 %v2347_v8, %v2327_v12  ;;  %2753 = vrot.lane.b32.xlu1 %v2744_v53, %s3697_s18  ;;  %v2799_v53 = vmul.f32 %v4815_v18, %v2796_v4 }
 0x5ac   : > { %v2369_v51 = vpop.permute.xlu0 %2368 }
 0x5ad   : > { %v2371_v22 = vpop.permute.xlu1 %2370  ;;  %v2357_v55 = vadd.f32 %v2355_v50, %v2351_v49 }
 0x5ae   : > { %2755 = vrot.lane.b32.xlu0 %v2745_v62, %s3697_s18  ;;  %v2376_v41 = vsel %vm376_vm0, %v2369_v51, %v2371_v22 }
 0x5af   : > { %2757 = vrot.lane.b32.xlu1 %v2746_v61, %s3697_s18  ;;  %v2380_v17 = vadd.f32 %v2376_v41, %v2356_v9  ;;  %v2820_v9 = vstv %s3446_s16  ;;  %v2461_v61 = vstv %s5094_s26  ;;  %s5221_s16 = sld [smem:[#allocation7 + $0x4b]]  ;;  %s3450_s26 = sld [smem:[#allocation7 + $0x54]] }
 0x5b0   : > { %v2373_v58 = vpop.permute.xlu0 %2372  ;;  %v2822_v50 = vmul.f32 %v4841_v54, %v2820_v9  ;;  %v2821_v22 = vmul.f32 %v4805_v7, %v2820_v9  ;;  %v2462_v41 = vmul.f32 %v4871_v36, %v2461_v61 }
 0x5b1   : > { %v2375_v3 = vpop.permute.xlu1 %2374 }
 0x5b2   : > { %2775 = vrot.lane.b32.xlu0 %v2767_v39, %s3698_s30  ;;  %v2377_v29 = vsel %vm376_vm0, %v2373_v58, %v2375_v3  ;;  %v2824_v3 = vmul.f32 %v4853_v2, %v2820_v9  ;;  %v2823_v58 = vmul.f32 %v4815_v18, %v2820_v9  ;;  %v2850_v39 = vstv %s3448_s29  ;;  %s3453_s29 = sld [smem:[#allocation7 + $0x57]] }
 0x5b3   : > { %2777 = vrot.lane.b32.xlu1 %v2768_v19, %s3698_s30  ;;  %v2381_v1 = vadd.f32 %v2377_v29, %v2357_v55  ;;  %v2852_v2 = vmul.f32 %v4874_v28, %v2850_v39  ;;  %v2851_v18 = vmul.f32 %v4838_v47, %v2850_v39  ;;  %v2463_v29 = vmul.f32 %v4881_v5, %v2461_v61 }
 0x5b4   : > { %v2393_v44 = vpop.permute.xlu0 %2392  ;;  %v2904_v9 = vstv %s3451_s9  ;;  %s3471_s9 = sshll.u32 (%p5315_p10), %s3747_s21, 4 }
 0x5b5   : > { %v2395_v48 = vpop.permute.xlu1 %2394 }
 0x5b6   : > { %v2400_v16 = vsel %vm401_vm1, %v2393_v44, %v2395_v48  ;;  %2779 = vrot.lane.b32.xlu0 %v2769_v25, %s3698_s30 }
 0x5b7   : > { %v2404_v13 = vadd.f32 %v2400_v16, %v2380_v17  ;;  %2781 = vrot.lane.b32.xlu1 %v2770_v24, %s3698_s30 }
 0x5b8   : > { %v2397_v34 = vpop.permute.xlu0 %2396 }
 0x5b9   : > { %v2399_v20 = vpop.permute.xlu1 %2398  ;;  %v2410_v35 = vadd.f32 %v2408_v32, %v2404_v13  ;;  %v2854_v13 = vmul.f32 %v4886_v38, %v2850_v39  ;;  %v2853_v32 = vmul.f32 %v4848_v59, %v2850_v39  ;;  %v2928_v39 = vstv %s3452_s11 }
 0x5ba   : > { %v2401_v37 = vsel %vm401_vm1, %v2397_v34, %v2399_v20  ;;  %2805 = vrot.lane.b32.xlu0 %v2797_v42, %s3697_s18  ;;  %v2874_v20 = vstv %s3449_s6  ;;  %s3456_s6 = sld [smem:[#allocation7 + $0x5a]] }
 0x5bb   : > { %v2405_v26 = vadd.f32 %v2401_v37, %v2381_v1  ;;  %2807 = vrot.lane.b32.xlu1 %v2798_v30, %s3697_s18  ;;  %v2876_v42 = vmul.f32 %v4874_v28, %v2874_v20 }
 0x5bc   : > { %v2423_v43 = vpop.permute.xlu0 %2422 }
 0x5bd   : > { %v2425_v12 = vpop.permute.xlu1 %2424  ;;  %v2411_v27 = vadd.f32 %v2409_v23, %v2405_v26  ;;  %v2515_v26 = vstv %s5119_s7  ;;  %s3459_s7 = sld [smem:[#allocation7 + $0x5d]] }
 0x5be   : > { %2809 = vrot.lane.b32.xlu0 %v2799_v53, %s3697_s18  ;;  %v2430_v51 = vsel %vm376_vm0, %v2423_v43, %v2425_v12  ;;  %v2877_v53 = vmul.f32 %v4848_v59, %v2874_v20  ;;  %v2905_v59 = vmul.f32 %v4871_v36, %v2904_v9 }
 0x5bf   : > { %2811 = vrot.lane.b32.xlu1 %v2800_v40, %s3697_s18  ;;  %v2434_v62 = vadd.f32 %v2430_v51, %v2410_v35  ;;  %v2875_v35 = vmul.f32 %v4838_v47, %v2874_v20  ;;  %v2878_v40 = vmul.f32 %v4886_v38, %v2874_v20  ;;  %v2906_v38 = vmul.f32 %v4907_v14, %v2904_v9 }
 0x5c0   : > { %v2427_v49 = vpop.permute.xlu0 %2426 }
 0x5c1   : > { %v2429_v8 = vpop.permute.xlu1 %2428 }
 0x5c2   : > { %2829 = vrot.lane.b32.xlu0 %v2821_v22, %s3698_s30  ;;  %v2431_v19 = vsel %vm376_vm0, %v2427_v49, %v2429_v8  ;;  %v2516_v8 = vmul.f32 %v4904_v6, %v2515_v26 }
 0x5c3   : > { %2831 = vrot.lane.b32.xlu1 %v2822_v50, %s3698_s30  ;;  %v2435_v31 = vadd.f32 %v2431_v19, %v2411_v27  ;;  %v2907_v19 = vmul.f32 %v4881_v5, %v2904_v9 }
 0x5c4   : > { %v2447_v10 = vpop.permute.xlu0 %2446 }
 0x5c5   : > { %v2449_v55 = vpop.permute.xlu1 %2448 }
 0x5c6   : > { %v2454_v54 = vsel %vm401_vm1, %v2447_v10, %v2449_v55  ;;  %2833 = vrot.lane.b32.xlu0 %v2823_v58, %s3698_s30  ;;  %v2517_v55 = vmul.f32 %v4914_v21, %v2515_v26  ;;  %v2908_v58 = vmul.f32 %v4919_v33, %v2904_v9 }
 0x5c7   : > { %v2458_v7 = vadd.f32 %v2454_v54, %v2434_v62  ;;  %2835 = vrot.lane.b32.xlu1 %v2824_v3, %s3698_s30 }
 0x5c8   : > { %v2451_v48 = vpop.permute.xlu0 %2450 }
 0x5c9   : > { %v2453_v17 = vpop.permute.xlu1 %2452  ;;  %v2464_v44 = vadd.f32 %v2462_v41, %v2458_v7 }
 0x5ca   : > { %v2455_v24 = vsel %vm401_vm1, %v2451_v48, %v2453_v17  ;;  %2859 = vrot.lane.b32.xlu0 %v2851_v18, %s3697_s18  ;;  %v2929_v17 = vmul.f32 %v4871_v36, %v2928_v39 }
 0x5cb   : > { %v2459_v25 = vadd.f32 %v2455_v24, %v2435_v31  ;;  %2861 = vrot.lane.b32.xlu1 %v2852_v2, %s3697_s18  ;;  %v2930_v31 = vmul.f32 %v4907_v14, %v2928_v39  ;;  %v2569_v2 = vstv %s5144_s12 }
 0x5cc   : > { %v2477_v4 = vpop.permute.xlu0 %2476 }
 0x5cd   : > { %v2479_v16 = vpop.permute.xlu1 %2478  ;;  %v2465_v1 = vadd.f32 %v2463_v29, %v2459_v25  ;;  %v2932_v25 = vmul.f32 %v4919_v33, %v2928_v39  ;;  %v2931_v29 = vmul.f32 %v4881_v5, %v2928_v39 }
 0x5ce   : > { %2863 = vrot.lane.b32.xlu0 %v2853_v32, %s3697_s18  ;;  %v2484_v37 = vsel %vm376_vm0, %v2477_v4, %v2479_v16  ;;  %v2958_v4 = vstv %s3454_s13  ;;  %s3125_s13 = scalar_lea.vmem (%p5315_p10), %s5300_s5, %s3471_s9 }
 0x5cf   : > { %2865 = vrot.lane.b32.xlu1 %v2854_v13, %s3697_s18  ;;  %v2488_v23 = vadd.f32 %v2484_v37, %v2464_v44  ;;  %v2570_v13 = vmul.f32 %v4937_v57, %v2569_v2  ;;  %v2960_v33 = vmul.f32 %v4940_v60, %v2958_v4  ;;  %v2959_v5 = vmul.f32 %v4904_v6, %v2958_v4 }
 0x5d0   : > { %v2481_v30 = vpop.permute.xlu0 %2480 }
 0x5d1   : > { %v2483_v34 = vpop.permute.xlu1 %2482 }
 0x5d2   : > { %2883 = vrot.lane.b32.xlu0 %v2875_v35, %s3698_s30  ;;  %v2485_v27 = vsel %vm376_vm0, %v2481_v30, %v2483_v34  ;;  %v2571_v35 = vmul.f32 %v4947_v45, %v2569_v2  ;;  %v3036_v2 = vstv %s3458_s8 }
 0x5d3   : > { %2885 = vrot.lane.b32.xlu1 %v2876_v42, %s3698_s30  ;;  %v2489_v49 = vadd.f32 %v2485_v27, %v2465_v1 }
 0x5d4   : > { %v2501_v43 = vpop.permute.xlu0 %2500 }
 0x5d5   : > { %v2503_v12 = vpop.permute.xlu1 %2502 }
 0x5d6   : > { %v2508_v28 = vsel %vm401_vm1, %v2501_v43, %v2503_v12  ;;  %2887 = vrot.lane.b32.xlu0 %v2877_v53, %s3698_s30  ;;  %v2961_v12 = vmul.f32 %v4914_v21, %v2958_v4 }
 0x5d7   : > { %v2512_v47 = vadd.f32 %v2508_v28, %v2488_v23  ;;  %2889 = vrot.lane.b32.xlu1 %v2878_v40, %s3698_s30  ;;  %v2962_v23 = vmul.f32 %v4952_v15, %v2958_v4  ;;  %v2982_v40 = vstv %s3455_s28 }
 0x5d8   : > { %v2505_v22 = vpop.permute.xlu0 %2504  ;;  %v2984_v28 = vmul.f32 %v4940_v60, %v2982_v40  ;;  %v2983_v9 = vmul.f32 %v4904_v6, %v2982_v40 }
 0x5d9   : > { %v2507_v50 = vpop.permute.xlu1 %2506  ;;  %v2518_v51 = vadd.f32 %v2516_v8, %v2512_v47  ;;  %v2623_v8 = vstv %s5169_s14 }
 0x5da   : > { %v2509_v61 = vsel %vm401_vm1, %v2505_v22, %v2507_v50  ;;  %2913 = vrot.lane.b32.xlu0 %v2905_v59, %s3697_s18  ;;  %v2985_v59 = vmul.f32 %v4914_v21, %v2982_v40  ;;  %v2625_v39 = vmul.f32 %v4980_v52, %v2623_v8 }
 0x5db   : > { %v2513_v62 = vadd.f32 %v2509_v61, %v2489_v49  ;;  %2915 = vrot.lane.b32.xlu1 %v2906_v38, %s3697_s18  ;;  %v2986_v38 = vmul.f32 %v4952_v15, %v2982_v40  ;;  %v3012_v61 = vstv %s3457_s15 }
 0x5dc   : > { %v2531_v3 = vpop.permute.xlu0 %2530  ;;  %v3014_v15 = vmul.f32 %v4973_v56, %v3012_v61  ;;  %v3013_v21 = vmul.f32 %v4937_v57, %v3012_v61 }
 0x5dd   : > { %v2533_v10 = vpop.permute.xlu1 %2532  ;;  %v2519_v54 = vadd.f32 %v2517_v55, %v2513_v62  ;;  %v2624_v62 = vmul.f32 %v4970_v11, %v2623_v8 }
 0x5de   : > { %2917 = vrot.lane.b32.xlu0 %v2907_v19, %s3697_s18  ;;  %v2538_v48 = vsel %vm376_vm0, %v2531_v3, %v2533_v10 }
 0x5df   : > { %2919 = vrot.lane.b32.xlu1 %v2908_v58, %s3697_s18  ;;  %v2542_v18 = vadd.f32 %v2538_v48, %v2518_v51 }
 0x5e0   : > { %v2535_v41 = vpop.permute.xlu0 %2534 }
 0x5e1   : > { %v2537_v7 = vpop.permute.xlu1 %2536 }
 0x5e2   : > { %2937 = vrot.lane.b32.xlu0 %v2929_v17, %s3698_s30  ;;  %v2539_v16 = vsel %vm376_vm0, %v2535_v41, %v2537_v7  ;;  %v3015_v17 = vmul.f32 %v4947_v45, %v3012_v61 }
 0x5e3   : > { %2939 = vrot.lane.b32.xlu1 %v2930_v31, %s3698_s30  ;;  %v2543_v32 = vadd.f32 %v2539_v16, %v2519_v54  ;;  %v3016_v31 = vmul.f32 %v4983_v63, %v3012_v61  ;;  %v2736_v61 = vstv %s5221_s16 }
 0x5e4   : > { %v2555_v24 = vpop.permute.xlu0 %2554 }
 0x5e5   : > { %v2557_v44 = vpop.permute.xlu1 %2556 }
 0x5e6   : > { %v2562_v14 = vsel %vm401_vm1, %v2555_v24, %v2557_v44  ;;  %2941 = vrot.lane.b32.xlu0 %v2931_v29, %s3698_s30  ;;  %v3038_v24 = vmul.f32 %v4973_v56, %v3036_v2 }
 0x5e7   : > { %v2566_v36 = vadd.f32 %v2562_v14, %v2542_v18  ;;  %2943 = vrot.lane.b32.xlu1 %v2932_v25, %s3698_s30  ;;  %v3037_v25 = vmul.f32 %v4937_v57, %v3036_v2 }
 0x5e8   : > { %v2559_v20 = vpop.permute.xlu0 %2558 }
 0x5e9   : > { %v2561_v1 = vpop.permute.xlu1 %2560  ;;  %v2572_v34 = vadd.f32 %v2570_v13, %v2566_v36  ;;  %v3040_v36 = vmul.f32 %v4983_v63, %v3036_v2  ;;  %v3039_v13 = vmul.f32 %v4947_v45, %v3036_v2 }
 0x5ea   : > { %v2563_v30 = vsel %vm401_vm1, %v2559_v20, %v2561_v1  ;;  %2967 = vrot.lane.b32.xlu0 %v2959_v5, %s3697_s18  ;;  %v2682_v1 = vstv %s5196_s23 }
 0x5eb   : > { %v2567_v42 = vadd.f32 %v2563_v30, %v2543_v32  ;;  %2969 = vrot.lane.b32.xlu1 %v2960_v33, %s3697_s18  ;;  %v3066_v32 = vstv %s3460_s17  ;;  %v3581_v30 = vld [vmem:[#allocation2] sm:$0xff] }
 0x5ec   : > { %v2585_v26 = vpop.permute.xlu0 %2584  ;;  %v3068_v45 = vmul.f32 %v5005_v46, %v3066_v32  ;;  %v3070_v40 = vmul.f32 %v5016_v0, %v3066_v32 }
 0x5ed   : > { %v2587_v37 = vpop.permute.xlu1 %2586  ;;  %v2573_v43 = vadd.f32 %v2571_v35, %v2567_v42  ;;  %v2683_v42 = vmul.f32 %v3581_v30, %v2682_v1 }
 0x5ee   : > { %2971 = vrot.lane.b32.xlu0 %v2961_v12, %s3697_s18  ;;  %v2592_v47 = vsel %vm376_vm0, %v2585_v26, %v2587_v37  ;;  %v2680_v37 = vstv %s5203_s10 }
 0x5ef   : > { %2973 = vrot.lane.b32.xlu1 %v2962_v23, %s3697_s18  ;;  %v2596_v49 = vadd.f32 %v2592_v47, %v2572_v34  ;;  %v3067_v34 = vmul.f32 %v4970_v11, %v3066_v32  ;;  %v2685_v12 = vadd.f32 %v2683_v42, %v2680_v37  ;;  %v3090_v47 = vstv %s3461_s20 }
 0x5f0   : > { %v2589_v27 = vpop.permute.xlu0 %2588 }
 0x5f1   : > { %v2591_v53 = vpop.permute.xlu1 %2590 }
 0x5f2   : > { %2991 = vrot.lane.b32.xlu0 %v2983_v9, %s3698_s30  ;;  %v2593_v51 = vsel %vm376_vm0, %v2589_v27, %v2591_v53  ;;  %v3069_v53 = vmul.f32 %v4980_v52, %v3066_v32  ;;  %v3582_v27 = vld [vmem:[#allocation2 + $0x10] sm:$0xff] }
 0x5f3   : > { %2993 = vrot.lane.b32.xlu1 %v2984_v28, %s3698_s30  ;;  %v2597_v55 = vadd.f32 %v2593_v51, %v2573_v43  ;;  %v2684_v28 = vmul.f32 %v3582_v27, %v2682_v1  ;;  %v3587_v27 = vld [vmem:[#allocation2 + $0x60] sm:$0xff] }
 0x5f4   : > { %v2609_v22 = vpop.permute.xlu0 %2608 }
 0x5f5   : > { %v2611_v50 = vpop.permute.xlu1 %2610 }
 0x5f6   : > { %v2616_v60 = vsel %vm401_vm1, %v2609_v22, %v2611_v50  ;;  %2995 = vrot.lane.b32.xlu0 %v2985_v59, %s3698_s30  ;;  %v2686_v50 = vadd.f32 %v2684_v28, %v2680_v37  ;;  %v3091_v59 = vmul.f32 %v4970_v11, %v3090_v47  ;;  %v3583_v11 = vld [vmem:[#allocation2 + $0x20] sm:$0xff] }
 0x5f7   : > { %v2620_v6 = vadd.f32 %v2616_v60, %v2596_v49  ;;  %2997 = vrot.lane.b32.xlu1 %v2986_v38, %s3698_s30  ;;  %v3092_v38 = vmul.f32 %v5005_v46, %v3090_v47  ;;  %v2737_v46 = vmul.f32 %v3583_v11, %v2736_v61 }
 0x5f8   : > { %v2613_v3 = vpop.permute.xlu0 %2612 }
 0x5f9   : > { %v2615_v10 = vpop.permute.xlu1 %2614  ;;  %v2626_v58 = vadd.f32 %v2624_v62, %v2620_v6 }
 0x5fa   : > { %v2617_v19 = vsel %vm401_vm1, %v2613_v3, %v2615_v10  ;;  %3021 = vrot.lane.b32.xlu0 %v3013_v21, %s3697_s18  ;;  %v3093_v10 = vmul.f32 %v4980_v52, %v3090_v47 }
 0x5fb   : > { %v2621_v54 = vadd.f32 %v2617_v19, %v2597_v55  ;;  %3023 = vrot.lane.b32.xlu1 %v3014_v15, %s3697_s18  ;;  %v3094_v55 = vmul.f32 %v5016_v0, %v3090_v47 }
 0x5fc   : > { %v2639_v41 = vpop.permute.xlu0 %2638 }
 0x5fd   : > { %v2641_v7 = vpop.permute.xlu1 %2640  ;;  %v2627_v48 = vadd.f32 %v2625_v39, %v2621_v54 }
 0x5fe   : > { %3025 = vrot.lane.b32.xlu0 %v3015_v17, %s3697_s18  ;;  %v2646_v29 = vsel %vm376_vm0, %v2639_v41, %v2641_v7  ;;  %v3584_v7 = vld [vmem:[#allocation2 + $0x30] sm:$0xff] }
 0x5ff   : > { %3027 = vrot.lane.b32.xlu1 %v3016_v31, %s3697_s18  ;;  %v2650_v16 = vadd.f32 %v2646_v29, %v2626_v58  ;;  %v2738_v41 = vmul.f32 %v3584_v7, %v2736_v61 }
 0x600   : > { %v2643_v44 = vpop.permute.xlu0 %2642 }
 0x601   : > { %v2645_v18 = vpop.permute.xlu1 %2644 }
 0x602   : > { %3045 = vrot.lane.b32.xlu0 %v3037_v25, %s3698_s30  ;;  %v2647_v56 = vsel %vm376_vm0, %v2643_v44, %v2645_v18 }
 0x603   : > { %3047 = vrot.lane.b32.xlu1 %v3038_v24, %s3698_s30  ;;  %v2651_v33 = vadd.f32 %v2647_v56, %v2627_v48 }
 0x604   : > { %v2663_v4 = vpop.permute.xlu0 %2662 }
 0x605   : > { %v2665_v14 = vpop.permute.xlu1 %2664 }
 0x606   : > { %v2670_v57 = vsel %vm401_vm1, %v2663_v4, %v2665_v14  ;;  %3049 = vrot.lane.b32.xlu0 %v3039_v13, %s3698_s30 }
 0x607   : > { %v2674_v20 = vadd.f32 %v2670_v57, %v2650_v16  ;;  %3051 = vrot.lane.b32.xlu1 %v3040_v36, %s3698_s30  ;;  %v3585_v36 = vld [vmem:[#allocation2 + $0x40] sm:$0xff] }
 0x608   : > { %v2667_v63 = vpop.permute.xlu0 %2666 }
 0x609   : > { %3435 = vst [vmem:[%s4737_s24 + $0x20] sm:$0xff] %v2674_v20  ;;  %v2669_v5 = vpop.permute.xlu1 %2668 }
 0x60a   : > { %v2671_v35 = vsel %vm401_vm1, %v2667_v63, %v2669_v5  ;;  %3075 = vrot.lane.b32.xlu0 %v3067_v34, %s3697_s18 }
 0x60b   : > { %v2675_v26 = vadd.f32 %v2671_v35, %v2651_v33  ;;  %3077 = vrot.lane.b32.xlu1 %v3068_v45, %s3697_s18  ;;  %v3586_v33 = vld [vmem:[#allocation2 + $0x50] sm:$0xff] }
 0x60c   : > { %v2698_v43 = vpop.permute.xlu0 %2697 }
 0x60d   : > { %3436 = vst [vmem:[%s4737_s24 + $0x28] sm:$0xff] %v2675_v26  ;;  %v2700_v23 = vpop.permute.xlu1 %2699 }
 0x60e   : > { %v2705_v9 = vsel %vm376_vm0, %v2698_v43, %v2700_v23  ;;  %3079 = vrot.lane.b32.xlu0 %v3069_v53, %s3697_s18 }
 0x60f   : > { %v2709_v8 = vadd.f32 %v2705_v9, %v2685_v12  ;;  %3081 = vrot.lane.b32.xlu1 %v3070_v40, %s3697_s18  ;;  %s3444_s18 = sld [smem:[#allocation7 + $0x4e]] }
 0x610   : > { %v2702_v22 = vpop.permute.xlu0 %2701 }
 0x611   : > { %v2704_v49 = vpop.permute.xlu1 %2703 }
 0x612   : > { %v2706_v51 = vsel %vm376_vm0, %v2702_v22, %v2704_v49  ;;  %3099 = vrot.lane.b32.xlu0 %v3091_v59, %s3698_s30 }
 0x613   : > { %v2710_v60 = vadd.f32 %v2706_v51, %v2686_v50  ;;  %3101 = vrot.lane.b32.xlu1 %v3092_v38, %s3698_s30  ;;  %v3588_v38 = vld [vmem:[#allocation2 + $0x70] sm:$0xff] }
 0x614   : > { %v2722_v62 = vpop.permute.xlu0 %2721 }
 0x615   : > { %v2724_v6 = vpop.permute.xlu1 %2723  ;;  %v2790_v25 = vstv %s3444_s18 }
 0x616   : > { %v2729_v3 = vsel %vm401_vm1, %v2722_v62, %v2724_v6  ;;  %3103 = vrot.lane.b32.xlu0 %v3093_v10, %s3698_s30  ;;  %v2791_v13 = vmul.f32 %v3585_v36, %v2790_v25  ;;  %v2792_v5 = vmul.f32 %v3586_v33, %v2790_v25  ;;  %v2898_v10 = vstv %s3450_s26 }
 0x617   : > { %v2733_v15 = vadd.f32 %v2729_v3, %v2709_v8  ;;  %3105 = vrot.lane.b32.xlu1 %v3094_v55, %s3698_s30  ;;  %s3447_s30 = sld [smem:[#allocation7 + $0x51]] }
 0x618   : > { %v2726_v58 = vpop.permute.xlu0 %2725 }
 0x619   : > { %v2728_v21 = vpop.permute.xlu1 %2727  ;;  %v2739_v19 = vadd.f32 %v2737_v46, %v2733_v15 }
 0x61a   : > { %v2730_v54 = vsel %vm401_vm1, %v2726_v58, %v2728_v21 }
 0x61b   : > { %v2734_v39 = vadd.f32 %v2730_v54, %v2710_v60 }
 0x61c   : > { %v2752_v52 = vpop.permute.xlu0 %2751 }
 0x61d   : > { %v2754_v0 = vpop.permute.xlu1 %2753  ;;  %v2740_v31 = vadd.f32 %v2738_v41, %v2734_v39  ;;  %v2844_v37 = vstv %s3447_s30 }
 0x61e   : > { %v2759_v17 = vsel %vm376_vm0, %v2752_v52, %v2754_v0  ;;  %v2845_v28 = vmul.f32 %v3587_v27, %v2844_v37  ;;  %v2846_v59 = vmul.f32 %v3588_v38, %v2844_v37 }
 0x61f   : > { %v2763_v48 = vadd.f32 %v2759_v17, %v2739_v19  ;;  %v3589_v19 = vld [vmem:[#allocation2 + $0x80] sm:$0xff]  ;;  %v3590_v17 = vld [vmem:[#allocation2 + $0x90] sm:$0xff] }
 0x620   : > { %v2756_v18 = vpop.permute.xlu0 %2755  ;;  %v2899_v54 = vmul.f32 %v3589_v19, %v2898_v10 }
 0x621   : > { %v2758_v2 = vpop.permute.xlu1 %2757 }
 0x622   : > { %v2760_v44 = vsel %vm376_vm0, %v2756_v18, %v2758_v2 }
 0x623   : > { %v2764_v24 = vadd.f32 %v2760_v44, %v2740_v31 }
 0x624   : > { %v2776_v16 = vpop.permute.xlu0 %2775 }
 0x625   : > { %v2778_v29 = vpop.permute.xlu1 %2777 }
 0x626   : > { %v2783_v14 = vsel %vm401_vm1, %v2776_v16, %v2778_v29  ;;  %v2952_v16 = vstv %s3453_s29 }
 0x627   : > { %v2787_v4 = vadd.f32 %v2783_v14, %v2763_v48  ;;  %v2900_v48 = vmul.f32 %v3590_v17, %v2898_v10 }
 0x628   : > { %v2780_v57 = vpop.permute.xlu0 %2779 }
 0x629   : > { %v2782_v56 = vpop.permute.xlu1 %2781  ;;  %v2793_v32 = vadd.f32 %v2791_v13, %v2787_v4 }
 0x62a   : > { %v2784_v1 = vsel %vm401_vm1, %v2780_v57, %v2782_v56 }
 0x62b   : > { %v2788_v20 = vadd.f32 %v2784_v1, %v2764_v24 }
 0x62c   : > { %v2806_v45 = vpop.permute.xlu0 %2805 }
 0x62d   : > { %v2808_v63 = vpop.permute.xlu1 %2807  ;;  %v2794_v34 = vadd.f32 %v2792_v5, %v2788_v20 }
 0x62e   : > { %v2813_v35 = vsel %vm376_vm0, %v2806_v45, %v2808_v63 }
 0x62f   : > { %v2817_v26 = vadd.f32 %v2813_v35, %v2793_v32  ;;  %v3591_v32 = vld [vmem:[#allocation2 + $0xa0] sm:$0xff] }
 0x630   : > { %v2810_v42 = vpop.permute.xlu0 %2809  ;;  %v2953_v1 = vmul.f32 %v3591_v32, %v2952_v16 }
 0x631   : > { %v2812_v30 = vpop.permute.xlu1 %2811 }
 0x632   : > { %v2814_v43 = vsel %vm376_vm0, %v2810_v42, %v2812_v30  ;;  %v3592_v30 = vld [vmem:[#allocation2 + $0xb0] sm:$0xff] }
 0x633   : > { %v2818_v9 = vadd.f32 %v2814_v43, %v2794_v34  ;;  %v2954_v42 = vmul.f32 %v3592_v30, %v2952_v16 }
 0x634   : > { %v2830_v12 = vpop.permute.xlu0 %2829 }
 0x635   : > { %v2832_v23 = vpop.permute.xlu1 %2831 }
 0x636   : > { %v2837_v40 = vsel %vm401_vm1, %v2830_v12, %v2832_v23 }
 0x637   : > { %v2841_v53 = vadd.f32 %v2837_v40, %v2817_v26  ;;  %v3006_v40 = vstv %s3456_s6 }
 0x638   : > { %v2834_v8 = vpop.permute.xlu0 %2833 }
 0x639   : > { %v2836_v47 = vpop.permute.xlu1 %2835  ;;  %v2847_v49 = vadd.f32 %v2845_v28, %v2841_v53 }
 0x63a   : > { %v2838_v50 = vsel %vm401_vm1, %v2834_v8, %v2836_v47 }
 0x63b   : > { %v2842_v22 = vadd.f32 %v2838_v50, %v2818_v9 }
 0x63c   : > { %v2860_v60 = vpop.permute.xlu0 %2859 }
 0x63d   : > { %v2862_v51 = vpop.permute.xlu1 %2861  ;;  %v2848_v61 = vadd.f32 %v2846_v59, %v2842_v22 }
 0x63e   : > { %v2867_v55 = vsel %vm376_vm0, %v2860_v60, %v2862_v51 }
 0x63f   : > { %v2871_v3 = vadd.f32 %v2867_v55, %v2847_v49  ;;  %v3593_v49 = vld [vmem:[#allocation2 + $0xc0] sm:$0xff] }
 0x640   : > { %v2864_v62 = vpop.permute.xlu0 %2863  ;;  %v3007_v50 = vmul.f32 %v3593_v49, %v3006_v40 }
 0x641   : > { %v2866_v6 = vpop.permute.xlu1 %2865 }
 0x642   : > { %v2868_v46 = vsel %vm376_vm0, %v2864_v62, %v2866_v6  ;;  %v3594_v6 = vld [vmem:[#allocation2 + $0xd0] sm:$0xff] }
 0x643   : > { %v2872_v39 = vadd.f32 %v2868_v46, %v2848_v61  ;;  %v3008_v62 = vmul.f32 %v3594_v6, %v3006_v40 }
 0x644   : > { %v2884_v11 = vpop.permute.xlu0 %2883 }
 0x645   : > { %v2886_v15 = vpop.permute.xlu1 %2885 }
 0x646   : > { %v2891_v21 = vsel %vm401_vm1, %v2884_v11, %v2886_v15 }
 0x647   : > { %v2895_v58 = vadd.f32 %v2891_v21, %v2871_v3  ;;  %v3060_v21 = vstv %s3459_s7 }
 0x648   : > { %v2888_v41 = vpop.permute.xlu0 %2887 }
 0x649   : > { %v2890_v7 = vpop.permute.xlu1 %2889  ;;  %v2901_v0 = vadd.f32 %v2899_v54, %v2895_v58 }
 0x64a   : > { %v2892_v52 = vsel %vm401_vm1, %v2888_v41, %v2890_v7 }
 0x64b   : > { %v2896_v31 = vadd.f32 %v2892_v52, %v2872_v39 }
 0x64c   : > { %v2914_v18 = vpop.permute.xlu0 %2913 }
 0x64d   : > { %v2916_v2 = vpop.permute.xlu1 %2915  ;;  %v2902_v44 = vadd.f32 %v2900_v48, %v2896_v31 }
 0x64e   : > { %v2921_v29 = vsel %vm376_vm0, %v2914_v18, %v2916_v2 }
 0x64f   : > { %v2925_v14 = vadd.f32 %v2921_v29, %v2901_v0  ;;  %v3595_v0 = vld [vmem:[#allocation2 + $0xe0] sm:$0xff] }
 0x650   : > { %v2918_v25 = vpop.permute.xlu0 %2917  ;;  %v3061_v52 = vmul.f32 %v3595_v0, %v3060_v21 }
 0x651   : > { %v2920_v24 = vpop.permute.xlu1 %2919 }
 0x652   : > { %v2922_v13 = vsel %vm376_vm0, %v2918_v25, %v2920_v24  ;;  %v3596_v24 = vld [vmem:[#allocation2 + $0xf0] sm:$0xff] }
 0x653   : > { %v2926_v20 = vadd.f32 %v2922_v13, %v2902_v44  ;;  %v3062_v25 = vmul.f32 %v3596_v24, %v3060_v21 }
 0x654   : > { %v2938_v36 = vpop.permute.xlu0 %2937 }
 0x655   : > { %v2940_v4 = vpop.permute.xlu1 %2939 }
 0x656   : > { %v2945_v56 = vsel %vm401_vm1, %v2938_v36, %v2940_v4 }
 0x657   : > { %v2949_v57 = vadd.f32 %v2945_v56, %v2925_v14 }
 0x658   : > { %v2942_v5 = vpop.permute.xlu0 %2941 }
 0x659   : > { %v2944_v33 = vpop.permute.xlu1 %2943  ;;  %v2955_v63 = vadd.f32 %v2953_v1, %v2949_v57 }
 0x65a   : > { %v2946_v45 = vsel %vm401_vm1, %v2942_v5, %v2944_v33 }
 0x65b   : > { %v2950_v34 = vadd.f32 %v2946_v45, %v2926_v20 }
 0x65c   : > { %v2968_v37 = vpop.permute.xlu0 %2967 }
 0x65d   : > { %v2970_v35 = vpop.permute.xlu1 %2969  ;;  %v2956_v26 = vadd.f32 %v2954_v42, %v2950_v34  ;;  %v3167_v42 = vld [vmem:[%s4737_s24] sm:$0xff] (%p5315_p10) }
 0x65e   : > { %v2975_v43 = vsel %vm376_vm0, %v2968_v37, %v2970_v35  ;;  %v3169_v35 = vld [vmem:[%s4737_s24 + $0x8] sm:$0xff] (%p5315_p10)  ;;  %v3171_v37 = vld [vmem:[%s4737_s24 + $0x10] sm:$0xff] (%p5315_p10)  ;;  %3168 = vst [vmem:[%s3125_s13] sm:$0xff] (%p5315_p10), %v3167_v42 }
 0x65f   : > { %v2979_v53 = vadd.f32 %v2975_v43, %v2955_v63  ;;  %3170 = vst [vmem:[%s3125_s13 + $0x8] sm:$0xff] (%p5315_p10), %v3169_v35  ;;  %3172 = vst [vmem:[%s3125_s13 + $0x20] sm:$0xff] (%p5315_p10), %v3171_v37 }
 0x660   : > { %v2972_v12 = vpop.permute.xlu0 %2971 }
 0x661   : > { %v2974_v23 = vpop.permute.xlu1 %2973 }
 0x662   : > { %v2976_v9 = vsel %vm376_vm0, %v2972_v12, %v2974_v23  ;;  %v3175_v23 = vld [vmem:[%s4737_s24 + $0x20] sm:$0xff] (%p5315_p10)  ;;  %v3177_v12 = vld [vmem:[%s4737_s24 + $0x28] sm:$0xff] (%p5315_p10) }
 0x663   : > { %v2980_v22 = vadd.f32 %v2976_v9, %v2956_v26  ;;  %v3173_v26 = vld [vmem:[%s4737_s24 + $0x18] sm:$0xff] (%p5315_p10)  ;;  %3176 = vst [vmem:[%s3125_s13 + $0x40] sm:$0xff] (%p5315_p10), %v3175_v23  ;;  %3178 = vst [vmem:[%s3125_s13 + $0x48] sm:$0xff] (%p5315_p10), %v3177_v12 }
 0x664   : > { %v2992_v28 = vpop.permute.xlu0 %2991  ;;  %3174 = vst [vmem:[%s3125_s13 + $0x28] sm:$0xff] (%p5315_p10), %v3173_v26 }
 0x665   : > { %v2994_v27 = vpop.permute.xlu1 %2993 }
 0x666   : > { %v2999_v47 = vsel %vm401_vm1, %v2992_v28, %v2994_v27 }
 0x667   : > { %v3003_v8 = vadd.f32 %v2999_v47, %v2979_v53 }
 0x668   : > { %v2996_v59 = vpop.permute.xlu0 %2995 }
 0x669   : > { %v2998_v38 = vpop.permute.xlu1 %2997  ;;  %v3009_v51 = vadd.f32 %v3007_v50, %v3003_v8 }
 0x66a   : > { %v3000_v60 = vsel %vm401_vm1, %v2996_v59, %v2998_v38 }
 0x66b   : > { %v3004_v61 = vadd.f32 %v3000_v60, %v2980_v22 }
 0x66c   : > { %v3022_v10 = vpop.permute.xlu0 %3021 }
 0x66d   : > { %v3024_v55 = vpop.permute.xlu1 %3023  ;;  %v3010_v3 = vadd.f32 %v3008_v62, %v3004_v61 }
 0x66e   : > { %v3029_v46 = vsel %vm376_vm0, %v3022_v10, %v3024_v55 }
 0x66f   : > { %v3033_v58 = vadd.f32 %v3029_v46, %v3009_v51 }
 0x670   : > { %v3026_v11 = vpop.permute.xlu0 %3025 }
 0x671   : > { %v3028_v15 = vpop.permute.xlu1 %3027 }
 0x672   : > { %v3030_v39 = vsel %vm376_vm0, %v3026_v11, %v3028_v15 }
 0x673   : > { %v3034_v31 = vadd.f32 %v3030_v39, %v3010_v3 }
 0x674   : > { %v3046_v54 = vpop.permute.xlu0 %3045 }
 0x675   : > { %v3048_v19 = vpop.permute.xlu1 %3047 }
 0x676   : > { %v3053_v7 = vsel %vm401_vm1, %v3046_v54, %v3048_v19 }
 0x677   : > { %v3057_v41 = vadd.f32 %v3053_v7, %v3033_v58 }
 0x678   : > { %v3050_v48 = vpop.permute.xlu0 %3049 }
 0x679   : > { %v3052_v17 = vpop.permute.xlu1 %3051  ;;  %v3063_v2 = vadd.f32 %v3061_v52, %v3057_v41 }
 0x67a   : > { %v3054_v18 = vsel %vm401_vm1, %v3050_v48, %v3052_v17 }
 0x67b   : > { %v3058_v44 = vadd.f32 %v3054_v18, %v3034_v31 }
 0x67c   : > { %v3076_v16 = vpop.permute.xlu0 %3075 }
 0x67d   : > { %v3078_v29 = vpop.permute.xlu1 %3077  ;;  %v3064_v14 = vadd.f32 %v3062_v25, %v3058_v44 }
 0x67e   : > { %v3083_v13 = vsel %vm376_vm0, %v3076_v16, %v3078_v29 }
 0x67f   : > { %v3087_v56 = vadd.f32 %v3083_v13, %v3063_v2 }
 0x680   : > { %v3080_v36 = vpop.permute.xlu0 %3079 }
 0x681   : > { %v3082_v4 = vpop.permute.xlu1 %3081 }
 0x682   : > { %v3084_v1 = vsel %vm376_vm0, %v3080_v36, %v3082_v4 }
 0x683   : > { %v3088_v5 = vadd.f32 %v3084_v1, %v3064_v14 }
 0x684   : > { %v3100_v32 = vpop.permute.xlu0 %3099 }
 0x685   : > { %v3102_v57 = vpop.permute.xlu1 %3101 }
 0x686   : > { %v3107_v20 = vsel %vm401_vm1, %v3100_v32, %v3102_v57 }
 0x687   : > { %v3111_v33 = vadd.f32 %v3107_v20, %v3087_v56  ;;  %3122 = sbr.rel (!%p5315_p10) target bundleno = 1686 (0x696), region = 83 }
 0x688   : > { %v3104_v45 = vpop.permute.xlu0 %3103 }
 0x689   : > { %3462 = vst [vmem:[%s4737_s24 + $0x30] sm:$0xff] %v3111_v33  ;;  %v3106_v63 = vpop.permute.xlu1 %3105 }
 0x68a   : > { %v3108_v34 = vsel %vm401_vm1, %v3104_v45, %v3106_v63 }
 0x68b   : > { %v3112_v30 = vadd.f32 %v3108_v34, %v3088_v5 }
 0x68d   : > { %3463 = vst [vmem:[%s4737_s24 + $0x38] sm:$0xff] %v3112_v30 }
 0x690   : > { %v3179_v43 = vld [vmem:[%s4737_s24 + $0x30] sm:$0xff] }
 0x691   : > { %3180 = vst [vmem:[%s3125_s13 + $0x60] sm:$0xff] %v3179_v43 }
 0x694   : > { %v3181_v40 = vld [vmem:[%s4737_s24 + $0x38] sm:$0xff] }
 0x695   : > { %3182 = vst [vmem:[%s3125_s13 + $0x68] sm:$0xff] %v3181_v40 }
 0x696 PF: > { %p15_p12 = scmp.ge.s32.totalorder %s3750_s22, 4   ;;  %s5316_s18 = smov %s3687_s19 }
 0x697   : > { %s5317_s19 = smov %s3760_s25  ;;  %s5318_s20 = smov %s3750_s22 }
 0x698   :  { %17 = sbr.rel (!%p15_p12) target bundleno = 4 (0x4), region = 164 }
 0x69f   :  { %3198 = vsyncpa [#allocation4], 1 }
 0x6a0   :  { %3200 = vsyncpa [#allocation4 + $0x1], 1 }
 0x6a1   :  { %3201 = vsyncpa [#allocation6], 1 }
 0x6a2   :  { %3202 = vsyncpa [#allocation9], 1 }

</bundles_post_ra>
